<compile_context>
chip_gen: v7x
topology: tpu7x:2x2x1
jax: 0.10.0
libtpu: 0.0.40
codegen_flags: <defaults>
</compile_context>

<pallas_src>
import functools

import numpy as np
import jax
import jax.numpy as jnp
from jax import lax
from jax.experimental import pallas as pl
from jax.experimental.pallas import tpu as pltpu


_WEIGHT_ORDER = (
    "enc1_w", "enc1_g", "enc1_be",
    "e2_w", "e2_g", "e2_be",
    "pc2_w", "pc2_g", "pc2_be",
    "bt_w", "bt_g", "bt_be",
    "d1a_w", "d1b_w", "d1_g", "d1_be",
    "d2_w", "d2_g", "d2_be",
    "pfc_w", "pfc_b",
    "f1_wf", "f1_wz", "f1_b",
    "f2_w", "f2_b",
    "f3_w", "f3_b",
)


# ------------------------------------------------------------------ constant helper matrices

def _tap_masks(H, W):
    """(9, H*W) validity masks: mask[t, y*W+x] = 1 iff 3x3 tap t of output (y, x) is in-image."""
    m = np.zeros((9, H * W), np.float32)
    for t in range(9):
        dy, dx = t // 3 - 1, t % 3 - 1
        for y in range(H):
            for xc in range(W):
                if 0 <= y + dy < H and 0 <= xc + dx < W:
                    m[t, y * W + xc] = 1.0
    return jnp.asarray(m)


def _stride2_select(H, W):
    """(H*W, Ho*Wo) 0/1 matrix picking the stride-2 conv output positions (an MXU gather)."""
    Ho, Wo = (H + 1) // 2, (W + 1) // 2
    s = np.zeros((H * W, Ho * Wo), np.float32)
    for i in range(Ho):
        for j in range(Wo):
            s[(2 * i) * W + (2 * j), i * Wo + j] = 1.0
    return jnp.asarray(s)


def _upsample2_mat(H, W):
    """(H*W, 4*H*W) 0/1 matrix implementing nearest-neighbour x2 upsampling as a matmul."""
    Hb, Wb = 2 * H, 2 * W
    u = np.zeros((H * W, Hb * Wb), np.float32)
    for i in range(H):
        for j in range(W):
            for di in range(2):
                for dj in range(2):
                    u[i * W + j, (2 * i + di) * Wb + (2 * j + dj)] = 1.0
    return jnp.asarray(u)


# ------------------------------------------------------------------ the fused kernel

def _model_home_kernel(
    x_ref, zin_ref,
    m0_ref, m1_ref, m2_ref, s0_ref, s1_ref, ups_ref, upb_ref,
    enc1_w_ref, enc1_g_ref, enc1_b_ref,
    e2_w_ref, e2_g_ref, e2_b_ref,
    pc2_w_ref, pc2_g_ref, pc2_b_ref,
    bt_w_ref, bt_g_ref, bt_b_ref,
    d1a_w_ref, d1b_w_ref, d1_g_ref, d1_b_ref,
    d2_w_ref, d2_g_ref, d2_b_ref,
    pfc_w_ref, pfc_b_ref,
    f1_wf_ref, f1_wz_ref, f1_b_ref,
    f2_w_ref, f2_b_ref,
    f3_w_ref, f3_b_ref,
    o_ref,
    dbl_ref, stack_ref,
    *, W0, W1, W2, F1, L, seg_out, eps, slope, use_prior):

    def conv_block(parts, w_refs, g_ref, b_ref, mask_ref, sel, width):
        """3x3 conv (+optional stride-2 select) + InstanceNorm + PReLU.

        Each input part is a (Ci, HW) f32 value.  The 9 taps are masked lane-shifts,
        written into `stack_ref` so the conv is a single K=9*Ci bf16 MXU dot.
        Conv bias is omitted (cancelled exactly by the IN mean subtraction).
        """
        mask = mask_ref[...]
        acc = None
        for xp, w_ref in zip(parts, w_refs):
            ci, hw = xp.shape
            # Doubled copy -> every tap shift is an in-bounds static lane slice;
            # wrapped positions are zeroed by the per-tap validity mask.
            dbl_ref[:ci, :hw] = xp
            dbl_ref[:ci, hw:2 * hw] = xp
            for t in range(9):
                dy, dx = divmod(t, 3)
                off = (dy - 1) * width + (dx - 1)
                s = off % hw
                tap = dbl_ref[:ci, s:s + hw] * mask[t:t + 1, :]
                stack_ref[t * ci:(t + 1) * ci, :hw] = tap
            stack = stack_ref[:9 * ci, :hw].astype(jnp.bfloat16)
            d = jnp.dot(w_ref[...].astype(jnp.bfloat16), stack,
                        preferred_element_type=jnp.float32)
            acc = d if acc is None else acc + d
        if sel is not None:                       # stride-2: keep only valid output positions
            acc = jnp.dot(acc, sel, preferred_element_type=jnp.float32)
        n = float(acc.shape[1])
        mean = jnp.sum(acc, axis=1, keepdims=True) * (1.0 / n)
        msq = jnp.sum(acc * acc, axis=1, keepdims=True) * (1.0 / n)
        var = msq - mean * mean
        y = (acc - mean) * lax.rsqrt(var + eps) * g_ref[...] + b_ref[...]
        return jnp.where(y > 0.0, y, slope * y)   # PReLU (single slope, PyTorch init 0.25)

    x = x_ref[0]                                  # (Cp, H*W) f32, channel-padded input image

    # ---- stage 1: e1 and PriorNet.pc1 merged (both convolve x, stride 2) ----
    enc1 = conv_block([x], [enc1_w_ref], enc1_g_ref, enc1_b_ref, m0_ref, s0_ref[...], W0)
    d1 = enc1[:F1]                                # U-Net encoder feature     (F1, HW1)
    # ---- encoder stage 2 (stride 2) ----
    d2 = conv_block([d1], [e2_w_ref], e2_g_ref, e2_b_ref, m1_ref, s1_ref[...], W1)   # (F2, HW2)
    # ---- bottleneck residual unit (stride 1) ----
    # TODO(synk): MONAI ResidualUnit stack simplified to a single conv block + identity skip.
    bn = conv_block([d2], [bt_w_ref], bt_g_ref, bt_b_ref, m2_ref, None, W2) + d2
    # ---- decoder stage 1: nearest x2 upsample (constant matmul) + fused skip-concat conv ----
    # TODO(synk): MONAI strided transposed-conv upsampling approximated by nearest x2 + conv.
    bn_up = jnp.dot(bn, ups_ref[...], preferred_element_type=jnp.float32)            # (F2, HW1)
    u1 = conv_block([bn_up, d1], [d1a_w_ref, d1b_w_ref], d1_g_ref, d1_b_ref,
                    m1_ref, None, W1)                                                # (F1, HW1)
    # ---- decoder stage 2: nearest x2 upsample + final conv -> U-Net features ----
    u1_up = jnp.dot(u1, upb_ref[...], preferred_element_type=jnp.float32)            # (F1, HW0)
    feat = conv_block([u1_up], [d2_w_ref], d2_g_ref, d2_b_ref, m0_ref, None, W0)     # (F1, HW0)

    # ---- PriorNet tail -> z (statically skipped when sample_z is supplied) ----
    if use_prior:
        h = enc1[F1:]                             # pc1 output (F1, HW1)
        p2 = conv_block([h], [pc2_w_ref], pc2_g_ref, pc2_b_ref, m1_ref, s1_ref[...], W1)
        pooled = jnp.sum(p2, axis=1, keepdims=True) * (1.0 / float(p2.shape[1]))     # GAP (F2,1)
        stats = jnp.dot(pfc_w_ref[...], pooled,
                        preferred_element_type=jnp.float32) + pfc_b_ref[...]         # (2L, 1)
        mu, logvar = stats[:L], stats[L:]
        z = mu + jnp.exp(0.5 * logvar) * zin_ref[0]                                  # reparam.
    else:
        z = zin_ref[0]                            # externally supplied sample_z

    # ---- Fcomb: z injection (rank-1 bias) + three 1x1 convs, all lane-dense ----
    hdd = jnp.maximum(
        jnp.dot(f1_wf_ref[...], feat, preferred_element_type=jnp.float32)
        + jnp.dot(f1_wz_ref[...], z, preferred_element_type=jnp.float32)
        + f1_b_ref[...], 0.0)
    hdd = jnp.maximum(
        jnp.dot(f2_w_ref[...], hdd, preferred_element_type=jnp.float32) + f2_b_ref[...], 0.0)
    if seg_out == 1:
        # Final F1 -> 1 projection as a VPU multiply + sublane reduce (no N=1 MXU matmul).
        logits = jnp.sum(hdd * f3_w_ref[...], axis=0, keepdims=True) + f3_b_ref[...]
    else:
        logits = lax.dot_general(f3_w_ref[...], hdd, (((0,), (0,)), ((), ())),
                                 preferred_element_type=jnp.float32) + f3_b_ref[...]
    o_ref[0] = logits                             # (seg_out, H*W), lane-dense store


# ------------------------------------------------------------------ wrapper

def model_home_forward(x_nchw, params, noise, latent_dim, seg_out_channels, sample_z=None):
    """Eval-mode ModelHome.forward (inject_latent=True, training=False)."""
    x = x_nchw.astype(jnp.float32)
    B, C, H, W = x.shape
    assert H % 4 == 0 and W % 4 == 0, "two stride-2 stages require H, W divisible by 4"
    Cp = params["enc1_w"].shape[1] // 9
    F1 = params["d2_w"].shape[0]
    F2 = params["bt_w"].shape[0]
    L = latent_dim
    HW = H * W
    H1, W1 = H // 2, W // 2
    H2, W2 = H1 // 2, W1 // 2

    # Trace-time constants baked into the compiled kernel.
    m0, m1, m2 = _tap_masks(H, W), _tap_masks(H1, W1), _tap_masks(H2, W2)
    s0, s1 = _stride2_select(H, W), _stride2_select(H1, W1)
    ups, upb = _upsample2_mat(H2, W2), _upsample2_mat(H1, W1)
    consts = [m0, m1, m2, s0, s1, ups, upb]

    x_flat = jnp.pad(x.reshape(B, C, HW), ((0, 0), (0, Cp - C), (0, 0)))
    use_prior = sample_z is None
    zin = (noise if use_prior else sample_z).astype(jnp.float32).reshape(B, L, 1)
    weights = [params[k] for k in _WEIGHT_ORDER]

    def _bcast(a):
        nd = a.ndim
        return pl.BlockSpec(a.shape, lambda b, _n=nd: (0,) * _n)

    cmax = max(Cp, F1, F2)
    out = pl.pallas_call(
        functools.partial(_model_home_kernel, W0=W, W1=W1, W2=W2, F1=F1, L=L,
                          seg_out=seg_out_channels, eps=1e-5, slope=0.25,
                          use_prior=use_prior),
        grid=(B,),
        in_specs=[pl.BlockSpec((1, Cp, HW), lambda b: (b, 0, 0)),
                  pl.BlockSpec((1, L, 1), lambda b: (b, 0, 0))]
                 + [_bcast(a) for a in consts + weights],
        out_specs=pl.BlockSpec((1, seg_out_channels, HW), lambda b: (b, 0, 0)),
        out_shape=jax.ShapeDtypeStruct((B, seg_out_channels, HW), jnp.float32),
        scratch_shapes=[pltpu.VMEM((cmax, 2 * HW), jnp.float32),        # doubled activation
                        pltpu.VMEM((9 * cmax, HW), jnp.float32)],       # conv K-stack
        compiler_params=pltpu.CompilerParams(dimension_semantics=("parallel",)),
    )(x_flat, zin, *consts, *weights)
    return out.reshape(B, seg_out_channels, H, W)


# ------------------------------------------------------------------ parameters

def init_params(key, image_channels, feature_channels, latent_dim, seg_out_channels):
    F1, F2 = feature_channels
    C = image_channels
    Cp = ((C + 7) // 8) * 8                 # pad image channels so conv K-stack chunks are 8-aligned
    L = latent_dim
    keys = jax.random.split(key, 16)
    p = {}

    def conv_w(k, cout, cin, cin_pad, fan_in=None):
        fan_in = 9 * cin if fan_in is None else fan_in
        w = (1.0 / np.sqrt(float(fan_in))) * jax.random.normal(k, (cout, 9, cin), jnp.float32)
        w = jnp.pad(w, ((0, 0), (0, 0), (0, cin_pad - cin)))
        return w.reshape(cout, 9 * cin_pad)

    def dense(k, rows, cols, fan_in):
        return (1.0 / np.sqrt(float(fan_in))) * jax.random.normal(k, (rows, cols), jnp.float32)

    # stage-1 convs on the input image: U-Net e1 (rows 0:F1) and PriorNet pc1 (rows F1:2F1) merged.
    p["enc1_w"] = jnp.concatenate([conv_w(keys[0], F1, C, Cp),
                                   conv_w(keys[1], F1, C, Cp)], axis=0)
    p["enc1_g"] = jnp.ones((2 * F1, 1), jnp.float32)
    p["enc1_be"] = jnp.zeros((2 * F1, 1), jnp.float32)

    for name, k, cout, cin in (("e2", keys[2], F2, F1), ("pc2", keys[3], F2, F1),
                               ("bt", keys[4], F2, F2), ("d2", keys[5], F1, F1)):
        p[f"{name}_w"] = conv_w(k, cout, cin, cin)
        p[f"{name}_g"] = jnp.ones((cout, 1), jnp.float32)
        p[f"{name}_be"] = jnp.zeros((cout, 1), jnp.float32)

    # decoder conv 1 consumes concat(upsample(bn) [F2 ch], skip d1 [F1 ch]); weight split by input.
    p["d1a_w"] = conv_w(keys[6], F1, F2, F2, fan_in=9 * (F2 + F1))
    p["d1b_w"] = conv_w(keys[7], F1, F1, F1, fan_in=9 * (F2 + F1))
    p["d1_g"] = jnp.ones((F1, 1), jnp.float32)
    p["d1_be"] = jnp.zeros((F1, 1), jnp.float32)

    # PriorNet latent head on the globally pooled pc2 features: stats = W @ pooled + b.
    p["pfc_w"] = dense(keys[8], 2 * L, F2, F2)
    p["pfc_b"] = jnp.zeros((2 * L, 1), jnp.float32)

    # Fcomb 1x1 convs (dense over channels), stored for the (C, H*W) layout.
    p["f1_wf"] = dense(keys[9], F1, F1, F1 + L)
    p["f1_wz"] = dense(keys[10], F1, L, F1 + L)
    p["f1_b"] = jnp.zeros((F1, 1), jnp.float32)
    p["f2_w"] = dense(keys[11], F1, F1, F1)
    p["f2_b"] = jnp.zeros((F1, 1), jnp.float32)
    p["f3_w"] = dense(keys[12], F1, seg_out_channels, F1)
    p["f3_b"] = jnp.zeros((seg_out_channels, 1), jnp.float32)
    return p


# ------------------------------------------------------------------ main

if __name__ == "__main__":
    B, C_IMG, H, W = 2, 4, 16, 16
    FEATURE_CHANNELS = (8, 16)
    LATENT_DIM = 4
    SEG_OUT = 1

    root = jax.random.PRNGKey(0)
    k_param, k_x, k_eps = jax.random.split(root, 3)

    params = init_params(k_param, C_IMG, FEATURE_CHANNELS, LATENT_DIM, SEG_OUT)
    x = jax.random.normal(k_x, (B, C_IMG, H, W), jnp.float32)           # NCHW, like PyTorch
    noise = jax.random.normal(k_eps, (B, LATENT_DIM, 1), jnp.float32)   # traced eps for reparam.

    fwd = jax.jit(functools.partial(model_home_forward,
                                    latent_dim=LATENT_DIM,
                                    seg_out_channels=SEG_OUT))
    logits = fwd(x, params, noise)
    jax.block_until_ready(logits)
    assert logits.shape == (B, SEG_OUT, H, W), logits.shape
    assert bool(jnp.all(jnp.isfinite(logits))), "non-finite logits"
    print("KERNEL_OK")
</pallas_src>

<mosaic_0001>
module attributes {stable_mosaic.version = 11 : i64} {
  func.func @_model_home_kernel(%arg0: i32, %arg1: memref<1x8x256xf32, #tpu.memory_space<vmem>>, %arg2: memref<1x4x1xf32, #tpu.memory_space<vmem>>, %arg3: memref<9x256xf32, #tpu.memory_space<vmem>>, %arg4: memref<9x64xf32, #tpu.memory_space<vmem>>, %arg5: memref<9x16xf32, #tpu.memory_space<vmem>>, %arg6: memref<256x64xf32, #tpu.memory_space<vmem>>, %arg7: memref<64x16xf32, #tpu.memory_space<vmem>>, %arg8: memref<16x64xf32, #tpu.memory_space<vmem>>, %arg9: memref<64x256xf32, #tpu.memory_space<vmem>>, %arg10: memref<16x72xf32, #tpu.memory_space<vmem>>, %arg11: memref<16x1xf32, #tpu.memory_space<vmem>>, %arg12: memref<16x1xf32, #tpu.memory_space<vmem>>, %arg13: memref<16x72xf32, #tpu.memory_space<vmem>>, %arg14: memref<16x1xf32, #tpu.memory_space<vmem>>, %arg15: memref<16x1xf32, #tpu.memory_space<vmem>>, %arg16: memref<16x72xf32, #tpu.memory_space<vmem>>, %arg17: memref<16x1xf32, #tpu.memory_space<vmem>>, %arg18: memref<16x1xf32, #tpu.memory_space<vmem>>, %arg19: memref<16x144xf32, #tpu.memory_space<vmem>>, %arg20: memref<16x1xf32, #tpu.memory_space<vmem>>, %arg21: memref<16x1xf32, #tpu.memory_space<vmem>>, %arg22: memref<8x144xf32, #tpu.memory_space<vmem>>, %arg23: memref<8x72xf32, #tpu.memory_space<vmem>>, %arg24: memref<8x1xf32, #tpu.memory_space<vmem>>, %arg25: memref<8x1xf32, #tpu.memory_space<vmem>>, %arg26: memref<8x72xf32, #tpu.memory_space<vmem>>, %arg27: memref<8x1xf32, #tpu.memory_space<vmem>>, %arg28: memref<8x1xf32, #tpu.memory_space<vmem>>, %arg29: memref<8x16xf32, #tpu.memory_space<vmem>>, %arg30: memref<8x1xf32, #tpu.memory_space<vmem>>, %arg31: memref<8x8xf32, #tpu.memory_space<vmem>>, %arg32: memref<8x4xf32, #tpu.memory_space<vmem>>, %arg33: memref<8x1xf32, #tpu.memory_space<vmem>>, %arg34: memref<8x8xf32, #tpu.memory_space<vmem>>, %arg35: memref<8x1xf32, #tpu.memory_space<vmem>>, %arg36: memref<8x1xf32, #tpu.memory_space<vmem>>, %arg37: memref<1x1xf32, #tpu.memory_space<vmem>>, %arg38: memref<1x1x256xf32, #tpu.memory_space<vmem>>, %arg39: memref<16x512xf32, #tpu.memory_space<vmem>>, %arg40: memref<144x256xf32, #tpu.memory_space<vmem>>) attributes {dimension_semantics = [#tpu.dimension_semantics<parallel>], iteration_bounds = array<i64: 2>, scalar_prefetch = 0 : i64, scratch_operands = 2 : i64, tpu.core_type = #tpu.core_type<tc>, window_params = [{transform_indices = @transform_0, window_bounds = array<i64: 1, 8, 256>}, {transform_indices = @transform_1, window_bounds = array<i64: 1, 4, 1>}, {pipeline_mode = #tpu.pipeline_mode<synchronous>, transform_indices = @transform_2, window_bounds = array<i64: 9, 256>}, {pipeline_mode = #tpu.pipeline_mode<synchronous>, transform_indices = @transform_3, window_bounds = array<i64: 9, 64>}, {pipeline_mode = #tpu.pipeline_mode<synchronous>, transform_indices = @transform_4, window_bounds = array<i64: 9, 16>}, {pipeline_mode = #tpu.pipeline_mode<synchronous>, transform_indices = @transform_5, window_bounds = array<i64: 256, 64>}, {pipeline_mode = #tpu.pipeline_mode<synchronous>, transform_indices = @transform_6, window_bounds = array<i64: 64, 16>}, {pipeline_mode = #tpu.pipeline_mode<synchronous>, transform_indices = @transform_7, window_bounds = array<i64: 16, 64>}, {pipeline_mode = #tpu.pipeline_mode<synchronous>, transform_indices = @transform_8, window_bounds = array<i64: 64, 256>}, {pipeline_mode = #tpu.pipeline_mode<synchronous>, transform_indices = @transform_9, window_bounds = array<i64: 16, 72>}, {pipeline_mode = #tpu.pipeline_mode<synchronous>, transform_indices = @transform_10, window_bounds = array<i64: 16, 1>}, {pipeline_mode = #tpu.pipeline_mode<synchronous>, transform_indices = @transform_11, window_bounds = array<i64: 16, 1>}, {pipeline_mode = #tpu.pipeline_mode<synchronous>, transform_indices = @transform_12, window_bounds = array<i64: 16, 72>}, {pipeline_mode = #tpu.pipeline_mode<synchronous>, transform_indices = @transform_13, window_bounds = array<i64: 16, 1>}, {pipeline_mode = #tpu.pipeline_mode<synchronous>, transform_indices = @transform_14, window_bounds = array<i64: 16, 1>}, {pipeline_mode = #tpu.pipeline_mode<synchronous>, transform_indices = @transform_15, window_bounds = array<i64: 16, 72>}, {pipeline_mode = #tpu.pipeline_mode<synchronous>, transform_indices = @transform_16, window_bounds = array<i64: 16, 1>}, {pipeline_mode = #tpu.pipeline_mode<synchronous>, transform_indices = @transform_17, window_bounds = array<i64: 16, 1>}, {pipeline_mode = #tpu.pipeline_mode<synchronous>, transform_indices = @transform_18, window_bounds = array<i64: 16, 144>}, {pipeline_mode = #tpu.pipeline_mode<synchronous>, transform_indices = @transform_19, window_bounds = array<i64: 16, 1>}, {pipeline_mode = #tpu.pipeline_mode<synchronous>, transform_indices = @transform_20, window_bounds = array<i64: 16, 1>}, {pipeline_mode = #tpu.pipeline_mode<synchronous>, transform_indices = @transform_21, window_bounds = array<i64: 8, 144>}, {pipeline_mode = #tpu.pipeline_mode<synchronous>, transform_indices = @transform_22, window_bounds = array<i64: 8, 72>}, {pipeline_mode = #tpu.pipeline_mode<synchronous>, transform_indices = @transform_23, window_bounds = array<i64: 8, 1>}, {pipeline_mode = #tpu.pipeline_mode<synchronous>, transform_indices = @transform_24, window_bounds = array<i64: 8, 1>}, {pipeline_mode = #tpu.pipeline_mode<synchronous>, transform_indices = @transform_25, window_bounds = array<i64: 8, 72>}, {pipeline_mode = #tpu.pipeline_mode<synchronous>, transform_indices = @transform_26, window_bounds = array<i64: 8, 1>}, {pipeline_mode = #tpu.pipeline_mode<synchronous>, transform_indices = @transform_27, window_bounds = array<i64: 8, 1>}, {pipeline_mode = #tpu.pipeline_mode<synchronous>, transform_indices = @transform_28, window_bounds = array<i64: 8, 16>}, {pipeline_mode = #tpu.pipeline_mode<synchronous>, transform_indices = @transform_29, window_bounds = array<i64: 8, 1>}, {pipeline_mode = #tpu.pipeline_mode<synchronous>, transform_indices = @transform_30, window_bounds = array<i64: 8, 8>}, {pipeline_mode = #tpu.pipeline_mode<synchronous>, transform_indices = @transform_31, window_bounds = array<i64: 8, 4>}, {pipeline_mode = #tpu.pipeline_mode<synchronous>, transform_indices = @transform_32, window_bounds = array<i64: 8, 1>}, {pipeline_mode = #tpu.pipeline_mode<synchronous>, transform_indices = @transform_33, window_bounds = array<i64: 8, 8>}, {pipeline_mode = #tpu.pipeline_mode<synchronous>, transform_indices = @transform_34, window_bounds = array<i64: 8, 1>}, {pipeline_mode = #tpu.pipeline_mode<synchronous>, transform_indices = @transform_35, window_bounds = array<i64: 8, 1>}, {pipeline_mode = #tpu.pipeline_mode<synchronous>, transform_indices = @transform_36, window_bounds = array<i64: 1, 1>}, {transform_indices = @transform_37, window_bounds = array<i64: 1, 1, 256>}]} {
    %c0 = arith.constant 0 : index
    %c0_0 = arith.constant 0 : index
    %c0_1 = arith.constant 0 : index
    %0 = vector.load %arg1[%c0, %c0_0, %c0_1] : memref<1x8x256xf32, #tpu.memory_space<vmem>>, vector<1x8x256xf32>
    %1 = vector.shape_cast %0 : vector<1x8x256xf32> to vector<8x256xf32>
    %c0_2 = arith.constant 0 : index
    %c0_3 = arith.constant 0 : index
    %2 = vector.load %arg6[%c0_2, %c0_3] : memref<256x64xf32, #tpu.memory_space<vmem>>, vector<256x64xf32>
    %c0_4 = arith.constant 0 : index
    %c0_5 = arith.constant 0 : index
    %3 = vector.load %arg3[%c0_4, %c0_5] : memref<9x256xf32, #tpu.memory_space<vmem>>, vector<9x256xf32>
    %c0_6 = arith.constant 0 : index
    %c0_7 = arith.constant 0 : index
    %4 = vector.load %arg39[%c0_6, %c0_7] : memref<16x512xf32, #tpu.memory_space<vmem>>, vector<8x256xf32>
    tpu.vector_store %arg39[%c0_6, %c0_7], %1 {strides = array<i32>} : memref<16x512xf32, #tpu.memory_space<vmem>>, vector<8x256xf32>,
    %c0_8 = arith.constant 0 : index
    %c256 = arith.constant 256 : index
    %5 = vector.load %arg39[%c0_8, %c256] : memref<16x512xf32, #tpu.memory_space<vmem>>, vector<8x256xf32>
    tpu.vector_store %arg39[%c0_8, %c256], %1 {strides = array<i32>} : memref<16x512xf32, #tpu.memory_space<vmem>>, vector<8x256xf32>,
    %c0_9 = arith.constant 0 : index
    %c239 = arith.constant 239 : index
    %6 = vector.load %arg39[%c0_9, %c239] : memref<16x512xf32, #tpu.memory_space<vmem>>, vector<8x256xf32>
    %7 = vector.extract_strided_slice %3 {offsets = [0, 0], sizes = [1, 256], strides = [1, 1]} : vector<9x256xf32> to vector<1x256xf32>
    %8 = vector.broadcast %7 : vector<1x256xf32> to vector<8x256xf32>
    %9 = arith.mulf %6, %8 : vector<8x256xf32>
    %c0_10 = arith.constant 0 : index
    %c0_11 = arith.constant 0 : index
    %10 = vector.load %arg40[%c0_10, %c0_11] : memref<144x256xf32, #tpu.memory_space<vmem>>, vector<8x256xf32>
    tpu.vector_store %arg40[%c0_10, %c0_11], %9 {strides = array<i32>} : memref<144x256xf32, #tpu.memory_space<vmem>>, vector<8x256xf32>,
    %c0_12 = arith.constant 0 : index
    %c240 = arith.constant 240 : index
    %11 = vector.load %arg39[%c0_12, %c240] : memref<16x512xf32, #tpu.memory_space<vmem>>, vector<8x256xf32>
    %12 = vector.extract_strided_slice %3 {offsets = [1, 0], sizes = [1, 256], strides = [1, 1]} : vector<9x256xf32> to vector<1x256xf32>
    %13 = vector.broadcast %12 : vector<1x256xf32> to vector<8x256xf32>
    %14 = arith.mulf %11, %13 : vector<8x256xf32>
    %c8 = arith.constant 8 : index
    %c0_13 = arith.constant 0 : index
    %15 = vector.load %arg40[%c8, %c0_13] : memref<144x256xf32, #tpu.memory_space<vmem>>, vector<8x256xf32>
    tpu.vector_store %arg40[%c8, %c0_13], %14 {strides = array<i32>} : memref<144x256xf32, #tpu.memory_space<vmem>>, vector<8x256xf32>,
    %c0_14 = arith.constant 0 : index
    %c241 = arith.constant 241 : index
    %16 = vector.load %arg39[%c0_14, %c241] : memref<16x512xf32, #tpu.memory_space<vmem>>, vector<8x256xf32>
    %17 = vector.extract_strided_slice %3 {offsets = [2, 0], sizes = [1, 256], strides = [1, 1]} : vector<9x256xf32> to vector<1x256xf32>
    %18 = vector.broadcast %17 : vector<1x256xf32> to vector<8x256xf32>
    %19 = arith.mulf %16, %18 : vector<8x256xf32>
    %c16 = arith.constant 16 : index
    %c0_15 = arith.constant 0 : index
    %20 = vector.load %arg40[%c16, %c0_15] : memref<144x256xf32, #tpu.memory_space<vmem>>, vector<8x256xf32>
    tpu.vector_store %arg40[%c16, %c0_15], %19 {strides = array<i32>} : memref<144x256xf32, #tpu.memory_space<vmem>>, vector<8x256xf32>,
    %c0_16 = arith.constant 0 : index
    %c255 = arith.constant 255 : index
    %21 = vector.load %arg39[%c0_16, %c255] : memref<16x512xf32, #tpu.memory_space<vmem>>, vector<8x256xf32>
    %22 = vector.extract_strided_slice %3 {offsets = [3, 0], sizes = [1, 256], strides = [1, 1]} : vector<9x256xf32> to vector<1x256xf32>
    %23 = vector.broadcast %22 : vector<1x256xf32> to vector<8x256xf32>
    %24 = arith.mulf %21, %23 : vector<8x256xf32>
    %c24 = arith.constant 24 : index
    %c0_17 = arith.constant 0 : index
    %25 = vector.load %arg40[%c24, %c0_17] : memref<144x256xf32, #tpu.memory_space<vmem>>, vector<8x256xf32>
    tpu.vector_store %arg40[%c24, %c0_17], %24 {strides = array<i32>} : memref<144x256xf32, #tpu.memory_space<vmem>>, vector<8x256xf32>,
    %c0_18 = arith.constant 0 : index
    %c0_19 = arith.constant 0 : index
    %26 = vector.load %arg39[%c0_18, %c0_19] : memref<16x512xf32, #tpu.memory_space<vmem>>, vector<8x256xf32>
    %27 = vector.extract_strided_slice %3 {offsets = [4, 0], sizes = [1, 256], strides = [1, 1]} : vector<9x256xf32> to vector<1x256xf32>
    %28 = vector.broadcast %27 : vector<1x256xf32> to vector<8x256xf32>
    %29 = arith.mulf %26, %28 : vector<8x256xf32>
    %c32 = arith.constant 32 : index
    %c0_20 = arith.constant 0 : index
    %30 = vector.load %arg40[%c32, %c0_20] : memref<144x256xf32, #tpu.memory_space<vmem>>, vector<8x256xf32>
    tpu.vector_store %arg40[%c32, %c0_20], %29 {strides = array<i32>} : memref<144x256xf32, #tpu.memory_space<vmem>>, vector<8x256xf32>,
    %c0_21 = arith.constant 0 : index
    %c1 = arith.constant 1 : index
    %31 = vector.load %arg39[%c0_21, %c1] : memref<16x512xf32, #tpu.memory_space<vmem>>, vector<8x256xf32>
    %32 = vector.extract_strided_slice %3 {offsets = [5, 0], sizes = [1, 256], strides = [1, 1]} : vector<9x256xf32> to vector<1x256xf32>
    %33 = vector.broadcast %32 : vector<1x256xf32> to vector<8x256xf32>
    %34 = arith.mulf %31, %33 : vector<8x256xf32>
    %c40 = arith.constant 40 : index
    %c0_22 = arith.constant 0 : index
    %35 = vector.load %arg40[%c40, %c0_22] : memref<144x256xf32, #tpu.memory_space<vmem>>, vector<8x256xf32>
    tpu.vector_store %arg40[%c40, %c0_22], %34 {strides = array<i32>} : memref<144x256xf32, #tpu.memory_space<vmem>>, vector<8x256xf32>,
    %c0_23 = arith.constant 0 : index
    %c15 = arith.constant 15 : index
    %36 = vector.load %arg39[%c0_23, %c15] : memref<16x512xf32, #tpu.memory_space<vmem>>, vector<8x256xf32>
    %37 = vector.extract_strided_slice %3 {offsets = [6, 0], sizes = [1, 256], strides = [1, 1]} : vector<9x256xf32> to vector<1x256xf32>
    %38 = vector.broadcast %37 : vector<1x256xf32> to vector<8x256xf32>
    %39 = arith.mulf %36, %38 : vector<8x256xf32>
    %c48 = arith.constant 48 : index
    %c0_24 = arith.constant 0 : index
    %40 = vector.load %arg40[%c48, %c0_24] : memref<144x256xf32, #tpu.memory_space<vmem>>, vector<8x256xf32>
    tpu.vector_store %arg40[%c48, %c0_24], %39 {strides = array<i32>} : memref<144x256xf32, #tpu.memory_space<vmem>>, vector<8x256xf32>,
    %c0_25 = arith.constant 0 : index
    %c16_26 = arith.constant 16 : index
    %41 = vector.load %arg39[%c0_25, %c16_26] : memref<16x512xf32, #tpu.memory_space<vmem>>, vector<8x256xf32>
    %42 = vector.extract_strided_slice %3 {offsets = [7, 0], sizes = [1, 256], strides = [1, 1]} : vector<9x256xf32> to vector<1x256xf32>
    %43 = vector.broadcast %42 : vector<1x256xf32> to vector<8x256xf32>
    %44 = arith.mulf %41, %43 : vector<8x256xf32>
    %c56 = arith.constant 56 : index
    %c0_27 = arith.constant 0 : index
    %45 = vector.load %arg40[%c56, %c0_27] : memref<144x256xf32, #tpu.memory_space<vmem>>, vector<8x256xf32>
    tpu.vector_store %arg40[%c56, %c0_27], %44 {strides = array<i32>} : memref<144x256xf32, #tpu.memory_space<vmem>>, vector<8x256xf32>,
    %c0_28 = arith.constant 0 : index
    %c17 = arith.constant 17 : index
    %46 = vector.load %arg39[%c0_28, %c17] : memref<16x512xf32, #tpu.memory_space<vmem>>, vector<8x256xf32>
    %47 = vector.extract_strided_slice %3 {offsets = [8, 0], sizes = [1, 256], strides = [1, 1]} : vector<9x256xf32> to vector<1x256xf32>
    %48 = vector.broadcast %47 : vector<1x256xf32> to vector<8x256xf32>
    %49 = arith.mulf %46, %48 : vector<8x256xf32>
    %c64 = arith.constant 64 : index
    %c0_29 = arith.constant 0 : index
    %50 = vector.load %arg40[%c64, %c0_29] : memref<144x256xf32, #tpu.memory_space<vmem>>, vector<8x256xf32>
    tpu.vector_store %arg40[%c64, %c0_29], %49 {strides = array<i32>} : memref<144x256xf32, #tpu.memory_space<vmem>>, vector<8x256xf32>,
    %c0_30 = arith.constant 0 : index
    %c0_31 = arith.constant 0 : index
    %51 = vector.load %arg40[%c0_30, %c0_31] : memref<144x256xf32, #tpu.memory_space<vmem>>, vector<72x256xf32>
    %52 = arith.truncf %51 : vector<72x256xf32> to vector<72x256xbf16>
    %c0_32 = arith.constant 0 : index
    %c0_33 = arith.constant 0 : index
    %53 = vector.load %arg10[%c0_32, %c0_33] : memref<16x72xf32, #tpu.memory_space<vmem>>, vector<16x72xf32>
    %54 = arith.truncf %53 : vector<16x72xf32> to vector<16x72xbf16>
    %cst = arith.constant dense<0.000000e+00> : vector<16x256xf32>
    %55 = tpu.matmul %54, %52, %cst {dimension_numbers = #tpu.dot_dimension_numbers<[1], [0], [0], [1], [0, 0, 1, 1], [], []>} : vector<16x72xbf16>, vector<72x256xbf16>, vector<16x256xf32> -> vector<16x256xf32>
    %cst_34 = arith.constant dense<0.000000e+00> : vector<16x64xf32>
    %56 = tpu.matmul %55, %2, %cst_34 {dimension_numbers = #tpu.dot_dimension_numbers<[1], [0], [0], [1], [0, 0, 1, 1], [], []>} : vector<16x256xf32>, vector<256x64xf32>, vector<16x64xf32> -> vector<16x64xf32>
    %cst_35 = arith.constant dense<0.000000e+00> : vector<16xf32>
    %57 = vector.multi_reduction <add>, %56, %cst_35 [1] : vector<16x64xf32> to vector<16xf32>
    %58 = vector.shape_cast %57 : vector<16xf32> to vector<16x1xf32>
    %cst_36 = arith.constant 1.562500e-02 : f32
    %59 = vector.broadcast %cst_36 : f32 to vector<16x1xf32>
    %60 = arith.mulf %58, %59 : vector<16x1xf32>
    %61 = arith.mulf %56, %56 : vector<16x64xf32>
    %cst_37 = arith.constant dense<0.000000e+00> : vector<16xf32>
    %62 = vector.multi_reduction <add>, %61, %cst_37 [1] : vector<16x64xf32> to vector<16xf32>
    %63 = vector.shape_cast %62 : vector<16xf32> to vector<16x1xf32>
    %cst_38 = arith.constant 1.562500e-02 : f32
    %64 = vector.broadcast %cst_38 : f32 to vector<16x1xf32>
    %65 = arith.mulf %63, %64 : vector<16x1xf32>
    %66 = arith.mulf %60, %60 : vector<16x1xf32>
    %67 = arith.subf %65, %66 : vector<16x1xf32>
    %68 = vector.broadcast %60 : vector<16x1xf32> to vector<16x64xf32>
    %69 = arith.subf %56, %68 : vector<16x64xf32>
    %cst_39 = arith.constant 9.99999974E-6 : f32
    %70 = vector.broadcast %cst_39 : f32 to vector<16x1xf32>
    %71 = arith.addf %67, %70 : vector<16x1xf32>
    %72 = math.rsqrt %71 : vector<16x1xf32>
    %73 = vector.broadcast %72 : vector<16x1xf32> to vector<16x64xf32>
    %74 = arith.mulf %69, %73 : vector<16x64xf32>
    %c0_40 = arith.constant 0 : index
    %c0_41 = arith.constant 0 : index
    %75 = vector.load %arg11[%c0_40, %c0_41] : memref<16x1xf32, #tpu.memory_space<vmem>>, vector<16x1xf32>
    %76 = vector.broadcast %75 : vector<16x1xf32> to vector<16x64xf32>
    %77 = arith.mulf %74, %76 : vector<16x64xf32>
    %c0_42 = arith.constant 0 : index
    %c0_43 = arith.constant 0 : index
    %78 = vector.load %arg12[%c0_42, %c0_43] : memref<16x1xf32, #tpu.memory_space<vmem>>, vector<16x1xf32>
    %79 = vector.broadcast %78 : vector<16x1xf32> to vector<16x64xf32>
    %80 = arith.addf %77, %79 : vector<16x64xf32>
    %cst_44 = arith.constant 0.000000e+00 : f32
    %81 = vector.broadcast %cst_44 : f32 to vector<16x64xf32>
    %82 = arith.cmpf ogt, %80, %81 : vector<16x64xf32>
    %cst_45 = arith.constant 2.500000e-01 : f32
    %83 = vector.broadcast %cst_45 : f32 to vector<16x64xf32>
    %84 = arith.mulf %83, %80 : vector<16x64xf32>
    %85 = arith.select %82, %80, %84 : vector<16x64xi1>, vector<16x64xf32>
    %86 = vector.extract_strided_slice %85 {offsets = [0, 0], sizes = [8, 64], strides = [1, 1]} : vector<16x64xf32> to vector<8x64xf32>
    %c0_46 = arith.constant 0 : index
    %c0_47 = arith.constant 0 : index
    %87 = vector.load %arg7[%c0_46, %c0_47] : memref<64x16xf32, #tpu.memory_space<vmem>>, vector<64x16xf32>
    %c0_48 = arith.constant 0 : index
    %c0_49 = arith.constant 0 : index
    %88 = vector.load %arg4[%c0_48, %c0_49] : memref<9x64xf32, #tpu.memory_space<vmem>>, vector<9x64xf32>
    %c0_50 = arith.constant 0 : index
    %c0_51 = arith.constant 0 : index
    %89 = vector.load %arg39[%c0_50, %c0_51] : memref<16x512xf32, #tpu.memory_space<vmem>>, vector<8x64xf32>
    tpu.vector_store %arg39[%c0_50, %c0_51], %86 {strides = array<i32>} : memref<16x512xf32, #tpu.memory_space<vmem>>, vector<8x64xf32>,
    %c0_52 = arith.constant 0 : index
    %c64_53 = arith.constant 64 : index
    %90 = vector.load %arg39[%c0_52, %c64_53] : memref<16x512xf32, #tpu.memory_space<vmem>>, vector<8x64xf32>
    tpu.vector_store %arg39[%c0_52, %c64_53], %86 {strides = array<i32>} : memref<16x512xf32, #tpu.memory_space<vmem>>, vector<8x64xf32>,
    %c0_54 = arith.constant 0 : index
    %c55 = arith.constant 55 : index
    %91 = vector.load %arg39[%c0_54, %c55] : memref<16x512xf32, #tpu.memory_space<vmem>>, vector<8x64xf32>
    %92 = vector.extract_strided_slice %88 {offsets = [0, 0], sizes = [1, 64], strides = [1, 1]} : vector<9x64xf32> to vector<1x64xf32>
    %93 = vector.broadcast %92 : vector<1x64xf32> to vector<8x64xf32>
    %94 = arith.mulf %91, %93 : vector<8x64xf32>
    %c0_55 = arith.constant 0 : index
    %c0_56 = arith.constant 0 : index
    %95 = vector.load %arg40[%c0_55, %c0_56] : memref<144x256xf32, #tpu.memory_space<vmem>>, vector<8x64xf32>
    tpu.vector_store %arg40[%c0_55, %c0_56], %94 {strides = array<i32>} : memref<144x256xf32, #tpu.memory_space<vmem>>, vector<8x64xf32>,
    %c0_57 = arith.constant 0 : index
    %c56_58 = arith.constant 56 : index
    %96 = vector.load %arg39[%c0_57, %c56_58] : memref<16x512xf32, #tpu.memory_space<vmem>>, vector<8x64xf32>
    %97 = vector.extract_strided_slice %88 {offsets = [1, 0], sizes = [1, 64], strides = [1, 1]} : vector<9x64xf32> to vector<1x64xf32>
    %98 = vector.broadcast %97 : vector<1x64xf32> to vector<8x64xf32>
    %99 = arith.mulf %96, %98 : vector<8x64xf32>
    %c8_59 = arith.constant 8 : index
    %c0_60 = arith.constant 0 : index
    %100 = vector.load %arg40[%c8_59, %c0_60] : memref<144x256xf32, #tpu.memory_space<vmem>>, vector<8x64xf32>
    tpu.vector_store %arg40[%c8_59, %c0_60], %99 {strides = array<i32>} : memref<144x256xf32, #tpu.memory_space<vmem>>, vector<8x64xf32>,
    %c0_61 = arith.constant 0 : index
    %c57 = arith.constant 57 : index
    %101 = vector.load %arg39[%c0_61, %c57] : memref<16x512xf32, #tpu.memory_space<vmem>>, vector<8x64xf32>
    %102 = vector.extract_strided_slice %88 {offsets = [2, 0], sizes = [1, 64], strides = [1, 1]} : vector<9x64xf32> to vector<1x64xf32>
    %103 = vector.broadcast %102 : vector<1x64xf32> to vector<8x64xf32>
    %104 = arith.mulf %101, %103 : vector<8x64xf32>
    %c16_62 = arith.constant 16 : index
    %c0_63 = arith.constant 0 : index
    %105 = vector.load %arg40[%c16_62, %c0_63] : memref<144x256xf32, #tpu.memory_space<vmem>>, vector<8x64xf32>
    tpu.vector_store %arg40[%c16_62, %c0_63], %104 {strides = array<i32>} : memref<144x256xf32, #tpu.memory_space<vmem>>, vector<8x64xf32>,
    %c0_64 = arith.constant 0 : index
    %c63 = arith.constant 63 : index
    %106 = vector.load %arg39[%c0_64, %c63] : memref<16x512xf32, #tpu.memory_space<vmem>>, vector<8x64xf32>
    %107 = vector.extract_strided_slice %88 {offsets = [3, 0], sizes = [1, 64], strides = [1, 1]} : vector<9x64xf32> to vector<1x64xf32>
    %108 = vector.broadcast %107 : vector<1x64xf32> to vector<8x64xf32>
    %109 = arith.mulf %106, %108 : vector<8x64xf32>
    %c24_65 = arith.constant 24 : index
    %c0_66 = arith.constant 0 : index
    %110 = vector.load %arg40[%c24_65, %c0_66] : memref<144x256xf32, #tpu.memory_space<vmem>>, vector<8x64xf32>
    tpu.vector_store %arg40[%c24_65, %c0_66], %109 {strides = array<i32>} : memref<144x256xf32, #tpu.memory_space<vmem>>, vector<8x64xf32>,
    %c0_67 = arith.constant 0 : index
    %c0_68 = arith.constant 0 : index
    %111 = vector.load %arg39[%c0_67, %c0_68] : memref<16x512xf32, #tpu.memory_space<vmem>>, vector<8x64xf32>
    %112 = vector.extract_strided_slice %88 {offsets = [4, 0], sizes = [1, 64], strides = [1, 1]} : vector<9x64xf32> to vector<1x64xf32>
    %113 = vector.broadcast %112 : vector<1x64xf32> to vector<8x64xf32>
    %114 = arith.mulf %111, %113 : vector<8x64xf32>
    %c32_69 = arith.constant 32 : index
    %c0_70 = arith.constant 0 : index
    %115 = vector.load %arg40[%c32_69, %c0_70] : memref<144x256xf32, #tpu.memory_space<vmem>>, vector<8x64xf32>
    tpu.vector_store %arg40[%c32_69, %c0_70], %114 {strides = array<i32>} : memref<144x256xf32, #tpu.memory_space<vmem>>, vector<8x64xf32>,
    %c0_71 = arith.constant 0 : index
    %c1_72 = arith.constant 1 : index
    %116 = vector.load %arg39[%c0_71, %c1_72] : memref<16x512xf32, #tpu.memory_space<vmem>>, vector<8x64xf32>
    %117 = vector.extract_strided_slice %88 {offsets = [5, 0], sizes = [1, 64], strides = [1, 1]} : vector<9x64xf32> to vector<1x64xf32>
    %118 = vector.broadcast %117 : vector<1x64xf32> to vector<8x64xf32>
    %119 = arith.mulf %116, %118 : vector<8x64xf32>
    %c40_73 = arith.constant 40 : index
    %c0_74 = arith.constant 0 : index
    %120 = vector.load %arg40[%c40_73, %c0_74] : memref<144x256xf32, #tpu.memory_space<vmem>>, vector<8x64xf32>
    tpu.vector_store %arg40[%c40_73, %c0_74], %119 {strides = array<i32>} : memref<144x256xf32, #tpu.memory_space<vmem>>, vector<8x64xf32>,
    %c0_75 = arith.constant 0 : index
    %c7 = arith.constant 7 : index
    %121 = vector.load %arg39[%c0_75, %c7] : memref<16x512xf32, #tpu.memory_space<vmem>>, vector<8x64xf32>
    %122 = vector.extract_strided_slice %88 {offsets = [6, 0], sizes = [1, 64], strides = [1, 1]} : vector<9x64xf32> to vector<1x64xf32>
    %123 = vector.broadcast %122 : vector<1x64xf32> to vector<8x64xf32>
    %124 = arith.mulf %121, %123 : vector<8x64xf32>
    %c48_76 = arith.constant 48 : index
    %c0_77 = arith.constant 0 : index
    %125 = vector.load %arg40[%c48_76, %c0_77] : memref<144x256xf32, #tpu.memory_space<vmem>>, vector<8x64xf32>
    tpu.vector_store %arg40[%c48_76, %c0_77], %124 {strides = array<i32>} : memref<144x256xf32, #tpu.memory_space<vmem>>, vector<8x64xf32>,
    %c0_78 = arith.constant 0 : index
    %c8_79 = arith.constant 8 : index
    %126 = vector.load %arg39[%c0_78, %c8_79] : memref<16x512xf32, #tpu.memory_space<vmem>>, vector<8x64xf32>
    %127 = vector.extract_strided_slice %88 {offsets = [7, 0], sizes = [1, 64], strides = [1, 1]} : vector<9x64xf32> to vector<1x64xf32>
    %128 = vector.broadcast %127 : vector<1x64xf32> to vector<8x64xf32>
    %129 = arith.mulf %126, %128 : vector<8x64xf32>
    %c56_80 = arith.constant 56 : index
    %c0_81 = arith.constant 0 : index
    %130 = vector.load %arg40[%c56_80, %c0_81] : memref<144x256xf32, #tpu.memory_space<vmem>>, vector<8x64xf32>
    tpu.vector_store %arg40[%c56_80, %c0_81], %129 {strides = array<i32>} : memref<144x256xf32, #tpu.memory_space<vmem>>, vector<8x64xf32>,
    %c0_82 = arith.constant 0 : index
    %c9 = arith.constant 9 : index
    %131 = vector.load %arg39[%c0_82, %c9] : memref<16x512xf32, #tpu.memory_space<vmem>>, vector<8x64xf32>
    %132 = vector.extract_strided_slice %88 {offsets = [8, 0], sizes = [1, 64], strides = [1, 1]} : vector<9x64xf32> to vector<1x64xf32>
    %133 = vector.broadcast %132 : vector<1x64xf32> to vector<8x64xf32>
    %134 = arith.mulf %131, %133 : vector<8x64xf32>
    %c64_83 = arith.constant 64 : index
    %c0_84 = arith.constant 0 : index
    %135 = vector.load %arg40[%c64_83, %c0_84] : memref<144x256xf32, #tpu.memory_space<vmem>>, vector<8x64xf32>
    tpu.vector_store %arg40[%c64_83, %c0_84], %134 {strides = array<i32>} : memref<144x256xf32, #tpu.memory_space<vmem>>, vector<8x64xf32>,
    %c0_85 = arith.constant 0 : index
    %c0_86 = arith.constant 0 : index
    %136 = vector.load %arg40[%c0_85, %c0_86] : memref<144x256xf32, #tpu.memory_space<vmem>>, vector<72x64xf32>
    %137 = arith.truncf %136 : vector<72x64xf32> to vector<72x64xbf16>
    %c0_87 = arith.constant 0 : index
    %c0_88 = arith.constant 0 : index
    %138 = vector.load %arg13[%c0_87, %c0_88] : memref<16x72xf32, #tpu.memory_space<vmem>>, vector<16x72xf32>
    %139 = arith.truncf %138 : vector<16x72xf32> to vector<16x72xbf16>
    %cst_89 = arith.constant dense<0.000000e+00> : vector<16x64xf32>
    %140 = tpu.matmul %139, %137, %cst_89 {dimension_numbers = #tpu.dot_dimension_numbers<[1], [0], [0], [1], [0, 0, 1, 1], [], []>} : vector<16x72xbf16>, vector<72x64xbf16>, vector<16x64xf32> -> vector<16x64xf32>
    %cst_90 = arith.constant dense<0.000000e+00> : vector<16x16xf32>
    %141 = tpu.matmul %140, %87, %cst_90 {dimension_numbers = #tpu.dot_dimension_numbers<[1], [0], [0], [1], [0, 0, 1, 1], [], []>} : vector<16x64xf32>, vector<64x16xf32>, vector<16x16xf32> -> vector<16x16xf32>
    %cst_91 = arith.constant dense<0.000000e+00> : vector<16xf32>
    %142 = vector.multi_reduction <add>, %141, %cst_91 [1] : vector<16x16xf32> to vector<16xf32>
    %143 = vector.shape_cast %142 : vector<16xf32> to vector<16x1xf32>
    %cst_92 = arith.constant 6.250000e-02 : f32
    %144 = vector.broadcast %cst_92 : f32 to vector<16x1xf32>
    %145 = arith.mulf %143, %144 : vector<16x1xf32>
    %146 = arith.mulf %141, %141 : vector<16x16xf32>
    %cst_93 = arith.constant dense<0.000000e+00> : vector<16xf32>
    %147 = vector.multi_reduction <add>, %146, %cst_93 [1] : vector<16x16xf32> to vector<16xf32>
    %148 = vector.shape_cast %147 : vector<16xf32> to vector<16x1xf32>
    %cst_94 = arith.constant 6.250000e-02 : f32
    %149 = vector.broadcast %cst_94 : f32 to vector<16x1xf32>
    %150 = arith.mulf %148, %149 : vector<16x1xf32>
    %151 = arith.mulf %145, %145 : vector<16x1xf32>
    %152 = arith.subf %150, %151 : vector<16x1xf32>
    %153 = vector.broadcast %145 : vector<16x1xf32> to vector<16x16xf32>
    %154 = arith.subf %141, %153 : vector<16x16xf32>
    %cst_95 = arith.constant 9.99999974E-6 : f32
    %155 = vector.broadcast %cst_95 : f32 to vector<16x1xf32>
    %156 = arith.addf %152, %155 : vector<16x1xf32>
    %157 = math.rsqrt %156 : vector<16x1xf32>
    %158 = vector.broadcast %157 : vector<16x1xf32> to vector<16x16xf32>
    %159 = arith.mulf %154, %158 : vector<16x16xf32>
    %c0_96 = arith.constant 0 : index
    %c0_97 = arith.constant 0 : index
    %160 = vector.load %arg14[%c0_96, %c0_97] : memref<16x1xf32, #tpu.memory_space<vmem>>, vector<16x1xf32>
    %161 = vector.broadcast %160 : vector<16x1xf32> to vector<16x16xf32>
    %162 = arith.mulf %159, %161 : vector<16x16xf32>
    %c0_98 = arith.constant 0 : index
    %c0_99 = arith.constant 0 : index
    %163 = vector.load %arg15[%c0_98, %c0_99] : memref<16x1xf32, #tpu.memory_space<vmem>>, vector<16x1xf32>
    %164 = vector.broadcast %163 : vector<16x1xf32> to vector<16x16xf32>
    %165 = arith.addf %162, %164 : vector<16x16xf32>
    %cst_100 = arith.constant 0.000000e+00 : f32
    %166 = vector.broadcast %cst_100 : f32 to vector<16x16xf32>
    %167 = arith.cmpf ogt, %165, %166 : vector<16x16xf32>
    %cst_101 = arith.constant 2.500000e-01 : f32
    %168 = vector.broadcast %cst_101 : f32 to vector<16x16xf32>
    %169 = arith.mulf %168, %165 : vector<16x16xf32>
    %170 = arith.select %167, %165, %169 : vector<16x16xi1>, vector<16x16xf32>
    %c0_102 = arith.constant 0 : index
    %c0_103 = arith.constant 0 : index
    %171 = vector.load %arg5[%c0_102, %c0_103] : memref<9x16xf32, #tpu.memory_space<vmem>>, vector<9x16xf32>
    %c0_104 = arith.constant 0 : index
    %c0_105 = arith.constant 0 : index
    %172 = vector.load %arg39[%c0_104, %c0_105] : memref<16x512xf32, #tpu.memory_space<vmem>>, vector<16x16xf32>
    tpu.vector_store %arg39[%c0_104, %c0_105], %170 {strides = array<i32>} : memref<16x512xf32, #tpu.memory_space<vmem>>, vector<16x16xf32>,
    %c0_106 = arith.constant 0 : index
    %c16_107 = arith.constant 16 : index
    %173 = vector.load %arg39[%c0_106, %c16_107] : memref<16x512xf32, #tpu.memory_space<vmem>>, vector<16x16xf32>
    tpu.vector_store %arg39[%c0_106, %c16_107], %170 {strides = array<i32>} : memref<16x512xf32, #tpu.memory_space<vmem>>, vector<16x16xf32>,
    %c0_108 = arith.constant 0 : index
    %c11 = arith.constant 11 : index
    %174 = vector.load %arg39[%c0_108, %c11] : memref<16x512xf32, #tpu.memory_space<vmem>>, vector<16x16xf32>
    %175 = vector.extract_strided_slice %171 {offsets = [0, 0], sizes = [1, 16], strides = [1, 1]} : vector<9x16xf32> to vector<1x16xf32>
    %176 = vector.broadcast %175 : vector<1x16xf32> to vector<16x16xf32>
    %177 = arith.mulf %174, %176 : vector<16x16xf32>
    %c0_109 = arith.constant 0 : index
    %c0_110 = arith.constant 0 : index
    %178 = vector.load %arg40[%c0_109, %c0_110] : memref<144x256xf32, #tpu.memory_space<vmem>>, vector<16x16xf32>
    tpu.vector_store %arg40[%c0_109, %c0_110], %177 {strides = array<i32>} : memref<144x256xf32, #tpu.memory_space<vmem>>, vector<16x16xf32>,
    %c0_111 = arith.constant 0 : index
    %c12 = arith.constant 12 : index
    %179 = vector.load %arg39[%c0_111, %c12] : memref<16x512xf32, #tpu.memory_space<vmem>>, vector<16x16xf32>
    %180 = vector.extract_strided_slice %171 {offsets = [1, 0], sizes = [1, 16], strides = [1, 1]} : vector<9x16xf32> to vector<1x16xf32>
    %181 = vector.broadcast %180 : vector<1x16xf32> to vector<16x16xf32>
    %182 = arith.mulf %179, %181 : vector<16x16xf32>
    %c16_112 = arith.constant 16 : index
    %c0_113 = arith.constant 0 : index
    %183 = vector.load %arg40[%c16_112, %c0_113] : memref<144x256xf32, #tpu.memory_space<vmem>>, vector<16x16xf32>
    tpu.vector_store %arg40[%c16_112, %c0_113], %182 {strides = array<i32>} : memref<144x256xf32, #tpu.memory_space<vmem>>, vector<16x16xf32>,
    %c0_114 = arith.constant 0 : index
    %c13 = arith.constant 13 : index
    %184 = vector.load %arg39[%c0_114, %c13] : memref<16x512xf32, #tpu.memory_space<vmem>>, vector<16x16xf32>
    %185 = vector.extract_strided_slice %171 {offsets = [2, 0], sizes = [1, 16], strides = [1, 1]} : vector<9x16xf32> to vector<1x16xf32>
    %186 = vector.broadcast %185 : vector<1x16xf32> to vector<16x16xf32>
    %187 = arith.mulf %184, %186 : vector<16x16xf32>
    %c32_115 = arith.constant 32 : index
    %c0_116 = arith.constant 0 : index
    %188 = vector.load %arg40[%c32_115, %c0_116] : memref<144x256xf32, #tpu.memory_space<vmem>>, vector<16x16xf32>
    tpu.vector_store %arg40[%c32_115, %c0_116], %187 {strides = array<i32>} : memref<144x256xf32, #tpu.memory_space<vmem>>, vector<16x16xf32>,
    %c0_117 = arith.constant 0 : index
    %c15_118 = arith.constant 15 : index
    %189 = vector.load %arg39[%c0_117, %c15_118] : memref<16x512xf32, #tpu.memory_space<vmem>>, vector<16x16xf32>
    %190 = vector.extract_strided_slice %171 {offsets = [3, 0], sizes = [1, 16], strides = [1, 1]} : vector<9x16xf32> to vector<1x16xf32>
    %191 = vector.broadcast %190 : vector<1x16xf32> to vector<16x16xf32>
    %192 = arith.mulf %189, %191 : vector<16x16xf32>
    %c48_119 = arith.constant 48 : index
    %c0_120 = arith.constant 0 : index
    %193 = vector.load %arg40[%c48_119, %c0_120] : memref<144x256xf32, #tpu.memory_space<vmem>>, vector<16x16xf32>
    tpu.vector_store %arg40[%c48_119, %c0_120], %192 {strides = array<i32>} : memref<144x256xf32, #tpu.memory_space<vmem>>, vector<16x16xf32>,
    %c0_121 = arith.constant 0 : index
    %c0_122 = arith.constant 0 : index
    %194 = vector.load %arg39[%c0_121, %c0_122] : memref<16x512xf32, #tpu.memory_space<vmem>>, vector<16x16xf32>
    %195 = vector.extract_strided_slice %171 {offsets = [4, 0], sizes = [1, 16], strides = [1, 1]} : vector<9x16xf32> to vector<1x16xf32>
    %196 = vector.broadcast %195 : vector<1x16xf32> to vector<16x16xf32>
    %197 = arith.mulf %194, %196 : vector<16x16xf32>
    %c64_123 = arith.constant 64 : index
    %c0_124 = arith.constant 0 : index
    %198 = vector.load %arg40[%c64_123, %c0_124] : memref<144x256xf32, #tpu.memory_space<vmem>>, vector<16x16xf32>
    tpu.vector_store %arg40[%c64_123, %c0_124], %197 {strides = array<i32>} : memref<144x256xf32, #tpu.memory_space<vmem>>, vector<16x16xf32>,
    %c0_125 = arith.constant 0 : index
    %c1_126 = arith.constant 1 : index
    %199 = vector.load %arg39[%c0_125, %c1_126] : memref<16x512xf32, #tpu.memory_space<vmem>>, vector<16x16xf32>
    %200 = vector.extract_strided_slice %171 {offsets = [5, 0], sizes = [1, 16], strides = [1, 1]} : vector<9x16xf32> to vector<1x16xf32>
    %201 = vector.broadcast %200 : vector<1x16xf32> to vector<16x16xf32>
    %202 = arith.mulf %199, %201 : vector<16x16xf32>
    %c80 = arith.constant 80 : index
    %c0_127 = arith.constant 0 : index
    %203 = vector.load %arg40[%c80, %c0_127] : memref<144x256xf32, #tpu.memory_space<vmem>>, vector<16x16xf32>
    tpu.vector_store %arg40[%c80, %c0_127], %202 {strides = array<i32>} : memref<144x256xf32, #tpu.memory_space<vmem>>, vector<16x16xf32>,
    %c0_128 = arith.constant 0 : index
    %c3 = arith.constant 3 : index
    %204 = vector.load %arg39[%c0_128, %c3] : memref<16x512xf32, #tpu.memory_space<vmem>>, vector<16x16xf32>
    %205 = vector.extract_strided_slice %171 {offsets = [6, 0], sizes = [1, 16], strides = [1, 1]} : vector<9x16xf32> to vector<1x16xf32>
    %206 = vector.broadcast %205 : vector<1x16xf32> to vector<16x16xf32>
    %207 = arith.mulf %204, %206 : vector<16x16xf32>
    %c96 = arith.constant 96 : index
    %c0_129 = arith.constant 0 : index
    %208 = vector.load %arg40[%c96, %c0_129] : memref<144x256xf32, #tpu.memory_space<vmem>>, vector<16x16xf32>
    tpu.vector_store %arg40[%c96, %c0_129], %207 {strides = array<i32>} : memref<144x256xf32, #tpu.memory_space<vmem>>, vector<16x16xf32>,
    %c0_130 = arith.constant 0 : index
    %c4 = arith.constant 4 : index
    %209 = vector.load %arg39[%c0_130, %c4] : memref<16x512xf32, #tpu.memory_space<vmem>>, vector<16x16xf32>
    %210 = vector.extract_strided_slice %171 {offsets = [7, 0], sizes = [1, 16], strides = [1, 1]} : vector<9x16xf32> to vector<1x16xf32>
    %211 = vector.broadcast %210 : vector<1x16xf32> to vector<16x16xf32>
    %212 = arith.mulf %209, %211 : vector<16x16xf32>
    %c112 = arith.constant 112 : index
    %c0_131 = arith.constant 0 : index
    %213 = vector.load %arg40[%c112, %c0_131] : memref<144x256xf32, #tpu.memory_space<vmem>>, vector<16x16xf32>
    tpu.vector_store %arg40[%c112, %c0_131], %212 {strides = array<i32>} : memref<144x256xf32, #tpu.memory_space<vmem>>, vector<16x16xf32>,
    %c0_132 = arith.constant 0 : index
    %c5 = arith.constant 5 : index
    %214 = vector.load %arg39[%c0_132, %c5] : memref<16x512xf32, #tpu.memory_space<vmem>>, vector<16x16xf32>
    %215 = vector.extract_strided_slice %171 {offsets = [8, 0], sizes = [1, 16], strides = [1, 1]} : vector<9x16xf32> to vector<1x16xf32>
    %216 = vector.broadcast %215 : vector<1x16xf32> to vector<16x16xf32>
    %217 = arith.mulf %214, %216 : vector<16x16xf32>
    %c128 = arith.constant 128 : index
    %c0_133 = arith.constant 0 : index
    %218 = vector.load %arg40[%c128, %c0_133] : memref<144x256xf32, #tpu.memory_space<vmem>>, vector<16x16xf32>
    tpu.vector_store %arg40[%c128, %c0_133], %217 {strides = array<i32>} : memref<144x256xf32, #tpu.memory_space<vmem>>, vector<16x16xf32>,
    %c0_134 = arith.constant 0 : index
    %c0_135 = arith.constant 0 : index
    %219 = vector.load %arg40[%c0_134, %c0_135] : memref<144x256xf32, #tpu.memory_space<vmem>>, vector<144x16xf32>
    %220 = arith.truncf %219 : vector<144x16xf32> to vector<144x16xbf16>
    %c0_136 = arith.constant 0 : index
    %c0_137 = arith.constant 0 : index
    %221 = vector.load %arg19[%c0_136, %c0_137] : memref<16x144xf32, #tpu.memory_space<vmem>>, vector<16x144xf32>
    %222 = arith.truncf %221 : vector<16x144xf32> to vector<16x144xbf16>
    %cst_138 = arith.constant dense<0.000000e+00> : vector<16x16xf32>
    %223 = tpu.matmul %222, %220, %cst_138 {dimension_numbers = #tpu.dot_dimension_numbers<[1], [0], [0], [1], [0, 0, 1, 1], [], []>} : vector<16x144xbf16>, vector<144x16xbf16>, vector<16x16xf32> -> vector<16x16xf32>
    %cst_139 = arith.constant dense<0.000000e+00> : vector<16xf32>
    %224 = vector.multi_reduction <add>, %223, %cst_139 [1] : vector<16x16xf32> to vector<16xf32>
    %225 = vector.shape_cast %224 : vector<16xf32> to vector<16x1xf32>
    %cst_140 = arith.constant 6.250000e-02 : f32
    %226 = vector.broadcast %cst_140 : f32 to vector<16x1xf32>
    %227 = arith.mulf %225, %226 : vector<16x1xf32>
    %228 = arith.mulf %223, %223 : vector<16x16xf32>
    %cst_141 = arith.constant dense<0.000000e+00> : vector<16xf32>
    %229 = vector.multi_reduction <add>, %228, %cst_141 [1] : vector<16x16xf32> to vector<16xf32>
    %230 = vector.shape_cast %229 : vector<16xf32> to vector<16x1xf32>
    %cst_142 = arith.constant 6.250000e-02 : f32
    %231 = vector.broadcast %cst_142 : f32 to vector<16x1xf32>
    %232 = arith.mulf %230, %231 : vector<16x1xf32>
    %233 = arith.mulf %227, %227 : vector<16x1xf32>
    %234 = arith.subf %232, %233 : vector<16x1xf32>
    %235 = vector.broadcast %227 : vector<16x1xf32> to vector<16x16xf32>
    %236 = arith.subf %223, %235 : vector<16x16xf32>
    %cst_143 = arith.constant 9.99999974E-6 : f32
    %237 = vector.broadcast %cst_143 : f32 to vector<16x1xf32>
    %238 = arith.addf %234, %237 : vector<16x1xf32>
    %239 = math.rsqrt %238 : vector<16x1xf32>
    %240 = vector.broadcast %239 : vector<16x1xf32> to vector<16x16xf32>
    %241 = arith.mulf %236, %240 : vector<16x16xf32>
    %c0_144 = arith.constant 0 : index
    %c0_145 = arith.constant 0 : index
    %242 = vector.load %arg20[%c0_144, %c0_145] : memref<16x1xf32, #tpu.memory_space<vmem>>, vector<16x1xf32>
    %243 = vector.broadcast %242 : vector<16x1xf32> to vector<16x16xf32>
    %244 = arith.mulf %241, %243 : vector<16x16xf32>
    %c0_146 = arith.constant 0 : index
    %c0_147 = arith.constant 0 : index
    %245 = vector.load %arg21[%c0_146, %c0_147] : memref<16x1xf32, #tpu.memory_space<vmem>>, vector<16x1xf32>
    %246 = vector.broadcast %245 : vector<16x1xf32> to vector<16x16xf32>
    %247 = arith.addf %244, %246 : vector<16x16xf32>
    %cst_148 = arith.constant 0.000000e+00 : f32
    %248 = vector.broadcast %cst_148 : f32 to vector<16x16xf32>
    %249 = arith.cmpf ogt, %247, %248 : vector<16x16xf32>
    %cst_149 = arith.constant 2.500000e-01 : f32
    %250 = vector.broadcast %cst_149 : f32 to vector<16x16xf32>
    %251 = arith.mulf %250, %247 : vector<16x16xf32>
    %252 = arith.select %249, %247, %251 : vector<16x16xi1>, vector<16x16xf32>
    %253 = arith.addf %252, %170 : vector<16x16xf32>
    %c0_150 = arith.constant 0 : index
    %c0_151 = arith.constant 0 : index
    %254 = vector.load %arg8[%c0_150, %c0_151] : memref<16x64xf32, #tpu.memory_space<vmem>>, vector<16x64xf32>
    %cst_152 = arith.constant dense<0.000000e+00> : vector<16x64xf32>
    %255 = tpu.matmul %253, %254, %cst_152 {dimension_numbers = #tpu.dot_dimension_numbers<[1], [0], [0], [1], [0, 0, 1, 1], [], []>} : vector<16x16xf32>, vector<16x64xf32>, vector<16x64xf32> -> vector<16x64xf32>
    %c0_153 = arith.constant 0 : index
    %c0_154 = arith.constant 0 : index
    %256 = vector.load %arg4[%c0_153, %c0_154] : memref<9x64xf32, #tpu.memory_space<vmem>>, vector<9x64xf32>
    %c0_155 = arith.constant 0 : index
    %c0_156 = arith.constant 0 : index
    %257 = vector.load %arg39[%c0_155, %c0_156] : memref<16x512xf32, #tpu.memory_space<vmem>>, vector<16x64xf32>
    tpu.vector_store %arg39[%c0_155, %c0_156], %255 {strides = array<i32>} : memref<16x512xf32, #tpu.memory_space<vmem>>, vector<16x64xf32>,
    %c0_157 = arith.constant 0 : index
    %c64_158 = arith.constant 64 : index
    %258 = vector.load %arg39[%c0_157, %c64_158] : memref<16x512xf32, #tpu.memory_space<vmem>>, vector<16x64xf32>
    tpu.vector_store %arg39[%c0_157, %c64_158], %255 {strides = array<i32>} : memref<16x512xf32, #tpu.memory_space<vmem>>, vector<16x64xf32>,
    %c0_159 = arith.constant 0 : index
    %c55_160 = arith.constant 55 : index
    %259 = vector.load %arg39[%c0_159, %c55_160] : memref<16x512xf32, #tpu.memory_space<vmem>>, vector<16x64xf32>
    %260 = vector.extract_strided_slice %256 {offsets = [0, 0], sizes = [1, 64], strides = [1, 1]} : vector<9x64xf32> to vector<1x64xf32>
    %261 = vector.broadcast %260 : vector<1x64xf32> to vector<16x64xf32>
    %262 = arith.mulf %259, %261 : vector<16x64xf32>
    %c0_161 = arith.constant 0 : index
    %c0_162 = arith.constant 0 : index
    %263 = vector.load %arg40[%c0_161, %c0_162] : memref<144x256xf32, #tpu.memory_space<vmem>>, vector<16x64xf32>
    tpu.vector_store %arg40[%c0_161, %c0_162], %262 {strides = array<i32>} : memref<144x256xf32, #tpu.memory_space<vmem>>, vector<16x64xf32>,
    %c0_163 = arith.constant 0 : index
    %c56_164 = arith.constant 56 : index
    %264 = vector.load %arg39[%c0_163, %c56_164] : memref<16x512xf32, #tpu.memory_space<vmem>>, vector<16x64xf32>
    %265 = vector.extract_strided_slice %256 {offsets = [1, 0], sizes = [1, 64], strides = [1, 1]} : vector<9x64xf32> to vector<1x64xf32>
    %266 = vector.broadcast %265 : vector<1x64xf32> to vector<16x64xf32>
    %267 = arith.mulf %264, %266 : vector<16x64xf32>
    %c16_165 = arith.constant 16 : index
    %c0_166 = arith.constant 0 : index
    %268 = vector.load %arg40[%c16_165, %c0_166] : memref<144x256xf32, #tpu.memory_space<vmem>>, vector<16x64xf32>
    tpu.vector_store %arg40[%c16_165, %c0_166], %267 {strides = array<i32>} : memref<144x256xf32, #tpu.memory_space<vmem>>, vector<16x64xf32>,
    %c0_167 = arith.constant 0 : index
    %c57_168 = arith.constant 57 : index
    %269 = vector.load %arg39[%c0_167, %c57_168] : memref<16x512xf32, #tpu.memory_space<vmem>>, vector<16x64xf32>
    %270 = vector.extract_strided_slice %256 {offsets = [2, 0], sizes = [1, 64], strides = [1, 1]} : vector<9x64xf32> to vector<1x64xf32>
    %271 = vector.broadcast %270 : vector<1x64xf32> to vector<16x64xf32>
    %272 = arith.mulf %269, %271 : vector<16x64xf32>
    %c32_169 = arith.constant 32 : index
    %c0_170 = arith.constant 0 : index
    %273 = vector.load %arg40[%c32_169, %c0_170] : memref<144x256xf32, #tpu.memory_space<vmem>>, vector<16x64xf32>
    tpu.vector_store %arg40[%c32_169, %c0_170], %272 {strides = array<i32>} : memref<144x256xf32, #tpu.memory_space<vmem>>, vector<16x64xf32>,
    %c0_171 = arith.constant 0 : index
    %c63_172 = arith.constant 63 : index
    %274 = vector.load %arg39[%c0_171, %c63_172] : memref<16x512xf32, #tpu.memory_space<vmem>>, vector<16x64xf32>
    %275 = vector.extract_strided_slice %256 {offsets = [3, 0], sizes = [1, 64], strides = [1, 1]} : vector<9x64xf32> to vector<1x64xf32>
    %276 = vector.broadcast %275 : vector<1x64xf32> to vector<16x64xf32>
    %277 = arith.mulf %274, %276 : vector<16x64xf32>
    %c48_173 = arith.constant 48 : index
    %c0_174 = arith.constant 0 : index
    %278 = vector.load %arg40[%c48_173, %c0_174] : memref<144x256xf32, #tpu.memory_space<vmem>>, vector<16x64xf32>
    tpu.vector_store %arg40[%c48_173, %c0_174], %277 {strides = array<i32>} : memref<144x256xf32, #tpu.memory_space<vmem>>, vector<16x64xf32>,
    %c0_175 = arith.constant 0 : index
    %c0_176 = arith.constant 0 : index
    %279 = vector.load %arg39[%c0_175, %c0_176] : memref<16x512xf32, #tpu.memory_space<vmem>>, vector<16x64xf32>
    %280 = vector.extract_strided_slice %256 {offsets = [4, 0], sizes = [1, 64], strides = [1, 1]} : vector<9x64xf32> to vector<1x64xf32>
    %281 = vector.broadcast %280 : vector<1x64xf32> to vector<16x64xf32>
    %282 = arith.mulf %279, %281 : vector<16x64xf32>
    %c64_177 = arith.constant 64 : index
    %c0_178 = arith.constant 0 : index
    %283 = vector.load %arg40[%c64_177, %c0_178] : memref<144x256xf32, #tpu.memory_space<vmem>>, vector<16x64xf32>
    tpu.vector_store %arg40[%c64_177, %c0_178], %282 {strides = array<i32>} : memref<144x256xf32, #tpu.memory_space<vmem>>, vector<16x64xf32>,
    %c0_179 = arith.constant 0 : index
    %c1_180 = arith.constant 1 : index
    %284 = vector.load %arg39[%c0_179, %c1_180] : memref<16x512xf32, #tpu.memory_space<vmem>>, vector<16x64xf32>
    %285 = vector.extract_strided_slice %256 {offsets = [5, 0], sizes = [1, 64], strides = [1, 1]} : vector<9x64xf32> to vector<1x64xf32>
    %286 = vector.broadcast %285 : vector<1x64xf32> to vector<16x64xf32>
    %287 = arith.mulf %284, %286 : vector<16x64xf32>
    %c80_181 = arith.constant 80 : index
    %c0_182 = arith.constant 0 : index
    %288 = vector.load %arg40[%c80_181, %c0_182] : memref<144x256xf32, #tpu.memory_space<vmem>>, vector<16x64xf32>
    tpu.vector_store %arg40[%c80_181, %c0_182], %287 {strides = array<i32>} : memref<144x256xf32, #tpu.memory_space<vmem>>, vector<16x64xf32>,
    %c0_183 = arith.constant 0 : index
    %c7_184 = arith.constant 7 : index
    %289 = vector.load %arg39[%c0_183, %c7_184] : memref<16x512xf32, #tpu.memory_space<vmem>>, vector<16x64xf32>
    %290 = vector.extract_strided_slice %256 {offsets = [6, 0], sizes = [1, 64], strides = [1, 1]} : vector<9x64xf32> to vector<1x64xf32>
    %291 = vector.broadcast %290 : vector<1x64xf32> to vector<16x64xf32>
    %292 = arith.mulf %289, %291 : vector<16x64xf32>
    %c96_185 = arith.constant 96 : index
    %c0_186 = arith.constant 0 : index
    %293 = vector.load %arg40[%c96_185, %c0_186] : memref<144x256xf32, #tpu.memory_space<vmem>>, vector<16x64xf32>
    tpu.vector_store %arg40[%c96_185, %c0_186], %292 {strides = array<i32>} : memref<144x256xf32, #tpu.memory_space<vmem>>, vector<16x64xf32>,
    %c0_187 = arith.constant 0 : index
    %c8_188 = arith.constant 8 : index
    %294 = vector.load %arg39[%c0_187, %c8_188] : memref<16x512xf32, #tpu.memory_space<vmem>>, vector<16x64xf32>
    %295 = vector.extract_strided_slice %256 {offsets = [7, 0], sizes = [1, 64], strides = [1, 1]} : vector<9x64xf32> to vector<1x64xf32>
    %296 = vector.broadcast %295 : vector<1x64xf32> to vector<16x64xf32>
    %297 = arith.mulf %294, %296 : vector<16x64xf32>
    %c112_189 = arith.constant 112 : index
    %c0_190 = arith.constant 0 : index
    %298 = vector.load %arg40[%c112_189, %c0_190] : memref<144x256xf32, #tpu.memory_space<vmem>>, vector<16x64xf32>
    tpu.vector_store %arg40[%c112_189, %c0_190], %297 {strides = array<i32>} : memref<144x256xf32, #tpu.memory_space<vmem>>, vector<16x64xf32>,
    %c0_191 = arith.constant 0 : index
    %c9_192 = arith.constant 9 : index
    %299 = vector.load %arg39[%c0_191, %c9_192] : memref<16x512xf32, #tpu.memory_space<vmem>>, vector<16x64xf32>
    %300 = vector.extract_strided_slice %256 {offsets = [8, 0], sizes = [1, 64], strides = [1, 1]} : vector<9x64xf32> to vector<1x64xf32>
    %301 = vector.broadcast %300 : vector<1x64xf32> to vector<16x64xf32>
    %302 = arith.mulf %299, %301 : vector<16x64xf32>
    %c128_193 = arith.constant 128 : index
    %c0_194 = arith.constant 0 : index
    %303 = vector.load %arg40[%c128_193, %c0_194] : memref<144x256xf32, #tpu.memory_space<vmem>>, vector<16x64xf32>
    tpu.vector_store %arg40[%c128_193, %c0_194], %302 {strides = array<i32>} : memref<144x256xf32, #tpu.memory_space<vmem>>, vector<16x64xf32>,
    %c0_195 = arith.constant 0 : index
    %c0_196 = arith.constant 0 : index
    %304 = vector.load %arg40[%c0_195, %c0_196] : memref<144x256xf32, #tpu.memory_space<vmem>>, vector<144x64xf32>
    %305 = arith.truncf %304 : vector<144x64xf32> to vector<144x64xbf16>
    %c0_197 = arith.constant 0 : index
    %c0_198 = arith.constant 0 : index
    %306 = vector.load %arg22[%c0_197, %c0_198] : memref<8x144xf32, #tpu.memory_space<vmem>>, vector<8x144xf32>
    %307 = arith.truncf %306 : vector<8x144xf32> to vector<8x144xbf16>
    %cst_199 = arith.constant dense<0.000000e+00> : vector<8x64xf32>
    %308 = tpu.matmul %307, %305, %cst_199 {dimension_numbers = #tpu.dot_dimension_numbers<[1], [0], [0], [1], [0, 0, 1, 1], [], []>} : vector<8x144xbf16>, vector<144x64xbf16>, vector<8x64xf32> -> vector<8x64xf32>
    %c0_200 = arith.constant 0 : index
    %c0_201 = arith.constant 0 : index
    %309 = vector.load %arg39[%c0_200, %c0_201] : memref<16x512xf32, #tpu.memory_space<vmem>>, vector<8x64xf32>
    tpu.vector_store %arg39[%c0_200, %c0_201], %86 {strides = array<i32>} : memref<16x512xf32, #tpu.memory_space<vmem>>, vector<8x64xf32>,
    %c0_202 = arith.constant 0 : index
    %c64_203 = arith.constant 64 : index
    %310 = vector.load %arg39[%c0_202, %c64_203] : memref<16x512xf32, #tpu.memory_space<vmem>>, vector<8x64xf32>
    tpu.vector_store %arg39[%c0_202, %c64_203], %86 {strides = array<i32>} : memref<16x512xf32, #tpu.memory_space<vmem>>, vector<8x64xf32>,
    %c0_204 = arith.constant 0 : index
    %c55_205 = arith.constant 55 : index
    %311 = vector.load %arg39[%c0_204, %c55_205] : memref<16x512xf32, #tpu.memory_space<vmem>>, vector<8x64xf32>
    %312 = vector.extract_strided_slice %256 {offsets = [0, 0], sizes = [1, 64], strides = [1, 1]} : vector<9x64xf32> to vector<1x64xf32>
    %313 = vector.broadcast %312 : vector<1x64xf32> to vector<8x64xf32>
    %314 = arith.mulf %311, %313 : vector<8x64xf32>
    %c0_206 = arith.constant 0 : index
    %c0_207 = arith.constant 0 : index
    %315 = vector.load %arg40[%c0_206, %c0_207] : memref<144x256xf32, #tpu.memory_space<vmem>>, vector<8x64xf32>
    tpu.vector_store %arg40[%c0_206, %c0_207], %314 {strides = array<i32>} : memref<144x256xf32, #tpu.memory_space<vmem>>, vector<8x64xf32>,
    %c0_208 = arith.constant 0 : index
    %c56_209 = arith.constant 56 : index
    %316 = vector.load %arg39[%c0_208, %c56_209] : memref<16x512xf32, #tpu.memory_space<vmem>>, vector<8x64xf32>
    %317 = vector.extract_strided_slice %256 {offsets = [1, 0], sizes = [1, 64], strides = [1, 1]} : vector<9x64xf32> to vector<1x64xf32>
    %318 = vector.broadcast %317 : vector<1x64xf32> to vector<8x64xf32>
    %319 = arith.mulf %316, %318 : vector<8x64xf32>
    %c8_210 = arith.constant 8 : index
    %c0_211 = arith.constant 0 : index
    %320 = vector.load %arg40[%c8_210, %c0_211] : memref<144x256xf32, #tpu.memory_space<vmem>>, vector<8x64xf32>
    tpu.vector_store %arg40[%c8_210, %c0_211], %319 {strides = array<i32>} : memref<144x256xf32, #tpu.memory_space<vmem>>, vector<8x64xf32>,
    %c0_212 = arith.constant 0 : index
    %c57_213 = arith.constant 57 : index
    %321 = vector.load %arg39[%c0_212, %c57_213] : memref<16x512xf32, #tpu.memory_space<vmem>>, vector<8x64xf32>
    %322 = vector.extract_strided_slice %256 {offsets = [2, 0], sizes = [1, 64], strides = [1, 1]} : vector<9x64xf32> to vector<1x64xf32>
    %323 = vector.broadcast %322 : vector<1x64xf32> to vector<8x64xf32>
    %324 = arith.mulf %321, %323 : vector<8x64xf32>
    %c16_214 = arith.constant 16 : index
    %c0_215 = arith.constant 0 : index
    %325 = vector.load %arg40[%c16_214, %c0_215] : memref<144x256xf32, #tpu.memory_space<vmem>>, vector<8x64xf32>
    tpu.vector_store %arg40[%c16_214, %c0_215], %324 {strides = array<i32>} : memref<144x256xf32, #tpu.memory_space<vmem>>, vector<8x64xf32>,
    %c0_216 = arith.constant 0 : index
    %c63_217 = arith.constant 63 : index
    %326 = vector.load %arg39[%c0_216, %c63_217] : memref<16x512xf32, #tpu.memory_space<vmem>>, vector<8x64xf32>
    %327 = vector.extract_strided_slice %256 {offsets = [3, 0], sizes = [1, 64], strides = [1, 1]} : vector<9x64xf32> to vector<1x64xf32>
    %328 = vector.broadcast %327 : vector<1x64xf32> to vector<8x64xf32>
    %329 = arith.mulf %326, %328 : vector<8x64xf32>
    %c24_218 = arith.constant 24 : index
    %c0_219 = arith.constant 0 : index
    %330 = vector.load %arg40[%c24_218, %c0_219] : memref<144x256xf32, #tpu.memory_space<vmem>>, vector<8x64xf32>
    tpu.vector_store %arg40[%c24_218, %c0_219], %329 {strides = array<i32>} : memref<144x256xf32, #tpu.memory_space<vmem>>, vector<8x64xf32>,
    %c0_220 = arith.constant 0 : index
    %c0_221 = arith.constant 0 : index
    %331 = vector.load %arg39[%c0_220, %c0_221] : memref<16x512xf32, #tpu.memory_space<vmem>>, vector<8x64xf32>
    %332 = vector.extract_strided_slice %256 {offsets = [4, 0], sizes = [1, 64], strides = [1, 1]} : vector<9x64xf32> to vector<1x64xf32>
    %333 = vector.broadcast %332 : vector<1x64xf32> to vector<8x64xf32>
    %334 = arith.mulf %331, %333 : vector<8x64xf32>
    %c32_222 = arith.constant 32 : index
    %c0_223 = arith.constant 0 : index
    %335 = vector.load %arg40[%c32_222, %c0_223] : memref<144x256xf32, #tpu.memory_space<vmem>>, vector<8x64xf32>
    tpu.vector_store %arg40[%c32_222, %c0_223], %334 {strides = array<i32>} : memref<144x256xf32, #tpu.memory_space<vmem>>, vector<8x64xf32>,
    %c0_224 = arith.constant 0 : index
    %c1_225 = arith.constant 1 : index
    %336 = vector.load %arg39[%c0_224, %c1_225] : memref<16x512xf32, #tpu.memory_space<vmem>>, vector<8x64xf32>
    %337 = vector.extract_strided_slice %256 {offsets = [5, 0], sizes = [1, 64], strides = [1, 1]} : vector<9x64xf32> to vector<1x64xf32>
    %338 = vector.broadcast %337 : vector<1x64xf32> to vector<8x64xf32>
    %339 = arith.mulf %336, %338 : vector<8x64xf32>
    %c40_226 = arith.constant 40 : index
    %c0_227 = arith.constant 0 : index
    %340 = vector.load %arg40[%c40_226, %c0_227] : memref<144x256xf32, #tpu.memory_space<vmem>>, vector<8x64xf32>
    tpu.vector_store %arg40[%c40_226, %c0_227], %339 {strides = array<i32>} : memref<144x256xf32, #tpu.memory_space<vmem>>, vector<8x64xf32>,
    %c0_228 = arith.constant 0 : index
    %c7_229 = arith.constant 7 : index
    %341 = vector.load %arg39[%c0_228, %c7_229] : memref<16x512xf32, #tpu.memory_space<vmem>>, vector<8x64xf32>
    %342 = vector.extract_strided_slice %256 {offsets = [6, 0], sizes = [1, 64], strides = [1, 1]} : vector<9x64xf32> to vector<1x64xf32>
    %343 = vector.broadcast %342 : vector<1x64xf32> to vector<8x64xf32>
    %344 = arith.mulf %341, %343 : vector<8x64xf32>
    %c48_230 = arith.constant 48 : index
    %c0_231 = arith.constant 0 : index
    %345 = vector.load %arg40[%c48_230, %c0_231] : memref<144x256xf32, #tpu.memory_space<vmem>>, vector<8x64xf32>
    tpu.vector_store %arg40[%c48_230, %c0_231], %344 {strides = array<i32>} : memref<144x256xf32, #tpu.memory_space<vmem>>, vector<8x64xf32>,
    %c0_232 = arith.constant 0 : index
    %c8_233 = arith.constant 8 : index
    %346 = vector.load %arg39[%c0_232, %c8_233] : memref<16x512xf32, #tpu.memory_space<vmem>>, vector<8x64xf32>
    %347 = vector.extract_strided_slice %256 {offsets = [7, 0], sizes = [1, 64], strides = [1, 1]} : vector<9x64xf32> to vector<1x64xf32>
    %348 = vector.broadcast %347 : vector<1x64xf32> to vector<8x64xf32>
    %349 = arith.mulf %346, %348 : vector<8x64xf32>
    %c56_234 = arith.constant 56 : index
    %c0_235 = arith.constant 0 : index
    %350 = vector.load %arg40[%c56_234, %c0_235] : memref<144x256xf32, #tpu.memory_space<vmem>>, vector<8x64xf32>
    tpu.vector_store %arg40[%c56_234, %c0_235], %349 {strides = array<i32>} : memref<144x256xf32, #tpu.memory_space<vmem>>, vector<8x64xf32>,
    %c0_236 = arith.constant 0 : index
    %c9_237 = arith.constant 9 : index
    %351 = vector.load %arg39[%c0_236, %c9_237] : memref<16x512xf32, #tpu.memory_space<vmem>>, vector<8x64xf32>
    %352 = vector.extract_strided_slice %256 {offsets = [8, 0], sizes = [1, 64], strides = [1, 1]} : vector<9x64xf32> to vector<1x64xf32>
    %353 = vector.broadcast %352 : vector<1x64xf32> to vector<8x64xf32>
    %354 = arith.mulf %351, %353 : vector<8x64xf32>
    %c64_238 = arith.constant 64 : index
    %c0_239 = arith.constant 0 : index
    %355 = vector.load %arg40[%c64_238, %c0_239] : memref<144x256xf32, #tpu.memory_space<vmem>>, vector<8x64xf32>
    tpu.vector_store %arg40[%c64_238, %c0_239], %354 {strides = array<i32>} : memref<144x256xf32, #tpu.memory_space<vmem>>, vector<8x64xf32>,
    %c0_240 = arith.constant 0 : index
    %c0_241 = arith.constant 0 : index
    %356 = vector.load %arg40[%c0_240, %c0_241] : memref<144x256xf32, #tpu.memory_space<vmem>>, vector<72x64xf32>
    %357 = arith.truncf %356 : vector<72x64xf32> to vector<72x64xbf16>
    %c0_242 = arith.constant 0 : index
    %c0_243 = arith.constant 0 : index
    %358 = vector.load %arg23[%c0_242, %c0_243] : memref<8x72xf32, #tpu.memory_space<vmem>>, vector<8x72xf32>
    %359 = arith.truncf %358 : vector<8x72xf32> to vector<8x72xbf16>
    %cst_244 = arith.constant dense<0.000000e+00> : vector<8x64xf32>
    %360 = tpu.matmul %359, %357, %cst_244 {dimension_numbers = #tpu.dot_dimension_numbers<[1], [0], [0], [1], [0, 0, 1, 1], [], []>} : vector<8x72xbf16>, vector<72x64xbf16>, vector<8x64xf32> -> vector<8x64xf32>
    %361 = arith.addf %308, %360 : vector<8x64xf32>
    %cst_245 = arith.constant dense<0.000000e+00> : vector<8xf32>
    %362 = vector.multi_reduction <add>, %361, %cst_245 [1] : vector<8x64xf32> to vector<8xf32>
    %363 = vector.shape_cast %362 : vector<8xf32> to vector<8x1xf32>
    %cst_246 = arith.constant 1.562500e-02 : f32
    %364 = vector.broadcast %cst_246 : f32 to vector<8x1xf32>
    %365 = arith.mulf %363, %364 : vector<8x1xf32>
    %366 = arith.mulf %361, %361 : vector<8x64xf32>
    %cst_247 = arith.constant dense<0.000000e+00> : vector<8xf32>
    %367 = vector.multi_reduction <add>, %366, %cst_247 [1] : vector<8x64xf32> to vector<8xf32>
    %368 = vector.shape_cast %367 : vector<8xf32> to vector<8x1xf32>
    %cst_248 = arith.constant 1.562500e-02 : f32
    %369 = vector.broadcast %cst_248 : f32 to vector<8x1xf32>
    %370 = arith.mulf %368, %369 : vector<8x1xf32>
    %371 = arith.mulf %365, %365 : vector<8x1xf32>
    %372 = arith.subf %370, %371 : vector<8x1xf32>
    %373 = vector.broadcast %365 : vector<8x1xf32> to vector<8x64xf32>
    %374 = arith.subf %361, %373 : vector<8x64xf32>
    %cst_249 = arith.constant 9.99999974E-6 : f32
    %375 = vector.broadcast %cst_249 : f32 to vector<8x1xf32>
    %376 = arith.addf %372, %375 : vector<8x1xf32>
    %377 = math.rsqrt %376 : vector<8x1xf32>
    %378 = vector.broadcast %377 : vector<8x1xf32> to vector<8x64xf32>
    %379 = arith.mulf %374, %378 : vector<8x64xf32>
    %c0_250 = arith.constant 0 : index
    %c0_251 = arith.constant 0 : index
    %380 = vector.load %arg24[%c0_250, %c0_251] : memref<8x1xf32, #tpu.memory_space<vmem>>, vector<8x1xf32>
    %381 = vector.broadcast %380 : vector<8x1xf32> to vector<8x64xf32>
    %382 = arith.mulf %379, %381 : vector<8x64xf32>
    %c0_252 = arith.constant 0 : index
    %c0_253 = arith.constant 0 : index
    %383 = vector.load %arg25[%c0_252, %c0_253] : memref<8x1xf32, #tpu.memory_space<vmem>>, vector<8x1xf32>
    %384 = vector.broadcast %383 : vector<8x1xf32> to vector<8x64xf32>
    %385 = arith.addf %382, %384 : vector<8x64xf32>
    %cst_254 = arith.constant 0.000000e+00 : f32
    %386 = vector.broadcast %cst_254 : f32 to vector<8x64xf32>
    %387 = arith.cmpf ogt, %385, %386 : vector<8x64xf32>
    %cst_255 = arith.constant 2.500000e-01 : f32
    %388 = vector.broadcast %cst_255 : f32 to vector<8x64xf32>
    %389 = arith.mulf %388, %385 : vector<8x64xf32>
    %390 = arith.select %387, %385, %389 : vector<8x64xi1>, vector<8x64xf32>
    %c0_256 = arith.constant 0 : index
    %c0_257 = arith.constant 0 : index
    %391 = vector.load %arg9[%c0_256, %c0_257] : memref<64x256xf32, #tpu.memory_space<vmem>>, vector<64x256xf32>
    %cst_258 = arith.constant dense<0.000000e+00> : vector<8x256xf32>
    %392 = tpu.matmul %390, %391, %cst_258 {dimension_numbers = #tpu.dot_dimension_numbers<[1], [0], [0], [1], [0, 0, 1, 1], [], []>} : vector<8x64xf32>, vector<64x256xf32>, vector<8x256xf32> -> vector<8x256xf32>
    %c0_259 = arith.constant 0 : index
    %c0_260 = arith.constant 0 : index
    %393 = vector.load %arg3[%c0_259, %c0_260] : memref<9x256xf32, #tpu.memory_space<vmem>>, vector<9x256xf32>
    %c0_261 = arith.constant 0 : index
    %c0_262 = arith.constant 0 : index
    %394 = vector.load %arg39[%c0_261, %c0_262] : memref<16x512xf32, #tpu.memory_space<vmem>>, vector<8x256xf32>
    tpu.vector_store %arg39[%c0_261, %c0_262], %392 {strides = array<i32>} : memref<16x512xf32, #tpu.memory_space<vmem>>, vector<8x256xf32>,
    %c0_263 = arith.constant 0 : index
    %c256_264 = arith.constant 256 : index
    %395 = vector.load %arg39[%c0_263, %c256_264] : memref<16x512xf32, #tpu.memory_space<vmem>>, vector<8x256xf32>
    tpu.vector_store %arg39[%c0_263, %c256_264], %392 {strides = array<i32>} : memref<16x512xf32, #tpu.memory_space<vmem>>, vector<8x256xf32>,
    %c0_265 = arith.constant 0 : index
    %c239_266 = arith.constant 239 : index
    %396 = vector.load %arg39[%c0_265, %c239_266] : memref<16x512xf32, #tpu.memory_space<vmem>>, vector<8x256xf32>
    %397 = vector.extract_strided_slice %393 {offsets = [0, 0], sizes = [1, 256], strides = [1, 1]} : vector<9x256xf32> to vector<1x256xf32>
    %398 = vector.broadcast %397 : vector<1x256xf32> to vector<8x256xf32>
    %399 = arith.mulf %396, %398 : vector<8x256xf32>
    %c0_267 = arith.constant 0 : index
    %c0_268 = arith.constant 0 : index
    %400 = vector.load %arg40[%c0_267, %c0_268] : memref<144x256xf32, #tpu.memory_space<vmem>>, vector<8x256xf32>
    tpu.vector_store %arg40[%c0_267, %c0_268], %399 {strides = array<i32>} : memref<144x256xf32, #tpu.memory_space<vmem>>, vector<8x256xf32>,
    %c0_269 = arith.constant 0 : index
    %c240_270 = arith.constant 240 : index
    %401 = vector.load %arg39[%c0_269, %c240_270] : memref<16x512xf32, #tpu.memory_space<vmem>>, vector<8x256xf32>
    %402 = vector.extract_strided_slice %393 {offsets = [1, 0], sizes = [1, 256], strides = [1, 1]} : vector<9x256xf32> to vector<1x256xf32>
    %403 = vector.broadcast %402 : vector<1x256xf32> to vector<8x256xf32>
    %404 = arith.mulf %401, %403 : vector<8x256xf32>
    %c8_271 = arith.constant 8 : index
    %c0_272 = arith.constant 0 : index
    %405 = vector.load %arg40[%c8_271, %c0_272] : memref<144x256xf32, #tpu.memory_space<vmem>>, vector<8x256xf32>
    tpu.vector_store %arg40[%c8_271, %c0_272], %404 {strides = array<i32>} : memref<144x256xf32, #tpu.memory_space<vmem>>, vector<8x256xf32>,
    %c0_273 = arith.constant 0 : index
    %c241_274 = arith.constant 241 : index
    %406 = vector.load %arg39[%c0_273, %c241_274] : memref<16x512xf32, #tpu.memory_space<vmem>>, vector<8x256xf32>
    %407 = vector.extract_strided_slice %393 {offsets = [2, 0], sizes = [1, 256], strides = [1, 1]} : vector<9x256xf32> to vector<1x256xf32>
    %408 = vector.broadcast %407 : vector<1x256xf32> to vector<8x256xf32>
    %409 = arith.mulf %406, %408 : vector<8x256xf32>
    %c16_275 = arith.constant 16 : index
    %c0_276 = arith.constant 0 : index
    %410 = vector.load %arg40[%c16_275, %c0_276] : memref<144x256xf32, #tpu.memory_space<vmem>>, vector<8x256xf32>
    tpu.vector_store %arg40[%c16_275, %c0_276], %409 {strides = array<i32>} : memref<144x256xf32, #tpu.memory_space<vmem>>, vector<8x256xf32>,
    %c0_277 = arith.constant 0 : index
    %c255_278 = arith.constant 255 : index
    %411 = vector.load %arg39[%c0_277, %c255_278] : memref<16x512xf32, #tpu.memory_space<vmem>>, vector<8x256xf32>
    %412 = vector.extract_strided_slice %393 {offsets = [3, 0], sizes = [1, 256], strides = [1, 1]} : vector<9x256xf32> to vector<1x256xf32>
    %413 = vector.broadcast %412 : vector<1x256xf32> to vector<8x256xf32>
    %414 = arith.mulf %411, %413 : vector<8x256xf32>
    %c24_279 = arith.constant 24 : index
    %c0_280 = arith.constant 0 : index
    %415 = vector.load %arg40[%c24_279, %c0_280] : memref<144x256xf32, #tpu.memory_space<vmem>>, vector<8x256xf32>
    tpu.vector_store %arg40[%c24_279, %c0_280], %414 {strides = array<i32>} : memref<144x256xf32, #tpu.memory_space<vmem>>, vector<8x256xf32>,
    %c0_281 = arith.constant 0 : index
    %c0_282 = arith.constant 0 : index
    %416 = vector.load %arg39[%c0_281, %c0_282] : memref<16x512xf32, #tpu.memory_space<vmem>>, vector<8x256xf32>
    %417 = vector.extract_strided_slice %393 {offsets = [4, 0], sizes = [1, 256], strides = [1, 1]} : vector<9x256xf32> to vector<1x256xf32>
    %418 = vector.broadcast %417 : vector<1x256xf32> to vector<8x256xf32>
    %419 = arith.mulf %416, %418 : vector<8x256xf32>
    %c32_283 = arith.constant 32 : index
    %c0_284 = arith.constant 0 : index
    %420 = vector.load %arg40[%c32_283, %c0_284] : memref<144x256xf32, #tpu.memory_space<vmem>>, vector<8x256xf32>
    tpu.vector_store %arg40[%c32_283, %c0_284], %419 {strides = array<i32>} : memref<144x256xf32, #tpu.memory_space<vmem>>, vector<8x256xf32>,
    %c0_285 = arith.constant 0 : index
    %c1_286 = arith.constant 1 : index
    %421 = vector.load %arg39[%c0_285, %c1_286] : memref<16x512xf32, #tpu.memory_space<vmem>>, vector<8x256xf32>
    %422 = vector.extract_strided_slice %393 {offsets = [5, 0], sizes = [1, 256], strides = [1, 1]} : vector<9x256xf32> to vector<1x256xf32>
    %423 = vector.broadcast %422 : vector<1x256xf32> to vector<8x256xf32>
    %424 = arith.mulf %421, %423 : vector<8x256xf32>
    %c40_287 = arith.constant 40 : index
    %c0_288 = arith.constant 0 : index
    %425 = vector.load %arg40[%c40_287, %c0_288] : memref<144x256xf32, #tpu.memory_space<vmem>>, vector<8x256xf32>
    tpu.vector_store %arg40[%c40_287, %c0_288], %424 {strides = array<i32>} : memref<144x256xf32, #tpu.memory_space<vmem>>, vector<8x256xf32>,
    %c0_289 = arith.constant 0 : index
    %c15_290 = arith.constant 15 : index
    %426 = vector.load %arg39[%c0_289, %c15_290] : memref<16x512xf32, #tpu.memory_space<vmem>>, vector<8x256xf32>
    %427 = vector.extract_strided_slice %393 {offsets = [6, 0], sizes = [1, 256], strides = [1, 1]} : vector<9x256xf32> to vector<1x256xf32>
    %428 = vector.broadcast %427 : vector<1x256xf32> to vector<8x256xf32>
    %429 = arith.mulf %426, %428 : vector<8x256xf32>
    %c48_291 = arith.constant 48 : index
    %c0_292 = arith.constant 0 : index
    %430 = vector.load %arg40[%c48_291, %c0_292] : memref<144x256xf32, #tpu.memory_space<vmem>>, vector<8x256xf32>
    tpu.vector_store %arg40[%c48_291, %c0_292], %429 {strides = array<i32>} : memref<144x256xf32, #tpu.memory_space<vmem>>, vector<8x256xf32>,
    %c0_293 = arith.constant 0 : index
    %c16_294 = arith.constant 16 : index
    %431 = vector.load %arg39[%c0_293, %c16_294] : memref<16x512xf32, #tpu.memory_space<vmem>>, vector<8x256xf32>
    %432 = vector.extract_strided_slice %393 {offsets = [7, 0], sizes = [1, 256], strides = [1, 1]} : vector<9x256xf32> to vector<1x256xf32>
    %433 = vector.broadcast %432 : vector<1x256xf32> to vector<8x256xf32>
    %434 = arith.mulf %431, %433 : vector<8x256xf32>
    %c56_295 = arith.constant 56 : index
    %c0_296 = arith.constant 0 : index
    %435 = vector.load %arg40[%c56_295, %c0_296] : memref<144x256xf32, #tpu.memory_space<vmem>>, vector<8x256xf32>
    tpu.vector_store %arg40[%c56_295, %c0_296], %434 {strides = array<i32>} : memref<144x256xf32, #tpu.memory_space<vmem>>, vector<8x256xf32>,
    %c0_297 = arith.constant 0 : index
    %c17_298 = arith.constant 17 : index
    %436 = vector.load %arg39[%c0_297, %c17_298] : memref<16x512xf32, #tpu.memory_space<vmem>>, vector<8x256xf32>
    %437 = vector.extract_strided_slice %393 {offsets = [8, 0], sizes = [1, 256], strides = [1, 1]} : vector<9x256xf32> to vector<1x256xf32>
    %438 = vector.broadcast %437 : vector<1x256xf32> to vector<8x256xf32>
    %439 = arith.mulf %436, %438 : vector<8x256xf32>
    %c64_299 = arith.constant 64 : index
    %c0_300 = arith.constant 0 : index
    %440 = vector.load %arg40[%c64_299, %c0_300] : memref<144x256xf32, #tpu.memory_space<vmem>>, vector<8x256xf32>
    tpu.vector_store %arg40[%c64_299, %c0_300], %439 {strides = array<i32>} : memref<144x256xf32, #tpu.memory_space<vmem>>, vector<8x256xf32>,
    %c0_301 = arith.constant 0 : index
    %c0_302 = arith.constant 0 : index
    %441 = vector.load %arg40[%c0_301, %c0_302] : memref<144x256xf32, #tpu.memory_space<vmem>>, vector<72x256xf32>
    %442 = arith.truncf %441 : vector<72x256xf32> to vector<72x256xbf16>
    %c0_303 = arith.constant 0 : index
    %c0_304 = arith.constant 0 : index
    %443 = vector.load %arg26[%c0_303, %c0_304] : memref<8x72xf32, #tpu.memory_space<vmem>>, vector<8x72xf32>
    %444 = arith.truncf %443 : vector<8x72xf32> to vector<8x72xbf16>
    %cst_305 = arith.constant dense<0.000000e+00> : vector<8x256xf32>
    %445 = tpu.matmul %444, %442, %cst_305 {dimension_numbers = #tpu.dot_dimension_numbers<[1], [0], [0], [1], [0, 0, 1, 1], [], []>} : vector<8x72xbf16>, vector<72x256xbf16>, vector<8x256xf32> -> vector<8x256xf32>
    %cst_306 = arith.constant dense<0.000000e+00> : vector<8xf32>
    %446 = vector.multi_reduction <add>, %445, %cst_306 [1] : vector<8x256xf32> to vector<8xf32>
    %447 = vector.shape_cast %446 : vector<8xf32> to vector<8x1xf32>
    %cst_307 = arith.constant 3.906250e-03 : f32
    %448 = vector.broadcast %cst_307 : f32 to vector<8x1xf32>
    %449 = arith.mulf %447, %448 : vector<8x1xf32>
    %450 = arith.mulf %445, %445 : vector<8x256xf32>
    %cst_308 = arith.constant dense<0.000000e+00> : vector<8xf32>
    %451 = vector.multi_reduction <add>, %450, %cst_308 [1] : vector<8x256xf32> to vector<8xf32>
    %452 = vector.shape_cast %451 : vector<8xf32> to vector<8x1xf32>
    %cst_309 = arith.constant 3.906250e-03 : f32
    %453 = vector.broadcast %cst_309 : f32 to vector<8x1xf32>
    %454 = arith.mulf %452, %453 : vector<8x1xf32>
    %455 = arith.mulf %449, %449 : vector<8x1xf32>
    %456 = arith.subf %454, %455 : vector<8x1xf32>
    %457 = vector.broadcast %449 : vector<8x1xf32> to vector<8x256xf32>
    %458 = arith.subf %445, %457 : vector<8x256xf32>
    %cst_310 = arith.constant 9.99999974E-6 : f32
    %459 = vector.broadcast %cst_310 : f32 to vector<8x1xf32>
    %460 = arith.addf %456, %459 : vector<8x1xf32>
    %461 = math.rsqrt %460 : vector<8x1xf32>
    %462 = vector.broadcast %461 : vector<8x1xf32> to vector<8x256xf32>
    %463 = arith.mulf %458, %462 : vector<8x256xf32>
    %c0_311 = arith.constant 0 : index
    %c0_312 = arith.constant 0 : index
    %464 = vector.load %arg27[%c0_311, %c0_312] : memref<8x1xf32, #tpu.memory_space<vmem>>, vector<8x1xf32>
    %465 = vector.broadcast %464 : vector<8x1xf32> to vector<8x256xf32>
    %466 = arith.mulf %463, %465 : vector<8x256xf32>
    %c0_313 = arith.constant 0 : index
    %c0_314 = arith.constant 0 : index
    %467 = vector.load %arg28[%c0_313, %c0_314] : memref<8x1xf32, #tpu.memory_space<vmem>>, vector<8x1xf32>
    %468 = vector.broadcast %467 : vector<8x1xf32> to vector<8x256xf32>
    %469 = arith.addf %466, %468 : vector<8x256xf32>
    %cst_315 = arith.constant 0.000000e+00 : f32
    %470 = vector.broadcast %cst_315 : f32 to vector<8x256xf32>
    %471 = arith.cmpf ogt, %469, %470 : vector<8x256xf32>
    %cst_316 = arith.constant 2.500000e-01 : f32
    %472 = vector.broadcast %cst_316 : f32 to vector<8x256xf32>
    %473 = arith.mulf %472, %469 : vector<8x256xf32>
    %474 = arith.select %471, %469, %473 : vector<8x256xi1>, vector<8x256xf32>
    %475 = vector.extract_strided_slice %85 {offsets = [8, 0], sizes = [8, 64], strides = [1, 1]} : vector<16x64xf32> to vector<8x64xf32>
    %c0_317 = arith.constant 0 : index
    %c0_318 = arith.constant 0 : index
    %476 = vector.load %arg7[%c0_317, %c0_318] : memref<64x16xf32, #tpu.memory_space<vmem>>, vector<64x16xf32>
    %c0_319 = arith.constant 0 : index
    %c0_320 = arith.constant 0 : index
    %477 = vector.load %arg4[%c0_319, %c0_320] : memref<9x64xf32, #tpu.memory_space<vmem>>, vector<9x64xf32>
    %c0_321 = arith.constant 0 : index
    %c0_322 = arith.constant 0 : index
    %478 = vector.load %arg39[%c0_321, %c0_322] : memref<16x512xf32, #tpu.memory_space<vmem>>, vector<8x64xf32>
    tpu.vector_store %arg39[%c0_321, %c0_322], %475 {strides = array<i32>} : memref<16x512xf32, #tpu.memory_space<vmem>>, vector<8x64xf32>,
    %c0_323 = arith.constant 0 : index
    %c64_324 = arith.constant 64 : index
    %479 = vector.load %arg39[%c0_323, %c64_324] : memref<16x512xf32, #tpu.memory_space<vmem>>, vector<8x64xf32>
    tpu.vector_store %arg39[%c0_323, %c64_324], %475 {strides = array<i32>} : memref<16x512xf32, #tpu.memory_space<vmem>>, vector<8x64xf32>,
    %c0_325 = arith.constant 0 : index
    %c55_326 = arith.constant 55 : index
    %480 = vector.load %arg39[%c0_325, %c55_326] : memref<16x512xf32, #tpu.memory_space<vmem>>, vector<8x64xf32>
    %481 = vector.extract_strided_slice %477 {offsets = [0, 0], sizes = [1, 64], strides = [1, 1]} : vector<9x64xf32> to vector<1x64xf32>
    %482 = vector.broadcast %481 : vector<1x64xf32> to vector<8x64xf32>
    %483 = arith.mulf %480, %482 : vector<8x64xf32>
    %c0_327 = arith.constant 0 : index
    %c0_328 = arith.constant 0 : index
    %484 = vector.load %arg40[%c0_327, %c0_328] : memref<144x256xf32, #tpu.memory_space<vmem>>, vector<8x64xf32>
    tpu.vector_store %arg40[%c0_327, %c0_328], %483 {strides = array<i32>} : memref<144x256xf32, #tpu.memory_space<vmem>>, vector<8x64xf32>,
    %c0_329 = arith.constant 0 : index
    %c56_330 = arith.constant 56 : index
    %485 = vector.load %arg39[%c0_329, %c56_330] : memref<16x512xf32, #tpu.memory_space<vmem>>, vector<8x64xf32>
    %486 = vector.extract_strided_slice %477 {offsets = [1, 0], sizes = [1, 64], strides = [1, 1]} : vector<9x64xf32> to vector<1x64xf32>
    %487 = vector.broadcast %486 : vector<1x64xf32> to vector<8x64xf32>
    %488 = arith.mulf %485, %487 : vector<8x64xf32>
    %c8_331 = arith.constant 8 : index
    %c0_332 = arith.constant 0 : index
    %489 = vector.load %arg40[%c8_331, %c0_332] : memref<144x256xf32, #tpu.memory_space<vmem>>, vector<8x64xf32>
    tpu.vector_store %arg40[%c8_331, %c0_332], %488 {strides = array<i32>} : memref<144x256xf32, #tpu.memory_space<vmem>>, vector<8x64xf32>,
    %c0_333 = arith.constant 0 : index
    %c57_334 = arith.constant 57 : index
    %490 = vector.load %arg39[%c0_333, %c57_334] : memref<16x512xf32, #tpu.memory_space<vmem>>, vector<8x64xf32>
    %491 = vector.extract_strided_slice %477 {offsets = [2, 0], sizes = [1, 64], strides = [1, 1]} : vector<9x64xf32> to vector<1x64xf32>
    %492 = vector.broadcast %491 : vector<1x64xf32> to vector<8x64xf32>
    %493 = arith.mulf %490, %492 : vector<8x64xf32>
    %c16_335 = arith.constant 16 : index
    %c0_336 = arith.constant 0 : index
    %494 = vector.load %arg40[%c16_335, %c0_336] : memref<144x256xf32, #tpu.memory_space<vmem>>, vector<8x64xf32>
    tpu.vector_store %arg40[%c16_335, %c0_336], %493 {strides = array<i32>} : memref<144x256xf32, #tpu.memory_space<vmem>>, vector<8x64xf32>,
    %c0_337 = arith.constant 0 : index
    %c63_338 = arith.constant 63 : index
    %495 = vector.load %arg39[%c0_337, %c63_338] : memref<16x512xf32, #tpu.memory_space<vmem>>, vector<8x64xf32>
    %496 = vector.extract_strided_slice %477 {offsets = [3, 0], sizes = [1, 64], strides = [1, 1]} : vector<9x64xf32> to vector<1x64xf32>
    %497 = vector.broadcast %496 : vector<1x64xf32> to vector<8x64xf32>
    %498 = arith.mulf %495, %497 : vector<8x64xf32>
    %c24_339 = arith.constant 24 : index
    %c0_340 = arith.constant 0 : index
    %499 = vector.load %arg40[%c24_339, %c0_340] : memref<144x256xf32, #tpu.memory_space<vmem>>, vector<8x64xf32>
    tpu.vector_store %arg40[%c24_339, %c0_340], %498 {strides = array<i32>} : memref<144x256xf32, #tpu.memory_space<vmem>>, vector<8x64xf32>,
    %c0_341 = arith.constant 0 : index
    %c0_342 = arith.constant 0 : index
    %500 = vector.load %arg39[%c0_341, %c0_342] : memref<16x512xf32, #tpu.memory_space<vmem>>, vector<8x64xf32>
    %501 = vector.extract_strided_slice %477 {offsets = [4, 0], sizes = [1, 64], strides = [1, 1]} : vector<9x64xf32> to vector<1x64xf32>
    %502 = vector.broadcast %501 : vector<1x64xf32> to vector<8x64xf32>
    %503 = arith.mulf %500, %502 : vector<8x64xf32>
    %c32_343 = arith.constant 32 : index
    %c0_344 = arith.constant 0 : index
    %504 = vector.load %arg40[%c32_343, %c0_344] : memref<144x256xf32, #tpu.memory_space<vmem>>, vector<8x64xf32>
    tpu.vector_store %arg40[%c32_343, %c0_344], %503 {strides = array<i32>} : memref<144x256xf32, #tpu.memory_space<vmem>>, vector<8x64xf32>,
    %c0_345 = arith.constant 0 : index
    %c1_346 = arith.constant 1 : index
    %505 = vector.load %arg39[%c0_345, %c1_346] : memref<16x512xf32, #tpu.memory_space<vmem>>, vector<8x64xf32>
    %506 = vector.extract_strided_slice %477 {offsets = [5, 0], sizes = [1, 64], strides = [1, 1]} : vector<9x64xf32> to vector<1x64xf32>
    %507 = vector.broadcast %506 : vector<1x64xf32> to vector<8x64xf32>
    %508 = arith.mulf %505, %507 : vector<8x64xf32>
    %c40_347 = arith.constant 40 : index
    %c0_348 = arith.constant 0 : index
    %509 = vector.load %arg40[%c40_347, %c0_348] : memref<144x256xf32, #tpu.memory_space<vmem>>, vector<8x64xf32>
    tpu.vector_store %arg40[%c40_347, %c0_348], %508 {strides = array<i32>} : memref<144x256xf32, #tpu.memory_space<vmem>>, vector<8x64xf32>,
    %c0_349 = arith.constant 0 : index
    %c7_350 = arith.constant 7 : index
    %510 = vector.load %arg39[%c0_349, %c7_350] : memref<16x512xf32, #tpu.memory_space<vmem>>, vector<8x64xf32>
    %511 = vector.extract_strided_slice %477 {offsets = [6, 0], sizes = [1, 64], strides = [1, 1]} : vector<9x64xf32> to vector<1x64xf32>
    %512 = vector.broadcast %511 : vector<1x64xf32> to vector<8x64xf32>
    %513 = arith.mulf %510, %512 : vector<8x64xf32>
    %c48_351 = arith.constant 48 : index
    %c0_352 = arith.constant 0 : index
    %514 = vector.load %arg40[%c48_351, %c0_352] : memref<144x256xf32, #tpu.memory_space<vmem>>, vector<8x64xf32>
    tpu.vector_store %arg40[%c48_351, %c0_352], %513 {strides = array<i32>} : memref<144x256xf32, #tpu.memory_space<vmem>>, vector<8x64xf32>,
    %c0_353 = arith.constant 0 : index
    %c8_354 = arith.constant 8 : index
    %515 = vector.load %arg39[%c0_353, %c8_354] : memref<16x512xf32, #tpu.memory_space<vmem>>, vector<8x64xf32>
    %516 = vector.extract_strided_slice %477 {offsets = [7, 0], sizes = [1, 64], strides = [1, 1]} : vector<9x64xf32> to vector<1x64xf32>
    %517 = vector.broadcast %516 : vector<1x64xf32> to vector<8x64xf32>
    %518 = arith.mulf %515, %517 : vector<8x64xf32>
    %c56_355 = arith.constant 56 : index
    %c0_356 = arith.constant 0 : index
    %519 = vector.load %arg40[%c56_355, %c0_356] : memref<144x256xf32, #tpu.memory_space<vmem>>, vector<8x64xf32>
    tpu.vector_store %arg40[%c56_355, %c0_356], %518 {strides = array<i32>} : memref<144x256xf32, #tpu.memory_space<vmem>>, vector<8x64xf32>,
    %c0_357 = arith.constant 0 : index
    %c9_358 = arith.constant 9 : index
    %520 = vector.load %arg39[%c0_357, %c9_358] : memref<16x512xf32, #tpu.memory_space<vmem>>, vector<8x64xf32>
    %521 = vector.extract_strided_slice %477 {offsets = [8, 0], sizes = [1, 64], strides = [1, 1]} : vector<9x64xf32> to vector<1x64xf32>
    %522 = vector.broadcast %521 : vector<1x64xf32> to vector<8x64xf32>
    %523 = arith.mulf %520, %522 : vector<8x64xf32>
    %c64_359 = arith.constant 64 : index
    %c0_360 = arith.constant 0 : index
    %524 = vector.load %arg40[%c64_359, %c0_360] : memref<144x256xf32, #tpu.memory_space<vmem>>, vector<8x64xf32>
    tpu.vector_store %arg40[%c64_359, %c0_360], %523 {strides = array<i32>} : memref<144x256xf32, #tpu.memory_space<vmem>>, vector<8x64xf32>,
    %c0_361 = arith.constant 0 : index
    %c0_362 = arith.constant 0 : index
    %525 = vector.load %arg40[%c0_361, %c0_362] : memref<144x256xf32, #tpu.memory_space<vmem>>, vector<72x64xf32>
    %526 = arith.truncf %525 : vector<72x64xf32> to vector<72x64xbf16>
    %c0_363 = arith.constant 0 : index
    %c0_364 = arith.constant 0 : index
    %527 = vector.load %arg16[%c0_363, %c0_364] : memref<16x72xf32, #tpu.memory_space<vmem>>, vector<16x72xf32>
    %528 = arith.truncf %527 : vector<16x72xf32> to vector<16x72xbf16>
    %cst_365 = arith.constant dense<0.000000e+00> : vector<16x64xf32>
    %529 = tpu.matmul %528, %526, %cst_365 {dimension_numbers = #tpu.dot_dimension_numbers<[1], [0], [0], [1], [0, 0, 1, 1], [], []>} : vector<16x72xbf16>, vector<72x64xbf16>, vector<16x64xf32> -> vector<16x64xf32>
    %cst_366 = arith.constant dense<0.000000e+00> : vector<16x16xf32>
    %530 = tpu.matmul %529, %476, %cst_366 {dimension_numbers = #tpu.dot_dimension_numbers<[1], [0], [0], [1], [0, 0, 1, 1], [], []>} : vector<16x64xf32>, vector<64x16xf32>, vector<16x16xf32> -> vector<16x16xf32>
    %cst_367 = arith.constant dense<0.000000e+00> : vector<16xf32>
    %531 = vector.multi_reduction <add>, %530, %cst_367 [1] : vector<16x16xf32> to vector<16xf32>
    %532 = vector.shape_cast %531 : vector<16xf32> to vector<16x1xf32>
    %cst_368 = arith.constant 6.250000e-02 : f32
    %533 = vector.broadcast %cst_368 : f32 to vector<16x1xf32>
    %534 = arith.mulf %532, %533 : vector<16x1xf32>
    %535 = arith.mulf %530, %530 : vector<16x16xf32>
    %cst_369 = arith.constant dense<0.000000e+00> : vector<16xf32>
    %536 = vector.multi_reduction <add>, %535, %cst_369 [1] : vector<16x16xf32> to vector<16xf32>
    %537 = vector.shape_cast %536 : vector<16xf32> to vector<16x1xf32>
    %cst_370 = arith.constant 6.250000e-02 : f32
    %538 = vector.broadcast %cst_370 : f32 to vector<16x1xf32>
    %539 = arith.mulf %537, %538 : vector<16x1xf32>
    %540 = arith.mulf %534, %534 : vector<16x1xf32>
    %541 = arith.subf %539, %540 : vector<16x1xf32>
    %542 = vector.broadcast %534 : vector<16x1xf32> to vector<16x16xf32>
    %543 = arith.subf %530, %542 : vector<16x16xf32>
    %cst_371 = arith.constant 9.99999974E-6 : f32
    %544 = vector.broadcast %cst_371 : f32 to vector<16x1xf32>
    %545 = arith.addf %541, %544 : vector<16x1xf32>
    %546 = math.rsqrt %545 : vector<16x1xf32>
    %547 = vector.broadcast %546 : vector<16x1xf32> to vector<16x16xf32>
    %548 = arith.mulf %543, %547 : vector<16x16xf32>
    %c0_372 = arith.constant 0 : index
    %c0_373 = arith.constant 0 : index
    %549 = vector.load %arg17[%c0_372, %c0_373] : memref<16x1xf32, #tpu.memory_space<vmem>>, vector<16x1xf32>
    %550 = vector.broadcast %549 : vector<16x1xf32> to vector<16x16xf32>
    %551 = arith.mulf %548, %550 : vector<16x16xf32>
    %c0_374 = arith.constant 0 : index
    %c0_375 = arith.constant 0 : index
    %552 = vector.load %arg18[%c0_374, %c0_375] : memref<16x1xf32, #tpu.memory_space<vmem>>, vector<16x1xf32>
    %553 = vector.broadcast %552 : vector<16x1xf32> to vector<16x16xf32>
    %554 = arith.addf %551, %553 : vector<16x16xf32>
    %cst_376 = arith.constant 0.000000e+00 : f32
    %555 = vector.broadcast %cst_376 : f32 to vector<16x16xf32>
    %556 = arith.cmpf ogt, %554, %555 : vector<16x16xf32>
    %cst_377 = arith.constant 2.500000e-01 : f32
    %557 = vector.broadcast %cst_377 : f32 to vector<16x16xf32>
    %558 = arith.mulf %557, %554 : vector<16x16xf32>
    %559 = arith.select %556, %554, %558 : vector<16x16xi1>, vector<16x16xf32>
    %cst_378 = arith.constant dense<0.000000e+00> : vector<16xf32>
    %560 = vector.multi_reduction <add>, %559, %cst_378 [1] : vector<16x16xf32> to vector<16xf32>
    %561 = vector.shape_cast %560 : vector<16xf32> to vector<16x1xf32>
    %cst_379 = arith.constant 6.250000e-02 : f32
    %562 = vector.broadcast %cst_379 : f32 to vector<16x1xf32>
    %563 = arith.mulf %561, %562 : vector<16x1xf32>
    %c0_380 = arith.constant 0 : index
    %c0_381 = arith.constant 0 : index
    %564 = vector.load %arg29[%c0_380, %c0_381] : memref<8x16xf32, #tpu.memory_space<vmem>>, vector<8x16xf32>
    %cst_382 = arith.constant dense<0.000000e+00> : vector<8x1xf32>
    %565 = tpu.matmul %564, %563, %cst_382 {dimension_numbers = #tpu.dot_dimension_numbers<[1], [0], [0], [1], [0, 0, 1, 1], [], []>} : vector<8x16xf32>, vector<16x1xf32>, vector<8x1xf32> -> vector<8x1xf32>
    %c0_383 = arith.constant 0 : index
    %c0_384 = arith.constant 0 : index
    %566 = vector.load %arg30[%c0_383, %c0_384] : memref<8x1xf32, #tpu.memory_space<vmem>>, vector<8x1xf32>
    %567 = arith.addf %565, %566 : vector<8x1xf32>
    %568 = vector.extract_strided_slice %567 {offsets = [0, 0], sizes = [4, 1], strides = [1, 1]} : vector<8x1xf32> to vector<4x1xf32>
    %569 = vector.extract_strided_slice %567 {offsets = [4, 0], sizes = [4, 1], strides = [1, 1]} : vector<8x1xf32> to vector<4x1xf32>
    %cst_385 = arith.constant 5.000000e-01 : f32
    %570 = vector.broadcast %cst_385 : f32 to vector<4x1xf32>
    %571 = arith.mulf %570, %569 : vector<4x1xf32>
    %572 = math.exp %571 : vector<4x1xf32>
    %c0_386 = arith.constant 0 : index
    %c0_387 = arith.constant 0 : index
    %c0_388 = arith.constant 0 : index
    %573 = vector.load %arg2[%c0_386, %c0_387, %c0_388] : memref<1x4x1xf32, #tpu.memory_space<vmem>>, vector<1x4x1xf32>
    %574 = vector.shape_cast %573 : vector<1x4x1xf32> to vector<4x1xf32>
    %575 = arith.mulf %572, %574 : vector<4x1xf32>
    %576 = arith.addf %568, %575 : vector<4x1xf32>
    %c0_389 = arith.constant 0 : index
    %c0_390 = arith.constant 0 : index
    %577 = vector.load %arg31[%c0_389, %c0_390] : memref<8x8xf32, #tpu.memory_space<vmem>>, vector<8x8xf32>
    %cst_391 = arith.constant dense<0.000000e+00> : vector<8x256xf32>
    %578 = tpu.matmul %577, %474, %cst_391 {dimension_numbers = #tpu.dot_dimension_numbers<[1], [0], [0], [1], [0, 0, 1, 1], [], []>} : vector<8x8xf32>, vector<8x256xf32>, vector<8x256xf32> -> vector<8x256xf32>
    %c0_392 = arith.constant 0 : index
    %c0_393 = arith.constant 0 : index
    %579 = vector.load %arg32[%c0_392, %c0_393] : memref<8x4xf32, #tpu.memory_space<vmem>>, vector<8x4xf32>
    %cst_394 = arith.constant dense<0.000000e+00> : vector<8x1xf32>
    %580 = tpu.matmul %579, %576, %cst_394 {dimension_numbers = #tpu.dot_dimension_numbers<[1], [0], [0], [1], [0, 0, 1, 1], [], []>} : vector<8x4xf32>, vector<4x1xf32>, vector<8x1xf32> -> vector<8x1xf32>
    %581 = vector.broadcast %580 : vector<8x1xf32> to vector<8x256xf32>
    %582 = arith.addf %578, %581 : vector<8x256xf32>
    %c0_395 = arith.constant 0 : index
    %c0_396 = arith.constant 0 : index
    %583 = vector.load %arg33[%c0_395, %c0_396] : memref<8x1xf32, #tpu.memory_space<vmem>>, vector<8x1xf32>
    %584 = vector.broadcast %583 : vector<8x1xf32> to vector<8x256xf32>
    %585 = arith.addf %582, %584 : vector<8x256xf32>
    %cst_397 = arith.constant 0.000000e+00 : f32
    %586 = vector.broadcast %cst_397 : f32 to vector<8x256xf32>
    %587 = arith.maximumf %585, %586 : vector<8x256xf32>
    %c0_398 = arith.constant 0 : index
    %c0_399 = arith.constant 0 : index
    %588 = vector.load %arg34[%c0_398, %c0_399] : memref<8x8xf32, #tpu.memory_space<vmem>>, vector<8x8xf32>
    %cst_400 = arith.constant dense<0.000000e+00> : vector<8x256xf32>
    %589 = tpu.matmul %588, %587, %cst_400 {dimension_numbers = #tpu.dot_dimension_numbers<[1], [0], [0], [1], [0, 0, 1, 1], [], []>} : vector<8x8xf32>, vector<8x256xf32>, vector<8x256xf32> -> vector<8x256xf32>
    %c0_401 = arith.constant 0 : index
    %c0_402 = arith.constant 0 : index
    %590 = vector.load %arg35[%c0_401, %c0_402] : memref<8x1xf32, #tpu.memory_space<vmem>>, vector<8x1xf32>
    %591 = vector.broadcast %590 : vector<8x1xf32> to vector<8x256xf32>
    %592 = arith.addf %589, %591 : vector<8x256xf32>
    %cst_403 = arith.constant 0.000000e+00 : f32
    %593 = vector.broadcast %cst_403 : f32 to vector<8x256xf32>
    %594 = arith.maximumf %592, %593 : vector<8x256xf32>
    %c0_404 = arith.constant 0 : index
    %c0_405 = arith.constant 0 : index
    %595 = vector.load %arg36[%c0_404, %c0_405] : memref<8x1xf32, #tpu.memory_space<vmem>>, vector<8x1xf32>
    %596 = vector.broadcast %595 : vector<8x1xf32> to vector<8x256xf32>
    %597 = arith.mulf %594, %596 : vector<8x256xf32>
    %cst_406 = arith.constant dense<0.000000e+00> : vector<256xf32>
    %598 = vector.multi_reduction <add>, %597, %cst_406 [0] : vector<8x256xf32> to vector<256xf32>
    %599 = vector.shape_cast %598 : vector<256xf32> to vector<1x256xf32>
    %c0_407 = arith.constant 0 : index
    %c0_408 = arith.constant 0 : index
    %600 = vector.load %arg37[%c0_407, %c0_408] : memref<1x1xf32, #tpu.memory_space<vmem>>, vector<1x1xf32>
    %601 = vector.broadcast %600 : vector<1x1xf32> to vector<1x256xf32>
    %602 = arith.addf %599, %601 : vector<1x256xf32>
    %c0_409 = arith.constant 0 : index
    %c0_410 = arith.constant 0 : index
    %c0_411 = arith.constant 0 : index
    %603 = vector.load %arg38[%c0_409, %c0_410, %c0_411] : memref<1x1x256xf32, #tpu.memory_space<vmem>>, vector<1x1x256xf32>
    %604 = vector.shape_cast %603 : vector<1x1x256xf32> to vector<1x256xf32>
    %605 = vector.shape_cast %602 : vector<1x256xf32> to vector<1x1x256xf32>
    tpu.vector_store %arg38[%c0_409, %c0_410, %c0_411], %605 {strides = array<i32>} : memref<1x1x256xf32, #tpu.memory_space<vmem>>, vector<1x1x256xf32>,
    return
  }
  func.func @transform_0(%arg0: i32) -> (i32, i32, i32) {
    %c0_i32 = arith.constant 0 : i32
    %c0_i32_0 = arith.constant 0 : i32
    %c0_i32_1 = arith.constant 0 : i32
    return %arg0, %c0_i32, %c0_i32_0 : i32, i32, i32
  }
  func.func @transform_1(%arg0: i32) -> (i32, i32, i32) {
    %c0_i32 = arith.constant 0 : i32
    %c0_i32_0 = arith.constant 0 : i32
    %c0_i32_1 = arith.constant 0 : i32
    return %arg0, %c0_i32, %c0_i32_0 : i32, i32, i32
  }
  func.func @transform_2(%arg0: i32) -> (i32, i32) {
    %c0_i32 = arith.constant 0 : i32
    %c0_i32_0 = arith.constant 0 : i32
    %c0_i32_1 = arith.constant 0 : i32
    return %c0_i32, %c0_i32_0 : i32, i32
  }
  func.func @transform_3(%arg0: i32) -> (i32, i32) {
    %c0_i32 = arith.constant 0 : i32
    %c0_i32_0 = arith.constant 0 : i32
    %c0_i32_1 = arith.constant 0 : i32
    return %c0_i32, %c0_i32_0 : i32, i32
  }
  func.func @transform_4(%arg0: i32) -> (i32, i32) {
    %c0_i32 = arith.constant 0 : i32
    %c0_i32_0 = arith.constant 0 : i32
    %c0_i32_1 = arith.constant 0 : i32
    return %c0_i32, %c0_i32_0 : i32, i32
  }
  func.func @transform_5(%arg0: i32) -> (i32, i32) {
    %c0_i32 = arith.constant 0 : i32
    %c0_i32_0 = arith.constant 0 : i32
    %c0_i32_1 = arith.constant 0 : i32
    return %c0_i32, %c0_i32_0 : i32, i32
  }
  func.func @transform_6(%arg0: i32) -> (i32, i32) {
    %c0_i32 = arith.constant 0 : i32
    %c0_i32_0 = arith.constant 0 : i32
    %c0_i32_1 = arith.constant 0 : i32
    return %c0_i32, %c0_i32_0 : i32, i32
  }
  func.func @transform_7(%arg0: i32) -> (i32, i32) {
    %c0_i32 = arith.constant 0 : i32
    %c0_i32_0 = arith.constant 0 : i32
    %c0_i32_1 = arith.constant 0 : i32
    return %c0_i32, %c0_i32_0 : i32, i32
  }
  func.func @transform_8(%arg0: i32) -> (i32, i32) {
    %c0_i32 = arith.constant 0 : i32
    %c0_i32_0 = arith.constant 0 : i32
    %c0_i32_1 = arith.constant 0 : i32
    return %c0_i32, %c0_i32_0 : i32, i32
  }
  func.func @transform_9(%arg0: i32) -> (i32, i32) {
    %c0_i32 = arith.constant 0 : i32
    %c0_i32_0 = arith.constant 0 : i32
    %c0_i32_1 = arith.constant 0 : i32
    return %c0_i32, %c0_i32_0 : i32, i32
  }
  func.func @transform_10(%arg0: i32) -> (i32, i32) {
    %c0_i32 = arith.constant 0 : i32
    %c0_i32_0 = arith.constant 0 : i32
    %c0_i32_1 = arith.constant 0 : i32
    return %c0_i32, %c0_i32_0 : i32, i32
  }
  func.func @transform_11(%arg0: i32) -> (i32, i32) {
    %c0_i32 = arith.constant 0 : i32
    %c0_i32_0 = arith.constant 0 : i32
    %c0_i32_1 = arith.constant 0 : i32
    return %c0_i32, %c0_i32_0 : i32, i32
  }
  func.func @transform_12(%arg0: i32) -> (i32, i32) {
    %c0_i32 = arith.constant 0 : i32
    %c0_i32_0 = arith.constant 0 : i32
    %c0_i32_1 = arith.constant 0 : i32
    return %c0_i32, %c0_i32_0 : i32, i32
  }
  func.func @transform_13(%arg0: i32) -> (i32, i32) {
    %c0_i32 = arith.constant 0 : i32
    %c0_i32_0 = arith.constant 0 : i32
    %c0_i32_1 = arith.constant 0 : i32
    return %c0_i32, %c0_i32_0 : i32, i32
  }
  func.func @transform_14(%arg0: i32) -> (i32, i32) {
    %c0_i32 = arith.constant 0 : i32
    %c0_i32_0 = arith.constant 0 : i32
    %c0_i32_1 = arith.constant 0 : i32
    return %c0_i32, %c0_i32_0 : i32, i32
  }
  func.func @transform_15(%arg0: i32) -> (i32, i32) {
    %c0_i32 = arith.constant 0 : i32
    %c0_i32_0 = arith.constant 0 : i32
    %c0_i32_1 = arith.constant 0 : i32
    return %c0_i32, %c0_i32_0 : i32, i32
  }
  func.func @transform_16(%arg0: i32) -> (i32, i32) {
    %c0_i32 = arith.constant 0 : i32
    %c0_i32_0 = arith.constant 0 : i32
    %c0_i32_1 = arith.constant 0 : i32
    return %c0_i32, %c0_i32_0 : i32, i32
  }
  func.func @transform_17(%arg0: i32) -> (i32, i32) {
    %c0_i32 = arith.constant 0 : i32
    %c0_i32_0 = arith.constant 0 : i32
    %c0_i32_1 = arith.constant 0 : i32
    return %c0_i32, %c0_i32_0 : i32, i32
  }
  func.func @transform_18(%arg0: i32) -> (i32, i32) {
    %c0_i32 = arith.constant 0 : i32
    %c0_i32_0 = arith.constant 0 : i32
    %c0_i32_1 = arith.constant 0 : i32
    return %c0_i32, %c0_i32_0 : i32, i32
  }
  func.func @transform_19(%arg0: i32) -> (i32, i32) {
    %c0_i32 = arith.constant 0 : i32
    %c0_i32_0 = arith.constant 0 : i32
    %c0_i32_1 = arith.constant 0 : i32
    return %c0_i32, %c0_i32_0 : i32, i32
  }
  func.func @transform_20(%arg0: i32) -> (i32, i32) {
    %c0_i32 = arith.constant 0 : i32
    %c0_i32_0 = arith.constant 0 : i32
    %c0_i32_1 = arith.constant 0 : i32
    return %c0_i32, %c0_i32_0 : i32, i32
  }
  func.func @transform_21(%arg0: i32) -> (i32, i32) {
    %c0_i32 = arith.constant 0 : i32
    %c0_i32_0 = arith.constant 0 : i32
    %c0_i32_1 = arith.constant 0 : i32
    return %c0_i32, %c0_i32_0 : i32, i32
  }
  func.func @transform_22(%arg0: i32) -> (i32, i32) {
    %c0_i32 = arith.constant 0 : i32
    %c0_i32_0 = arith.constant 0 : i32
    %c0_i32_1 = arith.constant 0 : i32
    return %c0_i32, %c0_i32_0 : i32, i32
  }
  func.func @transform_23(%arg0: i32) -> (i32, i32) {
    %c0_i32 = arith.constant 0 : i32
    %c0_i32_0 = arith.constant 0 : i32
    %c0_i32_1 = arith.constant 0 : i32
    return %c0_i32, %c0_i32_0 : i32, i32
  }
  func.func @transform_24(%arg0: i32) -> (i32, i32) {
    %c0_i32 = arith.constant 0 : i32
    %c0_i32_0 = arith.constant 0 : i32
    %c0_i32_1 = arith.constant 0 : i32
    return %c0_i32, %c0_i32_0 : i32, i32
  }
  func.func @transform_25(%arg0: i32) -> (i32, i32) {
    %c0_i32 = arith.constant 0 : i32
    %c0_i32_0 = arith.constant 0 : i32
    %c0_i32_1 = arith.constant 0 : i32
    return %c0_i32, %c0_i32_0 : i32, i32
  }
  func.func @transform_26(%arg0: i32) -> (i32, i32) {
    %c0_i32 = arith.constant 0 : i32
    %c0_i32_0 = arith.constant 0 : i32
    %c0_i32_1 = arith.constant 0 : i32
    return %c0_i32, %c0_i32_0 : i32, i32
  }
  func.func @transform_27(%arg0: i32) -> (i32, i32) {
    %c0_i32 = arith.constant 0 : i32
    %c0_i32_0 = arith.constant 0 : i32
    %c0_i32_1 = arith.constant 0 : i32
    return %c0_i32, %c0_i32_0 : i32, i32
  }
  func.func @transform_28(%arg0: i32) -> (i32, i32) {
    %c0_i32 = arith.constant 0 : i32
    %c0_i32_0 = arith.constant 0 : i32
    %c0_i32_1 = arith.constant 0 : i32
    return %c0_i32, %c0_i32_0 : i32, i32
  }
  func.func @transform_29(%arg0: i32) -> (i32, i32) {
    %c0_i32 = arith.constant 0 : i32
    %c0_i32_0 = arith.constant 0 : i32
    %c0_i32_1 = arith.constant 0 : i32
    return %c0_i32, %c0_i32_0 : i32, i32
  }
  func.func @transform_30(%arg0: i32) -> (i32, i32) {
    %c0_i32 = arith.constant 0 : i32
    %c0_i32_0 = arith.constant 0 : i32
    %c0_i32_1 = arith.constant 0 : i32
    return %c0_i32, %c0_i32_0 : i32, i32
  }
  func.func @transform_31(%arg0: i32) -> (i32, i32) {
    %c0_i32 = arith.constant 0 : i32
    %c0_i32_0 = arith.constant 0 : i32
    %c0_i32_1 = arith.constant 0 : i32
    return %c0_i32, %c0_i32_0 : i32, i32
  }
  func.func @transform_32(%arg0: i32) -> (i32, i32) {
    %c0_i32 = arith.constant 0 : i32
    %c0_i32_0 = arith.constant 0 : i32
    %c0_i32_1 = arith.constant 0 : i32
    return %c0_i32, %c0_i32_0 : i32, i32
  }
  func.func @transform_33(%arg0: i32) -> (i32, i32) {
    %c0_i32 = arith.constant 0 : i32
    %c0_i32_0 = arith.constant 0 : i32
    %c0_i32_1 = arith.constant 0 : i32
    return %c0_i32, %c0_i32_0 : i32, i32
  }
  func.func @transform_34(%arg0: i32) -> (i32, i32) {
    %c0_i32 = arith.constant 0 : i32
    %c0_i32_0 = arith.constant 0 : i32
    %c0_i32_1 = arith.constant 0 : i32
    return %c0_i32, %c0_i32_0 : i32, i32
  }
  func.func @transform_35(%arg0: i32) -> (i32, i32) {
    %c0_i32 = arith.constant 0 : i32
    %c0_i32_0 = arith.constant 0 : i32
    %c0_i32_1 = arith.constant 0 : i32
    return %c0_i32, %c0_i32_0 : i32, i32
  }
  func.func @transform_36(%arg0: i32) -> (i32, i32) {
    %c0_i32 = arith.constant 0 : i32
    %c0_i32_0 = arith.constant 0 : i32
    %c0_i32_1 = arith.constant 0 : i32
    return %c0_i32, %c0_i32_0 : i32, i32
  }
  func.func @transform_37(%arg0: i32) -> (i32, i32, i32) {
    %c0_i32 = arith.constant 0 : i32
    %c0_i32_0 = arith.constant 0 : i32
    %c0_i32_1 = arith.constant 0 : i32
    return %arg0, %c0_i32, %c0_i32_0 : i32, i32, i32
  }
}

</mosaic_0001>

<bundles_post_ra>
// kernel: model_home_forward.1
= control target key start
LH: loop header
LB: loop body
LE: loop exit
PB: predicated region body
PF: predicated region fallthrough
CT: control target
= control target key end

     0   :  { %s5447_s6 = smov 1   ;;  %s5448_s10 = smov 2   ;;  %s6803_s0 = inlined_call_operand.smem [shape: u32[38], index: -1, kind: input, shape index: {}] }
   0x1   :  { %s5544_s5 = sld [smem:[%s6803_s0]]   ;;  %s5449_s14 = smov 3  }
   0x2   :  { %s5549_s9 = sld [smem:[%s6803_s0 + %s5447_s6]]   ;;  %s5450_s18 = smov 4  }
   0x3   :  { %s5554_s13 = sld [smem:[%s6803_s0 + %s5448_s10]]   ;;  %s5451_s22 = smov 5  }
   0x4   :  { %s5559_s17 = sld [smem:[%s6803_s0 + %s5449_s14]]   ;;  %s5452_s26 = smov 6  }
   0x5   :  { %s5564_s21 = sld [smem:[%s6803_s0 + %s5450_s18]]   ;;  %s5453_s30 = smov 7  }
   0x6   :  { %s5569_s25 = sld [smem:[%s6803_s0 + %s5451_s22]]   ;;  %s5454_s4 = smov 8  }
   0x7   :  { %6884 = sst [smem:[#allocation27_spill]] %s5544_s5  ;;  %s5455_s10 = smov 9  }
   0x8   :  { %6885 = sst [smem:[#allocation28_spill]] %s5549_s9  ;;  %s5456_s15 = smov 10  }
   0x9   :  { %s5574_s29 = sld [smem:[%s6803_s0 + %s5452_s26]]   ;;  %s5457_s20 = smov 11  }
   0xa   :  { %6886 = sst [smem:[#allocation29_spill]] %s5559_s17  ;;  %s5458_s26 = smov 12  }
   0xb   :  { %6887 = sst [smem:[#allocation30_spill]] %s5564_s21  ;;  %s5459_s1 = smov 13  }
   0xc   :  { %6888 = sst [smem:[#allocation31_spill]] %s5569_s25  ;;  %s5460_s7 = smov 14  }
   0xd   :  { %s5579_s3 = sld [smem:[%s6803_s0 + %s5453_s30]]   ;;  %s5462_s22 = smov 16  }
   0xe   :  { %s5584_s8 = sld [smem:[%s6803_s0 + %s5454_s4]]   ;;  %s5463_s28 = smov 17  }
   0xf   :  { %6889 = sst [smem:[#allocation32_spill]] %s5574_s29 }
  0x10   :  { %s5589_s14 = sld [smem:[%s6803_s0 + %s5455_s10]]  }
  0x11   :  { %s5594_s19 = sld [smem:[%s6803_s0 + %s5456_s15]]   ;;  %s5461_s15 = smov 15  }
  0x12   :  { %s5599_s24 = sld [smem:[%s6803_s0 + %s5457_s20]]  }
  0x13   :  { %6890 = sst [smem:[#allocation33_spill]] %s5579_s3 }
  0x14   :  { %6891 = sst [smem:[#allocation34_spill]] %s5584_s8 }
  0x15   :  { %s5604_s30 = sld [smem:[%s6803_s0 + %s5458_s26]]  }
  0x16   :  { %6892 = sst [smem:[#allocation35_spill]] %s5589_s14 }
  0x17   :  { %6893 = sst [smem:[#allocation36_spill]] %s5594_s19 }
  0x18   :  { %6894 = sst [smem:[#allocation37_spill]] %s5599_s24 }
  0x19   :  { %s5609_s6 = sld [smem:[%s6803_s0 + %s5459_s1]]   ;;  %s5483_s1 = smov 37  }
  0x1a   :  { %s5614_s12 = sld [smem:[%s6803_s0 + %s5460_s7]]   ;;  %s5464_s7 = smov 18  }
  0x1b   :  { %s5619_s20 = sld [smem:[%s6803_s0 + %s5461_s15]]   ;;  %s5465_s15 = smov 19  }
  0x1c   :  { %s5624_s27 = sld [smem:[%s6803_s0 + %s5462_s22]]   ;;  %s5466_s22 = smov 20  }
  0x1d   :  { %s5629_s4 = sld [smem:[%s6803_s0 + %s5463_s28]]   ;;  %s5467_s28 = smov 21  }
  0x1e   :  { %s5634_s9 = sld [smem:[%s6803_s0 + %s5464_s7]]   ;;  %s5468_s7 = smov 22  }
  0x1f   :  { %6895 = sst [smem:[#allocation38_spill]] %s5609_s6 }
  0x20   :  { %6896 = sst [smem:[#allocation39_spill]] %s5614_s12 }
  0x21   :  { %6897 = sst [smem:[#allocation40_spill]] %s5619_s20 }
  0x22   :  { %6898 = sst [smem:[#allocation41_spill]] %s5624_s27 }
  0x23   :  { %6899 = sst [smem:[#allocation42_spill]] %s5629_s4 }
  0x24   :  { %6900 = sst [smem:[#allocation43_spill]] %s5634_s9 }
  0x25   :  { %s5639_s8 = sld [smem:[%s6803_s0 + %s5465_s15]]   ;;  %s5469_s15 = smov 23  }
  0x26   :  { %s5644_s27 = sld [smem:[%s6803_s0 + %s5466_s22]]   ;;  %s5470_s22 = smov 24  }
  0x27   :  { %s5649_s4 = sld [smem:[%s6803_s0 + %s5467_s28]]   ;;  %s5471_s28 = smov 25  }
  0x28   :  { %s5654_s3 = sld [smem:[%s6803_s0 + %s5468_s7]]   ;;  %s5472_s7 = smov 26  }
  0x29   :  { %s5659_s9 = sld [smem:[%s6803_s0 + %s5469_s15]]   ;;  %s5473_s15 = smov 27  }
  0x2a   :  { %s5674_s21 = sld [smem:[%s6803_s0 + %s5472_s7]]   ;;  %s5476_s7 = smov 30  }
  0x2b   :  { %6901 = sst [smem:[#allocation44_spill]] %s5639_s8 }
  0x2c   :  { %6902 = sst [smem:[#allocation45_spill]] %s5644_s27 }
  0x2d   :  { %6903 = sst [smem:[#allocation46_spill]] %s5649_s4 }
  0x2e   :  { %6904 = sst [smem:[#allocation47_spill]] %s5654_s3 }
  0x2f   :  { %6905 = sst [smem:[#allocation48_spill]] %s5659_s9 }
  0x30   :  { %s5664_s27 = sld [smem:[%s6803_s0 + %s5470_s22]]   ;;  %s5474_s22 = smov 28  }
  0x31   :  { %s5669_s8 = sld [smem:[%s6803_s0 + %s5471_s28]]   ;;  %s5475_s28 = smov 29  }
  0x32   :  { %6908 = sst [smem:[#allocation51_spill]] %s5674_s21 }
  0x33   :  { %s5679_s9 = sld [smem:[%s6803_s0 + %s5473_s15]]   ;;  %s5477_s15 = smov 31  }
  0x34   :  { %s5689_s12 = sld [smem:[%s6803_s0 + %s5475_s28]]   ;;  %s5479_s28 = smov 33  }
  0x35   :  { %s5694_s21 = sld [smem:[%s6803_s0 + %s5476_s7]]   ;;  %s5480_s7 = smov 34  }
  0x36   :  { %6906 = sst [smem:[#allocation49_spill]] %s5664_s27 }
  0x37   :  { %6907 = sst [smem:[#allocation50_spill]] %s5669_s8 }
  0x38   :  { %s5684_s27 = sld [smem:[%s6803_s0 + %s5474_s22]]   ;;  %s5478_s22 = smov 32  }
  0x39   :  { %6909 = sst [smem:[#allocation52_spill]] %s5679_s9 }
  0x3a   :  { %6911 = sst [smem:[#allocation54_spill]] %s5689_s12 }
  0x3b   :  { %6912 = sst [smem:[#allocation55_spill]] %s5694_s21 }
  0x3c   :  { %s5699_s9 = sld [smem:[%s6803_s0 + %s5477_s15]]   ;;  %s5481_s15 = smov 35  }
  0x3d   :  { %s5704_s29 = sld [smem:[%s6803_s0 + %s5478_s22]]   ;;  %s5482_s22 = smov 36  }
  0x3e   :  { %6910 = sst [smem:[#allocation53_spill]] %s5684_s27 }
  0x3f   :  { %s5709_s12 = sld [smem:[%s6803_s0 + %s5479_s28]]  }
  0x40   :  { %s5714_s6 = sld [smem:[%s6803_s0 + %s5480_s7]]  }
  0x41   :  { %s5727_s19 = sld [smem:[%s6803_s0 + %s5483_s1]]  }
  0x42   :  { %6913 = sst [smem:[#allocation56_spill]] %s5699_s9 }
  0x43   :  { %6914 = sst [smem:[#allocation57_spill]] %s5704_s29 }
  0x44   :  { %s5719_s9 = sld [smem:[%s6803_s0 + %s5481_s15]]  }
  0x45   :  { %6915 = sst [smem:[#allocation58_spill]] %s5709_s12 }
  0x46   :  { %s4585_s29 = sld [smem:[%s6803_s0 + %s5482_s22]]  }
  0x4c   :  { %v80_v0 = vstv %s4585_s29 }
  0x4d   :  { %81 = vst [vmem:[#allocation4] sm:$0x1] %v80_v0 }
  0x4e   :  { %82 = vsyncpa [#allocation6], 0 }
  0x4f   :  { %83 = vsyncpa [#allocation8], 0 }
  0x50   :  { %84 = vsyncpa [#allocation11], 0 }
  0x51   :  { %85 = vsyncpa [#allocation14], 0 }
  0x52   :  { %86 = vsyncpa [#allocation17], 0 }
  0x53   :  { %87 = vsyncpa [#allocation20], 0  ;;  %s5729_s7 = smov 0  }
  0x54 LB: > { %s6916_s24 = sld [smem:[#allocation37_spill]]  ;;  %s6918_s25 = sld [smem:[#allocation31_spill]]  ;;  %s5445_s7 = sphi %s5729_s7, %s93_s7  }
  0x55   : > { %s6917_s27 = sld [smem:[#allocation53_spill]]  ;;  %s6919_s21 = sld [smem:[#allocation55_spill]] }
  0x56   : > { %s6920_s20 = sld [smem:[#allocation40_spill]]  ;;  %s6921_s17 = sld [smem:[#allocation29_spill]] }
  0x57   : > { %s6922_s14 = sld [smem:[#allocation35_spill]]  ;;  %s6923_s12 = sld [smem:[#allocation58_spill]] }
  0x58   : > { %s6924_s8 = sld [smem:[#allocation50_spill]]  ;;  %s6925_s4 = sld [smem:[#allocation46_spill]] }
  0x59   : > { %s6926_s3 = sld [smem:[#allocation47_spill]]  ;;  %s5735_s0 = sadd.s32 4294967295, %s5445_s7  }
  0x5a   : > { %p4589_p0 = scmp.ge.s32.totalorder %s5445_s7, 1  ;;  %p911_p1 = scmp.lt.s32.totalorder %s5445_s7, 3 }
  0x5b   : > { %p6816_p2 = scmp.eq.s32.totalorder %s5735_s0, 0  ;;  %s5484_s10 = smov [#allocation7]  }
  0x5c   : > { %p5740_p3 = pnand %p4589_p0, %p911_p1  ;;  %s954_s11 = sshll.u32 %s5484_s10, 4  ;;  %s5744_s11 = int_to_ptr.vmem [resolvable:$true] %s954_s11 }
  0x5d   : > { %s5485_s15 = smov [#allocation10]   ;;  %s5486_s22 = smov [#allocation13]  }
  0x5e   : > { %s6927_s29 = scalar_select %p5740_p3, 1, 0 }
  0x5f   : > { %p4963_p4 = pneg %p5740_p3  ;;  %s992_s16 = sshll.u32 %s5485_s15, 4  ;;  %s5748_s16 = int_to_ptr.vmem [resolvable:$true] %s992_s16 }
  0x60   : > { %s1032_s23 = sshll.u32 %s5486_s22, 4  ;;  %s5487_s26 = smov [#allocation16]   ;;  %s5756_s23 = int_to_ptr.vmem [resolvable:$true] %s1032_s23 }
  0x61   : > { %p5752_p5 = pnand %p6816_p2, %p4963_p4  ;;  %s5758_s1 = sshll.u32 %s5487_s26, 4  ;;  %s1067_s1 = int_to_ptr.vmem [resolvable:$true] %s5758_s1 }
  0x62   : > { %s5135_s28 = scalar_lea.hbm %s6922_s14, 256 }
  0x63   : > { %p5136_p6 = scmp.ne.s32.totalorder %s6922_s14, %s5135_s28  ;;  %p5764_p7 = pneg %p5752_p5 }
  0x64   : > { %p5142_p10 = scmp.lt.u32.totalorder %s5135_s28, %s6922_s14 }
  0x65   : > { %p5138_p8 = pnand %p5764_p7, %p5136_p6 }
  0x67   : > { %p5139_p9 = pneg %p5138_p8 }
  0x69   : > { %p5144_p11 = pnand %p5142_p10, %p5139_p9 }
  0x6b   : > { %5147 = shalt.err (!%p5144_p11)
}
  0x6c   : > { %s5148_s10 = scalar_lea.vmem %s5744_s11, 256  ;;  %p5156_p1 = scmp.lt.s32.totalorder %s5744_s11, %s5744_s11 }
  0x6d   : > { %p5149_p12 = scmp.ne.s32.totalorder %s5744_s11, %s5148_s10  ;;  %p5157_p4 = scmp.lt.s32.totalorder %s5148_s10, %s5148_s10 }
  0x6f   : > { %p5151_p13 = pnand %p5149_p12, %p5764_p7  ;;  %p5158_p2 = por %p5157_p4, %p5156_p1 }
  0x71   : > { %p5152_p0 = pneg %p5151_p13 }
  0x73   : > { %p5159_p3 = pnand %p5158_p2, %p5152_p0 }
  0x75   : > { %5162 = shalt.err (!%p5159_p3)
}
  0x76   : > { %s5488_s15 = smov 128   ;;  %s5489_s22 = smov 8  }
  0x77   : > { %4969 = dma.hbm_to_vmem [thread:$0]  (!%p5752_p5), %s6922_s14, 256, %s5744_s11, [#allocation8], %s5488_s15, %s5488_s15, %s5489_s22  }
  0x78   : > { %s5163_s26 = scalar_lea.hbm %s6920_s20, 256 }
  0x79   : > { %p5164_p6 = scmp.ne.s32.totalorder %s6920_s20, %s5163_s26  ;;  %p5170_p3 = scmp.lt.u32.totalorder %s5163_s26, %s6920_s20 }
  0x7b   : > { %p5166_p8 = pnand %p5164_p6, %p5764_p7 }
  0x7d   : > { %p5167_p2 = pneg %p5166_p8 }
  0x7f   : > { %p5172_p9 = pnand %p5170_p3, %p5167_p2 }
  0x81   : > { %5175 = shalt.err (!%p5172_p9)
}
  0x82   : > { %s5176_s28 = scalar_lea.vmem %s5748_s16, 256  ;;  %p5184_p13 = scmp.lt.s32.totalorder %s5748_s16, %s5748_s16 }
  0x83   : > { %p5177_p10 = scmp.ne.s32.totalorder %s5748_s16, %s5176_s28  ;;  %p5185_p0 = scmp.lt.s32.totalorder %s5176_s28, %s5176_s28 }
  0x85   : > { %p5179_p11 = pnand %p5177_p10, %p5764_p7  ;;  %p5186_p1 = por %p5185_p0, %p5184_p13 }
  0x87   : > { %p5180_p12 = pneg %p5179_p11 }
  0x89   : > { %p5187_p4 = pnand %p5186_p1, %p5180_p12 }
  0x8b   : > { %5190 = shalt.err (!%p5187_p4)
}
  0x8c   : > { %4975 = dma.hbm_to_vmem [thread:$0]  (!%p5752_p5), %s6920_s20, 256, %s5748_s16, [#allocation11], %s5488_s15, %s5488_s15, %s5489_s22  }
  0x8d   : > { %s5191_s11 = scalar_lea.hbm %s6926_s3, 128 }
  0x8e   : > { %p5192_p6 = scmp.ne.s32.totalorder %s6926_s3, %s5191_s11  ;;  %p5198_p3 = scmp.lt.u32.totalorder %s5191_s11, %s6926_s3 }
  0x90   : > { %p5194_p8 = pnand %p5192_p6, %p5764_p7 }
  0x92   : > { %p5195_p2 = pneg %p5194_p8 }
  0x94   : > { %p5200_p9 = pnand %p5198_p3, %p5195_p2 }
  0x96   : > { %5203 = shalt.err (!%p5200_p9)
}
  0x97   : > { %s5204_s10 = scalar_lea.vmem %s5756_s23, 128  ;;  %p5212_p13 = scmp.lt.s32.totalorder %s5756_s23, %s5756_s23 }
  0x98   : > { %p5205_p10 = scmp.ne.s32.totalorder %s5756_s23, %s5204_s10  ;;  %p5213_p0 = scmp.lt.s32.totalorder %s5204_s10, %s5204_s10 }
  0x9a   : > { %p5207_p11 = pnand %p5205_p10, %p5764_p7  ;;  %p5214_p1 = por %p5213_p0, %p5212_p13 }
  0x9c   : > { %p5208_p12 = pneg %p5207_p11 }
  0x9e   : > { %p5215_p4 = pnand %p5214_p1, %p5208_p12 }
  0xa0   : > { %5218 = shalt.err (!%p5215_p4)
}
  0xa1   : > { %4981 = dma.hbm_to_vmem [thread:$0]  (!%p5752_p5), %s6926_s3, 128, %s5756_s23, [#allocation14]  }
  0xa2   : > { %s5219_s16 = scalar_lea.hbm %s6917_s27, 128 }
  0xa3   : > { %p5220_p6 = scmp.ne.s32.totalorder %s6917_s27, %s5219_s16  ;;  %p5226_p3 = scmp.lt.u32.totalorder %s5219_s16, %s6917_s27 }
  0xa5   : > { %p5222_p8 = pnand %p5220_p6, %p5764_p7 }
  0xa7   : > { %p5223_p2 = pneg %p5222_p8 }
  0xa9   : > { %p5228_p9 = pnand %p5226_p3, %p5223_p2 }
  0xab   : > { %5231 = shalt.err (!%p5228_p9)
}
  0xac   : > { %s5232_s26 = scalar_lea.vmem %s1067_s1, 128  ;;  %p5240_p13 = scmp.lt.s32.totalorder %s1067_s1, %s1067_s1 }
  0xad   : > { %p5233_p10 = scmp.ne.s32.totalorder %s1067_s1, %s5232_s26  ;;  %p5241_p0 = scmp.lt.s32.totalorder %s5232_s26, %s5232_s26 }
  0xaf   : > { %p5235_p11 = pnand %p5233_p10, %p5764_p7  ;;  %p5242_p1 = por %p5241_p0, %p5240_p13 }
  0xb1   : > { %p5236_p12 = pneg %p5235_p11 }
  0xb3   : > { %p5243_p4 = pnand %p5242_p1, %p5236_p12 }
  0xb5   : > { %5246 = shalt.err (!%p5243_p4)
}
  0xb6   : > { %4987 = dma.hbm_to_vmem [thread:$0]  (!%p5752_p5), %s6917_s27, 128, %s1067_s1, [#allocation17]  }
  0xb7   : > { %s5490_s23 = smov [#allocation5]   ;;  %s5491_s11 = smov [#allocation9]  }
  0xb8   : > { %s926_s28 = sshll.u32 %s5490_s23, 4  ;;  %s973_s10 = sshll.u32 %s5491_s11, 4  ;;  %s927_s28 = int_to_ptr.vmem [resolvable:$true] %s926_s28  ;;  %s974_s10 = int_to_ptr.vmem [resolvable:$true] %s973_s10 }
  0xb9   : > { %s5247_s16 = scalar_lea.hbm %s6921_s17, 256 }
  0xba   : > { %p5248_p6 = scmp.ne.s32.totalorder %s6921_s17, %s5247_s16  ;;  %p5254_p3 = scmp.lt.u32.totalorder %s5247_s16, %s6921_s17 }
  0xbc   : > { %p5250_p8 = pnand %p5248_p6, %p5764_p7 }
  0xbe   : > { %p5251_p2 = pneg %p5250_p8 }
  0xc0   : > { %p5256_p9 = pnand %p5254_p3, %p5251_p2 }
  0xc2   : > { %5259 = shalt.err (!%p5256_p9)
}
  0xc3   : > { %s5260_s26 = scalar_lea.vmem %s927_s28, 256  ;;  %p5268_p13 = scmp.lt.s32.totalorder %s927_s28, %s927_s28 }
  0xc4   : > { %p5261_p10 = scmp.ne.s32.totalorder %s927_s28, %s5260_s26  ;;  %p5269_p0 = scmp.lt.s32.totalorder %s5260_s26, %s5260_s26 }
  0xc6   : > { %p5263_p11 = pnand %p5261_p10, %p5764_p7  ;;  %p5270_p1 = por %p5269_p0, %p5268_p13 }
  0xc8   : > { %p5264_p12 = pneg %p5263_p11 }
  0xca   : > { %p5271_p4 = pnand %p5270_p1, %p5264_p12 }
  0xcc   : > { %5274 = shalt.err (!%p5271_p4)
}
  0xcd   : > { %4966 = dma.hbm_to_vmem [thread:$0]  (!%p5752_p5), %s6921_s17, 256, %s927_s28, [#allocation6], %s5488_s15, %s5488_s15, %s5489_s22  }
  0xce   : > { %s5275_s1 = scalar_lea.hbm %s5604_s30, 256 }
  0xcf   : > { %p5276_p6 = scmp.ne.s32.totalorder %s5604_s30, %s5275_s1  ;;  %p5282_p3 = scmp.lt.u32.totalorder %s5275_s1, %s5604_s30 }
  0xd1   : > { %p5278_p8 = pnand %p5276_p6, %p5764_p7 }
  0xd3   : > { %p5279_p2 = pneg %p5278_p8 }
  0xd5   : > { %p5284_p9 = pnand %p5282_p3, %p5279_p2 }
  0xd7   : > { %5287 = shalt.err (!%p5284_p9)
}
  0xd8   : > { %s5288_s23 = scalar_lea.vmem %s974_s10, 256  ;;  %p5296_p13 = scmp.lt.s32.totalorder %s974_s10, %s974_s10 }
  0xd9   : > { %p5289_p10 = scmp.ne.s32.totalorder %s974_s10, %s5288_s23  ;;  %p5297_p0 = scmp.lt.s32.totalorder %s5288_s23, %s5288_s23 }
  0xdb   : > { %p5291_p11 = pnand %p5289_p10, %p5764_p7  ;;  %p5298_p1 = por %p5297_p0, %p5296_p13 }
  0xdd   : > { %p5292_p12 = pneg %p5291_p11 }
  0xdf   : > { %p5299_p4 = pnand %p5298_p1, %p5292_p12 }
  0xe1   : > { %5302 = shalt.err (!%p5299_p4)
}
  0xe2   : > { %4972 = dma.hbm_to_vmem [thread:$0]  (!%p5752_p5), %s5604_s30, 256, %s974_s10, [#allocation8], %s5488_s15, %s5488_s15, %s5489_s22  }
  0xe3   : > { %s5492_s28 = smov [#allocation12]   ;;  %s5493_s16 = smov [#allocation15]  }
  0xe4   : > { %s1021_s11 = sshll.u32 %s5492_s28, 4  ;;  %s1049_s26 = sshll.u32 %s5493_s16, 4  ;;  %s1022_s11 = int_to_ptr.vmem [resolvable:$true] %s1021_s11  ;;  %s1050_s26 = int_to_ptr.vmem [resolvable:$true] %s1049_s26 }
  0xe5   : > { %s5303_s1 = scalar_lea.hbm %s6925_s4, 256 }
  0xe6   : > { %p5304_p6 = scmp.ne.s32.totalorder %s6925_s4, %s5303_s1  ;;  %p5310_p3 = scmp.lt.u32.totalorder %s5303_s1, %s6925_s4 }
  0xe8   : > { %p5306_p8 = pnand %p5304_p6, %p5764_p7 }
  0xea   : > { %p5307_p2 = pneg %p5306_p8 }
  0xec   : > { %p5312_p9 = pnand %p5310_p3, %p5307_p2 }
  0xee   : > { %5315 = shalt.err (!%p5312_p9)
}
  0xef   : > { %s5316_s23 = scalar_lea.vmem %s1022_s11, 256  ;;  %p5324_p13 = scmp.lt.s32.totalorder %s1022_s11, %s1022_s11 }
  0xf0   : > { %p5317_p10 = scmp.ne.s32.totalorder %s1022_s11, %s5316_s23  ;;  %p5325_p0 = scmp.lt.s32.totalorder %s5316_s23, %s5316_s23 }
  0xf2   : > { %p5319_p11 = pnand %p5317_p10, %p5764_p7  ;;  %p5326_p1 = por %p5325_p0, %p5324_p13 }
  0xf4   : > { %p5320_p12 = pneg %p5319_p11 }
  0xf6   : > { %p5327_p4 = pnand %p5326_p1, %p5320_p12 }
  0xf8   : > { %5330 = shalt.err (!%p5327_p4)
}
  0xf9   : > { %4978 = dma.hbm_to_vmem [thread:$0]  (!%p5752_p5), %s6925_s4, 256, %s1022_s11, [#allocation11]  }
  0xfa   : > { %s5331_s15 = scalar_lea.hbm %s6924_s8, 128 }
  0xfb   : > { %p5332_p6 = scmp.ne.s32.totalorder %s6924_s8, %s5331_s15  ;;  %p5338_p3 = scmp.lt.u32.totalorder %s5331_s15, %s6924_s8 }
  0xfd   : > { %p5334_p8 = pnand %p5332_p6, %p5764_p7 }
  0xff   : > { %p5335_p2 = pneg %p5334_p8 }
 0x101   : > { %p5340_p9 = pnand %p5338_p3, %p5335_p2 }
 0x103   : > { %5343 = shalt.err (!%p5340_p9)
}
 0x104   : > { %s5344_s22 = scalar_lea.vmem %s1050_s26, 128  ;;  %p5352_p13 = scmp.lt.s32.totalorder %s1050_s26, %s1050_s26 }
 0x105   : > { %p5345_p10 = scmp.ne.s32.totalorder %s1050_s26, %s5344_s22  ;;  %p5353_p0 = scmp.lt.s32.totalorder %s5344_s22, %s5344_s22 }
 0x107   : > { %p5347_p11 = pnand %p5345_p10, %p5764_p7  ;;  %p5354_p1 = por %p5353_p0, %p5352_p13 }
 0x109   : > { %p5348_p12 = pneg %p5347_p11 }
 0x10b   : > { %p5355_p4 = pnand %p5354_p1, %p5348_p12 }
 0x10d   : > { %5358 = shalt.err (!%p5355_p4)
}
 0x10e   : > { %4984 = dma.hbm_to_vmem [thread:$0]  (!%p5752_p5), %s6924_s8, 128, %s1050_s26, [#allocation14]  }
 0x10f   : > { %s5494_s10 = smov [#allocation18]   ;;  %s5495_s11 = smov [#allocation19]  }
 0x110   : > { %s1080_s28 = sshll.u32 %s5494_s10, 4  ;;  %s1097_s16 = sshll.u32 %s5495_s11, 4  ;;  %s1081_s28 = int_to_ptr.vmem [resolvable:$true] %s1080_s28  ;;  %s1098_s16 = int_to_ptr.vmem [resolvable:$true] %s1097_s16 }
 0x111   : > { %s5359_s1 = scalar_lea.hbm %s6919_s21, 128 }
 0x112   : > { %p5360_p6 = scmp.ne.s32.totalorder %s6919_s21, %s5359_s1  ;;  %p5366_p3 = scmp.lt.u32.totalorder %s5359_s1, %s6919_s21 }
 0x114   : > { %p5362_p8 = pnand %p5360_p6, %p5764_p7 }
 0x116   : > { %p5363_p2 = pneg %p5362_p8 }
 0x118   : > { %p5368_p9 = pnand %p5366_p3, %p5363_p2 }
 0x11a   : > { %5371 = shalt.err (!%p5368_p9)
}
 0x11b   : > { %s5372_s23 = scalar_lea.vmem %s1081_s28, 128  ;;  %p5380_p13 = scmp.lt.s32.totalorder %s1081_s28, %s1081_s28 }
 0x11c   : > { %p5373_p10 = scmp.ne.s32.totalorder %s1081_s28, %s5372_s23  ;;  %p5381_p0 = scmp.lt.s32.totalorder %s5372_s23, %s5372_s23 }
 0x11e   : > { %p5375_p11 = pnand %p5373_p10, %p5764_p7  ;;  %p5382_p1 = por %p5381_p0, %p5380_p13 }
 0x120   : > { %p5376_p12 = pneg %p5375_p11 }
 0x122   : > { %p5383_p4 = pnand %p5382_p1, %p5376_p12 }
 0x124   : > { %5386 = shalt.err (!%p5383_p4)
}
 0x125   : > { %4990 = dma.hbm_to_vmem [thread:$0]  (!%p5752_p5), %s6919_s21, 128, %s1081_s28, [#allocation17]  }
 0x126   : > { %s5387_s26 = scalar_lea.hbm %s6923_s12, 128 }
 0x127   : > { %p5388_p6 = scmp.ne.s32.totalorder %s6923_s12, %s5387_s26  ;;  %p5394_p3 = scmp.lt.u32.totalorder %s5387_s26, %s6923_s12 }
 0x129   : > { %p5390_p8 = pnand %p5388_p6, %p5764_p7 }
 0x12b   : > { %p5391_p2 = pneg %p5390_p8 }
 0x12d   : > { %p5396_p9 = pnand %p5394_p3, %p5391_p2 }
 0x12f   : > { %5399 = shalt.err (!%p5396_p9)
}
 0x130   : > { %s5400_s15 = scalar_lea.vmem %s1098_s16, 128  ;;  %p5408_p13 = scmp.lt.s32.totalorder %s1098_s16, %s1098_s16 }
 0x131   : > { %p5401_p10 = scmp.ne.s32.totalorder %s1098_s16, %s5400_s15  ;;  %p5409_p0 = scmp.lt.s32.totalorder %s5400_s15, %s5400_s15 }
 0x133   : > { %p5403_p11 = pnand %p5401_p10, %p5764_p7  ;;  %p5410_p1 = por %p5409_p0, %p5408_p13 }
 0x135   : > { %p5404_p12 = pneg %p5403_p11 }
 0x137   : > { %p5411_p4 = pnand %p5410_p1, %p5404_p12 }
 0x139   : > { %5414 = shalt.err (!%p5411_p4)
}
 0x13a   : > { %4993 = dma.hbm_to_vmem [thread:$0]  (!%p5752_p5), %s6923_s12, 128, %s1098_s16, [#allocation20]  }
 0x13b   : > { %p6930_p6 = scmp.ne.s32.totalorder %s6927_s29, 0 }
 0x13c   : > { %p6931_p8 = scmp.eq.s32.totalorder (!%p6930_p6), %s5735_s0, 0 }
 0x13d   : > { %1134 = sbr.rel (%p6930_p6) target bundleno = 5671 (0x1627), region = 168 }
 0x144   : > { %5420 = dma.done.wait (%p6931_p8), [#allocation6], 256   ;;  %p6932_p2 = pmov %p6931_p8 }
 0x146   : > { %5422 = vsyncadd (%p6932_p2), [#allocation6], 4294967040  ;;  %p6933_p7 = pmov %p6932_p2 }
 0x147   : > { %p6934_p3 = pmov %p6932_p2 }
 0x148   : > { %5424 = dma.done.wait (%p6933_p7), [#allocation8], 512  }
 0x149   : > { %5426 = vsyncadd (%p6934_p3), [#allocation8], 4294966784  ;;  %p6935_p9 = pmov %p6932_p2 }
 0x14a   : > { %p6936_p5 = pmov %p6932_p2 }
 0x14b   : > { %5428 = dma.done.wait (%p6935_p9), [#allocation11], 512  }
 0x14c   : > { %5430 = vsyncadd (%p6936_p5), [#allocation11], 4294966784  ;;  %p6937_p10 = pmov %p6932_p2 }
 0x14d   : > { %p6938_p11 = pmov %p6932_p2 }
 0x14e   : > { %5432 = dma.done.wait (%p6937_p10), [#allocation14], 256  }
 0x14f   : > { %5434 = vsyncadd (%p6938_p11), [#allocation14], 4294967040  ;;  %p6939_p12 = pmov %p6932_p2 }
 0x150   : > { %p6940_p13 = pmov %p6932_p2 }
 0x151   : > { %5436 = dma.done.wait (%p6939_p12), [#allocation17], 256  }
 0x152   : > { %5438 = vsyncadd (%p6940_p13), [#allocation17], 4294967040  ;;  %p6941_p0 = pmov %p6932_p2 }
 0x154   : > { %5440 = dma.done.wait (%p6941_p0), [#allocation20], 128   ;;  %p6942_p1 = pmov %p6941_p0 }
 0x155   : > { %s6943_s5 = sld [smem:[#allocation27_spill]]  ;;  %p1265_p4 = scmp.lt.s32.totalorder %s5735_s0, 1  ;;  %v1324_v1 = vlaneseq  ;;  %v1313_v6 = vld [vmem:[%s5554_s13] sm:$0xff]  ;;  %v5945_v8 = vld [vmem:[%s5554_s13 + $0x8] sm:$0xff]  ;;  %v4616_v30 = vld [vmem:[%s5554_s13 + $0x10] ss:$0 sm:$0xff] }
 0x156   : > { %5442 = vsyncadd (%p6942_p1), [#allocation20], 4294967168  ;;  %s6820_s2 = smov 112   ;;  %s6822_s22 = smov 111   ;;  %v4617_v31 = vld [vmem:[%s5554_s13 + $0x18] ss:$0 sm:$0xff] }
 0x157   : > { %s6988_s0 = smov (!%p1265_p4, %s5735_s0), 1  ;;  %v5925_v2 = vshrl.u32 %v1324_v1, 7  ;;  %s6860_s10 = smov 113   ;;  %vm1338_vm0 = vcmask 908288   ;;  %vm1379_vm1 = vcmask 916480   ;;  %vm1420_vm2 = vcmask 924672  }
 0x158   : > { %s4647_s29 = sshll.u32 %s6988_s0, 4  ;;  %s6854_s28 = smov 127   ;;  %vm1461_vm3 = vcmask 1039360   ;;  %vm1437_vm4 = vcmask 121856   ;;  %vm1478_vm5 = vcmask 7168   ;;  %vm1396_vm6 = vcmask 130048  }
 0x159   : > { %v5929_v3 = vsub.s32 1, %v5925_v2  ;;  %v5932_v4 = vsub.s32 4, %v5925_v2  ;;  %v5935_v5 = vsub.s32 0, %v5925_v2  ;;  %v5961_v15 = vsub.s32 2, %v5925_v2  ;;  %s6862_s11 = smov 1   ;;  %s6858_s16 = smov 15  }
 0x15a   : > { %v5970_v18 = vsub.s32 3, %v5925_v2  ;;  %v5978_v21 = vsub.s32 5, %v5925_v2  ;;  %v5986_v24 = vsub.s32 6, %v5925_v2  ;;  %v5994_v27 = vsub.s32 7, %v5925_v2  ;;  %s6856_s1 = smov 16   ;;  %s6818_s23 = smov 17  }
 0x15b   : > { %s5938_s18 = scalar_lea.vmem %s6943_s5, %s4647_s29  ;;  %v1368_v9 = vrot.slane %v1313_v6, %v5929_v3  ;;  %v1490_v10 = vrot.slane %v1313_v6, %v5932_v4  ;;  %v1327_v11 = vrot.slane %v1313_v6, %v5935_v5  ;;  %v1372_v13 = vrot.slane %v5945_v8, %v5929_v3  ;;  %s6944_s26 = sld [smem:[#allocation36_spill]] }
 0x15c   : > { %v5942_v7 = vld [vmem:[%s5938_s18] sm:$0xff]  ;;  %v1331_v14 = vrot.slane %v5945_v8, %v5935_v5  ;;  %v1413_v16 = vrot.slane %v5945_v8, %v5961_v15  ;;  %v1409_v17 = vrot.slane %v1313_v6, %v5961_v15  ;;  %v1454_v19 = vrot.slane %v5945_v8, %v5970_v18  ;;  %v6008_v32 = vld [vmem:[%s5938_s18 + $0x8] sm:$0xff]  ;;  %s6834_s15 = smov 55   ;;  %s6826_s29 = smov 7  }
 0x15d   : > { %1317 = vst [vmem:[#allocation2] sm:$0xff] %v5942_v7  ;;  %1375 = vrot.lane.b32.xlu1 %v1368_v9, %s6820_s2  ;;  %v5953_v12 = vmul.f32 %v1490_v10, %v5942_v7  ;;  %1334 = vrot.lane.b32.xlu0 %v1327_v11, %s6822_s22  ;;  %v1450_v20 = vrot.slane %v1313_v6, %v5970_v18  ;;  %vm1355_vm7 = vcmask 138240   ;;  %vm1690_vm8 = vcmask 1043456   ;;  %s6824_s18 = smov 9   ;;  %s6957_s3 = smov 63  }
 0x15e   : > { %v1509_v22 = vrot.slane %v5945_v8, %v5978_v21  ;;  %v1505_v23 = vrot.slane %v1313_v6, %v5978_v21  ;;  %v1548_v25 = vrot.slane %v5945_v8, %v5986_v24  ;;  %v1544_v26 = vrot.slane %v1313_v6, %v5986_v24  ;;  %s6958_s4 = smov 57   ;;  %s6959_s5 = smov 7  }
 0x15f   : > { %1497 = vst [vmem:[#allocation3 + $0x40] sm:$0xff] %v5953_v12  ;;  %v1587_v28 = vrot.slane %v5945_v8, %v5994_v27  ;;  %v1583_v29 = vrot.slane %v1313_v6, %v5994_v27  ;;  %v1494_v59 = vrot.slane %v5945_v8, %v5932_v4  ;;  %vm1686_vm9 = vcmask 588800   ;;  %s6960_s8 = smov 1   ;;  %s6962_s12 = smov 8  }
 0x160   : > { %vm1815_vm10 = vcmask 523264   ;;  %vm1895_vm12 = vcmask 1048064   ;;  %vm5521_vm13 = vmmov 0   ;;  %s6963_s14 = smov 73   ;;  %s6966_s17 = smov 65  }
 0x161   : > { %1377 = vrot.lane.b32.xlu1 %v1372_v13, %s6820_s2  ;;  %1336 = vrot.lane.b32.xlu0 %v1331_v14, %s6822_s22  ;;  %v6043_v9 = vmul.f32 %v1494_v59, %v6008_v32  ;;  %v1290_v59 = vld [vmem:[%s6918_s25 + $0x48] sm:$0xff]  ;;  %s6968_s20 = smov 119   ;;  %s6969_s21 = smov 120  }
 0x162   : > { %s6971_s27 = sld [smem:[#allocation48_spill]] }
 0x165   : > { %1418 = vrot.lane.b32.xlu1 %v1413_v16, %s6860_s10  ;;  %1416 = vrot.lane.b32.xlu0 %v1409_v17, %s6860_s10 }
 0x169   : > { %1459 = vrot.lane.b32.xlu1 %v1454_v19, %s6854_s28  ;;  %1457 = vrot.lane.b32.xlu0 %v1450_v20, %s6854_s28 }
 0x16d   : > { %1514 = vrot.lane.b32.xlu1 %v1509_v22, %s6862_s11  ;;  %1512 = vrot.lane.b32.xlu0 %v1505_v23, %s6862_s11 }
 0x171   : > { %1553 = vrot.lane.b32.xlu1 %v1548_v25, %s6858_s16  ;;  %1551 = vrot.lane.b32.xlu0 %v1544_v26, %s6858_s16 }
 0x175   : > { %1592 = vrot.lane.b32.xlu1 %v1587_v28, %s6856_s1  ;;  %1590 = vrot.lane.b32.xlu0 %v1583_v29, %s6856_s1  ;;  %v5504_v28 = vmov 0  }
 0x176   : > { %1729 = vmatprep.mubr.bf16.mxu0 %v5504_v28  ;;  %5111 = vset.pattern.permute.xlu0 %v5504_v28 }
 0x177   : > { %5112 = vset.pattern.permute.xlu1 %v5504_v28 }
 0x179   : > { %1629 = vrot.lane.b32.xlu0 %v4616_v30, %s6818_s23  ;;  %1631 = vrot.lane.b32.xlu1 %v4617_v31, %s6818_s23  ;;  %v1297_v30 = vld [vmem:[%s6918_s25 + $0x80] sm:$0xff]  ;;  %v1298_v31 = vld [vmem:[%s6918_s25 + $0x88] sm:$0xff] }
 0x1cf   : > { %v1376_v33 = vpop.permute.xlu1 %1375  ;;  %v1335_v34 = vpop.permute.xlu0 %1334 }
 0x1d0   : > { %v1343_v35 = vmul.f32 %v1335_v34, %v6008_v32  ;;  %v1384_v45 = vmul.f32 %v1376_v33, %v6008_v32 }
 0x1d2   : > { %1349 = vrot.lane.b32.xlu0 %v1343_v35, %s6818_s23  ;;  %v4832_v35 = vpack.c.bf16 %v1298_v31, %v1297_v30 }
 0x1d3   : > { %v1378_v36 = vpop.permute.xlu1 %1377  ;;  %v1337_v37 = vpop.permute.xlu0 %1336 }
 0x1d4   : > { %v1345_v38 = vmul.f32 %v1337_v37, %v6008_v32  ;;  %v1386_v41 = vmul.f32 %v1378_v36, %v6008_v32  ;;  %v1339_v57 = vsel %vm1338_vm0, %v1335_v34, %v1337_v37  ;;  %v1380_v62 = vsel %vm1379_vm1, %v1376_v33, %v1378_v36  ;;  %v1281_v33 = vld [vmem:[%s6918_s25] sm:$0xff]  ;;  %v1282_v36 = vld [vmem:[%s6918_s25 + $0x8] sm:$0xff]  ;;  %v1299_v37 = vld [vmem:[%s6918_s25 + $0x90] sm:$0xff]  ;;  %4833 = vmatprep.subr.bf16.mxu1 %v4832_v35 }
 0x1d5   : > { %v1344_v61 = vmul.f32 %v1339_v57, %v5942_v7  ;;  %v1385_v6 = vmul.f32 %v1380_v62, %v5942_v7 }
 0x1d6   : > { %1353 = vrot.lane.b32.xlu1 %v1345_v38, %s6818_s23  ;;  %v1300_v38 = vld [vmem:[%s6918_s25 + $0x98] sm:$0xff] }
 0x1d7   : > { %v1419_v39 = vpop.permute.xlu1 %1418  ;;  %v1417_v40 = vpop.permute.xlu0 %1416 }
 0x1d8   : > { %v1425_v42 = vmul.f32 %v1417_v40, %v6008_v32  ;;  %v1427_v48 = vmul.f32 %v1419_v39, %v6008_v32  ;;  %v1421_v8 = vsel %vm1420_vm2, %v1417_v40, %v1419_v39  ;;  %v4836_v39 = vpack.c.bf16 %v1300_v38, %v1299_v37  ;;  %v1283_v40 = vld [vmem:[%s6918_s25 + $0x10] sm:$0xff] }
 0x1d9   : > { %v1426_v11 = vmul.f32 %v1421_v8, %v5942_v7  ;;  %v1309_v8 = vld [vmem:[%s6918_s25 + $0xe0] sm:$0xff] }
 0x1da   : > { %1394 = vrot.lane.b32.xlu1 %v1386_v41, %s6856_s1  ;;  %1431 = vrot.lane.b32.xlu0 %v1425_v42, %s6858_s16  ;;  %v1284_v41 = vld [vmem:[%s6918_s25 + $0x18] sm:$0xff]  ;;  %v1301_v42 = vld [vmem:[%s6918_s25 + $0xa0] sm:$0xff] }
 0x1db   : > { %v1460_v43 = vpop.permute.xlu1 %1459  ;;  %v1458_v44 = vpop.permute.xlu0 %1457 }
 0x1dc   : > { %v1468_v51 = vmul.f32 %v1460_v43, %v6008_v32  ;;  %v1466_v55 = vmul.f32 %v1458_v44, %v6008_v32  ;;  %v1462_v13 = vsel %vm1461_vm3, %v1458_v44, %v1460_v43  ;;  %v1302_v43 = vld [vmem:[%s6918_s25 + $0xa8] sm:$0xff] }
 0x1dd   : > { %v1467_v17 = vmul.f32 %v1462_v13, %v5942_v7 }
 0x1de   : > { %1390 = vrot.lane.b32.xlu1 %v1384_v45, %s6856_s1  ;;  %v4838_v45 = vpack.c.bf16 %v1284_v41, %v1283_v40 }
 0x1df   : > { %v1515_v46 = vpop.permute.xlu1 %1514  ;;  %v1513_v47 = vpop.permute.xlu0 %1512 }
 0x1e0   : > { %v1520_v49 = vmul.f32 %v1513_v47, %v5942_v7  ;;  %v1522_v60 = vmul.f32 %v1515_v46, %v5942_v7  ;;  %v1516_v19 = vsel %vm1478_vm5, %v1513_v47, %v1515_v46  ;;  %v4840_v46 = vpack.c.bf16 %v1302_v43, %v1301_v42  ;;  %v1285_v47 = vld [vmem:[%s6918_s25 + $0x20] sm:$0xff] }
 0x1e1   : > { %v1521_v23 = vmul.f32 %v1516_v19, %v6008_v32  ;;  %v1312_v19 = vld [vmem:[%s6918_s25 + $0xf8] sm:$0xff] }
 0x1e2   : > { %1435 = vrot.lane.b32.xlu1 %v1427_v48, %s6858_s16  ;;  %1526 = vrot.lane.b32.xlu0 %v1520_v49, %s6854_s28  ;;  %v1286_v48 = vld [vmem:[%s6918_s25 + $0x28] sm:$0xff]  ;;  %v1303_v49 = vld [vmem:[%s6918_s25 + $0xb0] sm:$0xff] }
 0x1e3   : > { %v1554_v50 = vpop.permute.xlu1 %1553  ;;  %v1552_v53 = vpop.permute.xlu0 %1551 }
 0x1e4   : > { %v1561_v52 = vmul.f32 %v1554_v50, %v5942_v7  ;;  %v1559_v63 = vmul.f32 %v1552_v53, %v5942_v7  ;;  %v1555_v14 = vsel %vm1437_vm4, %v1552_v53, %v1554_v50  ;;  %v1304_v50 = vld [vmem:[%s6918_s25 + $0xb8] sm:$0xff] }
 0x1e5   : > { %v1560_v16 = vmul.f32 %v1555_v14, %v6008_v32  ;;  %v1288_v53 = vld [vmem:[%s6918_s25 + $0x38] sm:$0xff]  ;;  %v1293_v14 = vld [vmem:[%s6918_s25 + $0x60] sm:$0xff] }
 0x1e6   : > { %1476 = vrot.lane.b32.xlu1 %v1468_v51, %s6862_s11  ;;  %1569 = vrot.lane.b32.xlu0 %v1561_v52, %s6860_s10  ;;  %v4842_v51 = vpack.c.bf16 %v1286_v48, %v1285_v47  ;;  %v1287_v52 = vld [vmem:[%s6918_s25 + $0x30] sm:$0xff] }
 0x1e7   : > { %v1593_v54 = vpop.permute.xlu1 %1592  ;;  %v1591_v58 = vpop.permute.xlu0 %1590 }
 0x1e8   : > { %v1600_v56 = vmul.f32 %v1593_v54, %v5942_v7  ;;  %v1594_v20 = vsel %vm1396_vm6, %v1591_v58, %v1593_v54  ;;  %v1598_v29 = vmul.f32 %v1591_v58, %v5942_v7  ;;  %v1305_v54 = vld [vmem:[%s6918_s25 + $0xc0] sm:$0xff] }
 0x1e9   : > { %v1599_v22 = vmul.f32 %v1594_v20, %v6008_v32  ;;  %v1289_v58 = vld [vmem:[%s6918_s25 + $0x40] sm:$0xff] }
 0x1ea   : > { %1472 = vrot.lane.b32.xlu1 %v1466_v55, %s6862_s11  ;;  %1608 = vrot.lane.b32.xlu0 %v1600_v56, %s6820_s2  ;;  %v1306_v55 = vld [vmem:[%s6918_s25 + $0xc8] sm:$0xff]  ;;  %v4846_v56 = vpack.c.bf16 %v1288_v53, %v1287_v52  ;;  %v4850_v62 = vpack.c.bf16 %v1290_v59, %v1289_v58 }
 0x1eb   : > { %v1630_v0 = vpop.permute.xlu0 %1629  ;;  %v1632_v25 = vpop.permute.xlu1 %1631  ;;  %v4848_v57 = vpack.c.bf16 %v1306_v55, %v1305_v54 }
 0x1ec   : > { %v1637_v10 = vmul.f32 %v1630_v0, %v5942_v7  ;;  %v1639_v26 = vmul.f32 %v1632_v25, %v5942_v7  ;;  %v1633_v34 = vsel %vm1355_vm7, %v1630_v0, %v1632_v25  ;;  %v4834_v7 = vpack.c.bf16 %v1282_v36, %v1281_v33  ;;  %v1291_v0 = vld [vmem:[%s6918_s25 + $0x50] sm:$0xff] }
 0x1ed   : > { %v1638_v44 = vmul.f32 %v1633_v34, %v6008_v32  ;;  %v4844_v32 = vpack.c.bf16 %v1304_v50, %v1303_v49 }
 0x1ee   : > { %1530 = vrot.lane.b32.xlu1 %v1522_v60, %s6854_s28  ;;  %1351 = vrot.lane.b32.xlu0 %v1344_v61, %s6818_s23  ;;  %v1307_v60 = vld [vmem:[%s6918_s25 + $0xd0] sm:$0xff]  ;;  %v1308_v61 = vld [vmem:[%s6918_s25 + $0xd8] sm:$0xff]  ;;  %s6840_s23 = smov 64  }
 0x1ef   : > { %4835 = vmatpush3.bf16.msra.mxu1 %v4834_v7 }
 0x1f0   : > { %4837 = vmatprep.subr.bf16.mxu1 %v4836_v39 }
 0x1f2   : > { %1565 = vrot.lane.b32.xlu1 %v1559_v63, %s6860_s10  ;;  %1392 = vrot.lane.b32.xlu0 %v1385_v6, %s6856_s1  ;;  %v4852_v63 = vpack.c.bf16 %v1308_v61, %v1307_v60  ;;  %v1292_v6 = vld [vmem:[%s6918_s25 + $0x58] sm:$0xff] }
 0x1f3   : > { %4839 = vmatpush3.bf16.msra.mxu1 %v4838_v45 }
 0x1f4   : > { %4841 = vmatprep.subr.bf16.mxu1 %v4840_v46 }
 0x1f6   : > { %1643 = vrot.lane.b32.xlu1 %v1637_v10, %s6822_s22  ;;  %1433 = vrot.lane.b32.xlu0 %v1426_v11, %s6858_s16  ;;  %v1310_v10 = vld [vmem:[%s6918_s25 + $0xe8] sm:$0xff]  ;;  %v4854_v11 = vpack.c.bf16 %v1292_v6, %v1291_v0 }
 0x1f7   : > { %4843 = vmatpush3.bf16.msra.mxu1 %v4842_v51  ;;  %v4856_v13 = vpack.c.bf16 %v1310_v10, %v1309_v8 }
 0x1f8   : > { %4845 = vmatprep.subr.bf16.mxu1 %v4844_v32 }
 0x1fa   : > { %1567 = vrot.lane.b32.xlu1 %v1560_v16, %s6860_s10  ;;  %1474 = vrot.lane.b32.xlu0 %v1467_v17, %s6862_s11  ;;  %v1294_v16 = vld [vmem:[%s6918_s25 + $0x68] sm:$0xff]  ;;  %v1311_v17 = vld [vmem:[%s6918_s25 + $0xf0] sm:$0xff] }
 0x1fb   : > { %4847 = vmatpush3.bf16.msra.mxu1 %v4846_v56  ;;  %v4858_v20 = vpack.c.bf16 %v1294_v16, %v1293_v14 }
 0x1fc   : > { %4849 = vmatprep.subr.bf16.mxu1 %v4848_v57 }
 0x1fe   : > { %1606 = vrot.lane.b32.xlu1 %v1599_v22, %s6820_s2  ;;  %1528 = vrot.lane.b32.xlu0 %v1521_v23, %s6854_s28  ;;  %v4860_v22 = vpack.c.bf16 %v1312_v19, %v1311_v17  ;;  %v1684_v17 = vld [vmem:[#allocation7 + $0x8] sm:$0xff] }
 0x1ff   : > { %4851 = vmatpush3.bf16.msra.mxu1 %v4850_v62 }
 0x200   : > { %4853 = vmatprep.subr.bf16.mxu1 %v4852_v63 }
 0x202   : > { %1604 = vrot.lane.b32.xlu0 %v1598_v29, %s6820_s2  ;;  %1647 = vrot.lane.b32.xlu1 %v1639_v26, %s6822_s22  ;;  %s6836_s2 = smov 56  }
 0x203   : > { %4855 = vmatpush3.bf16.msra.mxu1 %v4854_v11 }
 0x204   : > { %4857 = vmatprep.subr.bf16.mxu1 %v4856_v13 }
 0x206   : > { %1645 = vrot.lane.b32.xlu0 %v1638_v44, %s6822_s22  ;;  %s6830_s22 = smov 57  }
 0x207   : > { %4859 = vmatpush3.bf16.msra.mxu1 %v4858_v20 }
 0x208   : > { %4861 = vmatprep.subr.bf16.mxu1 %v4860_v22 }
 0x244   : > { %v1350_v25 = vpop.permute.xlu0 %1349 }
 0x248   : > { %v1354_v23 = vpop.permute.xlu1 %1353 }
 0x24c   : > { %v1395_v26 = vpop.permute.xlu1 %1394  ;;  %v1432_v29 = vpop.permute.xlu0 %1431 }
 0x250   : > { %v1391_v30 = vpop.permute.xlu1 %1390 }
 0x254   : > { %v1436_v31 = vpop.permute.xlu1 %1435  ;;  %v1527_v33 = vpop.permute.xlu0 %1526 }
 0x258   : > { %v1477_v34 = vpop.permute.xlu1 %1476  ;;  %v1570_v35 = vpop.permute.xlu0 %1569 }
 0x25c   : > { %v1473_v36 = vpop.permute.xlu1 %1472  ;;  %v1609_v37 = vpop.permute.xlu0 %1608 }
 0x260   : > { %v1531_v38 = vpop.permute.xlu1 %1530  ;;  %v1352_v7 = vpop.permute.xlu0 %1351 }
 0x261   : > { %v1356_v39 = vsel %vm1355_vm7, %v1350_v25, %v1352_v7  ;;  %v1357_v42 = vsel %vm1355_vm7, %v1352_v7, %v1354_v23  ;;  %v1295_v25 = vld [vmem:[%s6918_s25 + $0x70] sm:$0xff] }
 0x262   : > { %1360 = vst [vmem:[#allocation3] sm:$0xff] %v1356_v39 }
 0x264   : > { %v1566_v40 = vpop.permute.xlu1 %1565  ;;  %v1393_v41 = vpop.permute.xlu0 %1392 }
 0x265   : > { %v1397_v43 = vsel %vm1396_vm6, %v1391_v30, %v1393_v41  ;;  %v1398_v44 = vsel %vm1396_vm6, %v1393_v41, %v1395_v26  ;;  %v1296_v26 = vld [vmem:[%s6918_s25 + $0x78] sm:$0xff]  ;;  %s6970_s25 = sld [smem:[#allocation49_spill]] }
 0x266   : > { %1401 = vst [vmem:[#allocation3 + $0x10] sm:$0xff] %v1397_v43  ;;  %v1674_v45 = vpack.c.bf16 %v1398_v44, %v1357_v42  ;;  %v1673_v46 = vpack.c.bf16 %v1397_v43, %v1356_v39  ;;  %v1860_v43 = vld [vmem:[%s6916_s24] sm:$0xff] }
 0x267   : > { %v1846_v44 = vld [vmem:[%s6944_s26] sm:$0xff] }
 0x268   : > { %v1644_v47 = vpop.permute.xlu1 %1643  ;;  %v1434_v48 = vpop.permute.xlu0 %1433  ;;  %1697 = vmatprep.subr.bf16.mxu0 %v1674_v45  ;;  %v1888_v45 = vld [vmem:[#allocation5] sm:$0xff] }
 0x269   : > { %v1438_v49 = vsel %vm1437_vm4, %v1432_v29, %v1434_v48  ;;  %1698 = vmatpush1.bf16.msra.mxu0 %v1673_v46  ;;  %v1439_v32 = vsel %vm1437_vm4, %v1434_v48, %v1436_v31  ;;  %v4862_v29 = vpack.c.bf16 %v1296_v26, %v1295_v25  ;;  %v6134_v46 = vrot.slane %v1888_v45, %v5935_v5  ;;  %v6143_v48 = vld [vmem:[#allocation5 + $0x8] ss:$0 sm:$0xff] }
 0x26a   : > { %1442 = vst [vmem:[#allocation3 + $0x20] sm:$0xff] %v1438_v49 }
 0x26b   : > { %4863 = vmatpush3.bf16.msra.mxu1 %v4862_v29 }
 0x26c   : > { %v1568_v50 = vpop.permute.xlu1 %1567  ;;  %v1475_v51 = vpop.permute.xlu0 %1474 }
 0x26d   : > { %v1571_v52 = vsel %vm1420_vm2, %v1566_v40, %v1568_v50  ;;  %v1479_v53 = vsel %vm1478_vm5, %v1473_v36, %v1475_v51  ;;  %v1480_v54 = vsel %vm1478_vm5, %v1475_v51, %v1477_v34  ;;  %v1572_v0 = vsel %vm1420_vm2, %v1568_v50, %v1570_v35 }
 0x26e   : > { %1575 = vst [vmem:[#allocation3 + $0x60] sm:$0xff] %v1571_v52  ;;  %1483 = vst [vmem:[#allocation3 + $0x30] sm:$0xff] %v1479_v53  ;;  %v1676_v55 = vpack.c.bf16 %v1480_v54, %v1439_v32  ;;  %v1675_v56 = vpack.c.bf16 %v1479_v53, %v1438_v49 }
 0x270   : > { %v1607_v57 = vpop.permute.xlu1 %1606  ;;  %v1529_v58 = vpop.permute.xlu0 %1528  ;;  %1699 = vmatprep.subr.bf16.mxu0 %v1676_v55 }
 0x271   : > { %v1611_v59 = vsel %vm1379_vm1, %v1607_v57, %v1609_v37  ;;  %v1532_v60 = vsel %vm1461_vm3, %v1527_v33, %v1529_v58  ;;  %v1533_v61 = vsel %vm1461_vm3, %v1529_v58, %v1531_v38  ;;  %1700 = vmatpush1.bf16.msra.mxu0 %v1675_v56 }
 0x272   : > { %1536 = vst [vmem:[#allocation3 + $0x50] sm:$0xff] %v1532_v60  ;;  %v1678_v62 = vpack.c.bf16 %v1533_v61, %v6043_v9  ;;  %v1677_v63 = vpack.c.bf16 %v1532_v60, %v5953_v12  ;;  %v1680_v8 = vpack.c.bf16 %v1611_v59, %v1572_v0  ;;  %v1683_v12 = vld [vmem:[#allocation7] sm:$0xff]  ;;  %v6154_v0 = vrot.slane %v1888_v45, %v5929_v3 }
 0x273   : > { %v1685_v23 = vpack.c.bf16 %v1684_v17, %v1683_v12 }
 0x274   : > { %v1605_v6 = vpop.permute.xlu0 %1604  ;;  %1701 = vmatprep.subr.bf16.mxu0 %v1678_v62  ;;  %v1648_v11 = vpop.permute.xlu1 %1647 }
 0x275   : > { %v1610_v10 = vsel %vm1379_vm1, %v1605_v6, %v1607_v57  ;;  %1702 = vmatpush1.bf16.msra.mxu0 %v1677_v63  ;;  %v6159_v6 = vrot.slane %v1888_v45, %v5961_v15 }
 0x276   : > { %1614 = vst [vmem:[#allocation3 + $0x70] sm:$0xff] %v1610_v10  ;;  %1703 = vmatprep.subr.bf16.mxu0 %v1680_v8  ;;  %v1679_v13 = vpack.c.bf16 %v1610_v10, %v1571_v52  ;;  %v6164_v8 = vrot.slane %v1888_v45, %v5970_v18  ;;  %v6169_v10 = vrot.slane %v1888_v45, %v5978_v21 }
 0x278   : > { %v1646_v14 = vpop.permute.xlu0 %1645 }
 0x279   : > { %v1649_v16 = vsel %vm1338_vm0, %v1644_v47, %v1646_v14  ;;  %v1650_v9 = vsel %vm1338_vm0, %v1646_v14, %v1648_v11  ;;  %1704 = vmatpush1.bf16.msra.mxu0 %v1679_v13  ;;  %v6139_v47 = vrot.slane %v1888_v45, %v5986_v24  ;;  %v6174_v11 = vrot.slane %v1888_v45, %v5994_v27 }
 0x27a   : > { %1653 = vst [vmem:[#allocation3 + $0x80] sm:$0xff] %v1649_v16  ;;  %v1682_v19 = vpack.c.bf16 %v1650_v9, %v1650_v9  ;;  %v1681_v20 = vpack.c.bf16 %v1649_v16, %v1649_v16  ;;  %v6183_v9 = vrot.slane %v1888_v45, %v5932_v4 }
 0x27c   : > { %4618 = vmatprep.subr.msk.bf16.mxu0 %vm1690_vm8, %v1682_v19  ;;  %v1692_v22 = vsel %vm1690_vm8, %v1681_v20, 0  ;;  %v5513_v19 = vmov 0.0  }
 0x27d   : > { %1706 = vmatpush1.bf16.msra.mxu0 %v1692_v22 }
 0x27e   : > { %4733 = vmatprep.subr.bf16.mxu0 %v5513_v19 }
 0x280   : > { %4619 = vmatmul.mubr.msk.bf16.vlgmr.msra.gmra.mrb[0].mxu0 %vm1686_vm9, %v1685_v23 }
 0x281   : > { %4743 = vmatprep.mubr.msk.bf16.mxu0 %vm5521_vm13, %v5513_v19 }
 0x353   : > { %v1731_v30 = vpop.f32.mrb[0].mxu0 }
 0x354   : > { %v1733_v31 = vpop.f32.mrb[1].mxu0 }
 0x355   : > { %v1735_v33 = vpop.f32.mrb[2].mxu0  ;;  %1804 = vmatprep.mubr.f32.mxu1 %v1733_v31 }
 0x356   : > { %v1737_v34 = vpop.f32.mrb[3].mxu0  ;;  %1805 = vmatmul.mubr.f32.vlgmr.msra.gmra.mrb[0].mxu1 %v1731_v30 }
 0x357   : > { %1809 = vmatprep.mubr.f32.mxu1 %v1737_v34 }
 0x35a   : > { %1810 = vmatmul.mubr.f32.gmra.mrb[2].mxu1 %v1735_v33 }
 0x429   : > { %v4680_v35 = vpop.f32.mrb[0].mxu1 }
 0x42a   : > { %v4681_v36 = vpop.f32.mrb[1].mxu1 }
 0x42b   : > { %v4682_v37 = vadd.f32 %v4681_v36, %v4680_v35 }
 0x42d   : > { %v4683_v38 = vpop.f32.mrb[2].mxu1  ;;  %v1816_v7 = vsel %vm1815_vm10, %v4682_v37, 0.0  ;;  %v1824_v39 = vmul.f32 %v4682_v37, %v4682_v37 }
 0x42e   : > { %1817 = vadd.xlane.f32.xlu0 %v1816_v7  ;;  %v4684_v40 = vpop.f32.mrb[3].mxu1 }
 0x42f   : > { %v6128_v41 = vadd.f32 %v4684_v40, %v4683_v38  ;;  %v1826_v42 = vsel %vm1815_vm10, %v1824_v39, 0.0 }
 0x430   : > { %1827 = vadd.xlane.f32.xlu1 %v1826_v42 }
 0x441   : > { %1864 = vperm.xlu1 %5112, %v1860_v43  }
 0x444   : > { %1850 = vperm.xlu0 %5111, %v1846_v44  }
 0x445   : > { %1903 = vrot.lane.b32.xlu1 %v6134_v46, %s6834_s15  ;;  %s6844_s15 = smov 71  }
 0x448   : > { %1985 = vrot.lane.b32.xlu0 %v6139_v47, %s6826_s29  ;;  %s6828_s29 = smov 8  }
 0x44c   : > { %2015 = vrot.lane.b32.xlu0 %v6143_v48, %s6824_s18  ;;  %s6832_s18 = smov 63  }
 0x4bb   : > { %v1818_v49 = vpop.xlane.xlu0 %1817 }
 0x4bc   : > { %v1822_v50 = vmul.f32 0.015625, %v1818_v49 }
 0x4bd   : > { %v1828_v51 = vpop.xlane.xlu1 %1827 }
 0x4be   : > { %v1834_v32 = vmul.f32 %v1822_v50, %v1822_v50  ;;  %v1832_v52 = vmul.f32 0.015625, %v1828_v51  ;;  %v1838_v55 = vsub.f32 %v4682_v37, %v1822_v50 }
 0x4c0   : > { %v1836_v53 = vsub.f32 %v1832_v52, %v1834_v32 }
 0x4c1   : > { %v1865_v59 = vpop.permute.xlu1 %1864 }
 0x4c2   : > { %v1840_v54 = vadd.f32 1e-05, %v1836_v53 }
 0x4c3   : > { %v1851_v57 = vpop.permute.xlu0 %1850 }
 0x4c4   : > { %5113 = vrsqrt.f32 %v1840_v54 }
 0x4c5   : > { %v1904_v13 = vpop.permute.xlu1 %1903 }
 0x4c7   : > { %v1986_v25 = vpop.permute.xlu0 %1985 }
 0x4cb   : > { %v2016_v35 = vpop.permute.xlu0 %2015 }
 0x4ce   : > { %v5114_v56 = vpop.eup %5113 }
 0x4cf   : > { %v1844_v58 = vmul.f32 %v5114_v56, %v1838_v55 }
 0x4d1   : > { %v1858_v60 = vmul.f32 %v1851_v57, %v1844_v58 }
 0x4d3   : > { %v1872_v61 = vadd.f32 %v1865_v59, %v1858_v60 }
 0x4d5   : > { %vm1874_vm11 = vcmp.gt.f32.partialorder %v1872_v61, 0.0  ;;  %v1876_v62 = vmul.f32 0.25, %v1872_v61 }
 0x4d7   : > { %v6147_v63 = vsel %vm1874_vm11, %v1872_v61, %v1876_v62  ;;  %vm2245_vm11 = vcmask 261248  }
 0x4d8   : > { %1892 = vrot.lane.b32.xlu1 %v6147_v63, %s6840_s23  ;;  %1890 = vst.msk [vmem:[#allocation2] sm:$0xff] %vm1815_vm10, %v6147_v63  ;;  %s6946_s23 = sld [smem:[#allocation32_spill]] }
 0x4dc   : > { %1918 = vrot.lane.b32.xlu1 %v6154_v0, %s6836_s2  ;;  %s6945_s2 = sld [smem:[#allocation38_spill]] }
 0x4de   : > { %v1880_v40 = vld [vmem:[%s6946_s23] sm:$0xff]  ;;  %v1881_v42 = vld [vmem:[%s6946_s23 + $0x8] sm:$0xff]  ;;  %v1882_v43 = vld [vmem:[%s6946_s23 + $0x10] sm:$0xff] }
 0x4df   : > { %v4864_v44 = vpack.c.bf16 %v1881_v42, %v1880_v40  ;;  %v1883_v45 = vld [vmem:[%s6946_s23 + $0x18] sm:$0xff]  ;;  %v1884_v50 = vld [vmem:[%s6946_s23 + $0x20] sm:$0xff]  ;;  %v1885_v51 = vld [vmem:[%s6946_s23 + $0x28] sm:$0xff] }
 0x4e0   : > { %1933 = vrot.lane.b32.xlu1 %v6159_v6, %s6830_s22  ;;  %s6852_s22 = smov 73   ;;  %v4868_v49 = vpack.c.bf16 %v1883_v45, %v1882_v43  ;;  %v4872_v32 = vpack.c.bf16 %v1885_v51, %v1884_v50  ;;  %v1886_v52 = vld [vmem:[%s6946_s23 + $0x30] sm:$0xff]  ;;  %v1887_v53 = vld [vmem:[%s6946_s23 + $0x38] sm:$0xff] }
 0x4e1   : > { %4865 = vmatprep.subr.bf16.mxu1 %v4864_v44  ;;  %v4876_v54 = vpack.c.bf16 %v1887_v53, %v1886_v52 }
 0x4e2   : > { %v2199_v7 = vld [vmem:[%s6945_s2] sm:$0xff]  ;;  %v2200_v39 = vld [vmem:[%s6945_s2 + $0x8] sm:$0xff]  ;;  %4867 = vmatpush3.bf16.msra.mxu1 %v4864_v44  ;;  %s6956_s2 = smov 55  }
 0x4e3   : > { %4869 = vmatprep.subr.bf16.mxu1 %v4868_v49 }
 0x4e4   : > { %1948 = vrot.lane.b32.xlu1 %v6164_v8, %s6832_s18  ;;  %s6842_s18 = smov 65  }
 0x4e6   : > { %4871 = vmatpush3.bf16.msra.mxu1 %v4868_v49 }
 0x4e7   : > { %4873 = vmatprep.subr.bf16.mxu1 %v4872_v32 }
 0x4e8   : > { %1970 = vrot.lane.b32.xlu1 %v6169_v10, %s6862_s11 }
 0x4ea   : > { %4875 = vmatpush3.bf16.msra.mxu1 %v4872_v32 }
 0x4eb   : > { %4877 = vmatprep.subr.bf16.mxu1 %v4876_v54 }
 0x4ec   : > { %2000 = vrot.lane.b32.xlu1 %v6174_v11, %s6828_s29  ;;  %s6838_s29 = smov 72  }
 0x4ee   : > { %4879 = vmatpush3.bf16.msra.mxu1 %v4876_v54 }
 0x54a   : > { %v6178_v14 = vpop.permute.xlu1 %1892 }
 0x54b   : > { %1896 = vst.msk [vmem:[#allocation2] sm:$0xff] %vm1895_vm12, %v6178_v14 }
 0x54e   : > { %v1919_v16 = vpop.permute.xlu1 %1918 }
 0x552   : > { %v1957_v12 = vld [vmem:[#allocation2] sm:$0xff]  ;;  %v1934_v17 = vpop.permute.xlu1 %1933 }
 0x553   : > { %v1962_v20 = vmul.f32 %v6183_v9, %v1957_v12  ;;  %v1921_v22 = vmul.f32 %v1957_v12, %v1919_v16  ;;  %v1906_v23 = vmul.f32 %v1957_v12, %v1904_v13  ;;  %v1936_v30 = vmul.f32 %v1957_v12, %v1934_v17 }
 0x554   : > { %v1988_v33 = vmul.f32 %v1986_v25, %v1957_v12  ;;  %v2018_v37 = vmul.f32 %v2016_v35, %v1957_v12  ;;  %v2038_v35 = vld [vmem:[#allocation9] sm:$0xff] }
 0x555   : > { %1963 = vst.msk [vmem:[#allocation3 + $0x40] sm:$0xff] %vm1815_vm10, %v1962_v20  ;;  %1923 = vrot.lane.b32.xlu0 %v1921_v22, %s6838_s29  ;;  %1908 = vrot.lane.b32.xlu1 %v1906_v23, %s6852_s22  ;;  %s6850_s29 = smov 121   ;;  %s5523_s22 = smov 12  }
 0x556   : > { %v1949_v26 = vpop.permute.xlu1 %1948 }
 0x557   : > { %v1951_v29 = vmul.f32 %v1957_v12, %v1949_v26 }
 0x559   : > { %1953 = vrot.lane.b32.xlu0 %v1951_v29, %s6842_s18  ;;  %1938 = vrot.lane.b32.xlu1 %v1936_v30, %s6844_s15  ;;  %s6848_s18 = smov 119   ;;  %s6846_s15 = smov 120  }
 0x55a   : > { %v1971_v31 = vpop.permute.xlu1 %1970 }
 0x55b   : > { %v1973_v34 = vmul.f32 %v1971_v31, %v1957_v12 }
 0x55c   : > { %v2028_v23 = vld [vmem:[#allocation3 + $0x40] sm:$0xff] }
 0x55d   : > { %1990 = vrot.lane.b32.xlu0 %v1988_v33, %s6850_s29  ;;  %1975 = vrot.lane.b32.xlu1 %v1973_v34, %s6854_s28  ;;  %s5522_s29 = smov 11   ;;  %s5524_s28 = smov 13  }
 0x55e   : > { %v2001_v36 = vpop.permute.xlu1 %2000 }
 0x55f   : > { %v2003_v38 = vmul.f32 %v2001_v36, %v1957_v12  ;;  %v2039_v36 = vld [vmem:[#allocation9 + $0x8] sm:$0xff] }
 0x561   : > { %2020 = vrot.lane.b32.xlu0 %v2018_v37, %s6848_s18  ;;  %2005 = vrot.lane.b32.xlu1 %v2003_v38, %s6846_s15  ;;  %v2040_v38 = vpack.c.bf16 %v2039_v36, %v2038_v35  ;;  %s6947_s15 = sld [smem:[#allocation39_spill]]  ;;  %s6948_s18 = sld [smem:[#allocation30_spill]] }
 0x565   : > { %2203 = vperm.xlu0 %5111, %v2199_v7   ;;  %2208 = vperm.xlu1 %5112, %v2200_v39  }
 0x567   : > { %v2213_v53 = vld [vmem:[%s6947_s15] sm:$0xff]  ;;  %v2214_v54 = vld [vmem:[%s6947_s15 + $0x8] sm:$0xff]  ;;  %s6964_s15 = smov 72  }
 0x5c7   : > { %v1924_v55 = vpop.permute.xlu0 %1923  ;;  %v1909_v56 = vpop.permute.xlu1 %1908 }
 0x5c8   : > { %1926 = vst.msk [vmem:[#allocation3 + $0x10] sm:$0xff] %vm1815_vm10, %v1924_v55  ;;  %1911 = vst.msk [vmem:[#allocation3] sm:$0xff] %vm1815_vm10, %v1909_v56 }
 0x5cb   : > { %v1954_v57 = vpop.permute.xlu0 %1953  ;;  %v1939_v58 = vpop.permute.xlu1 %1938 }
 0x5cc   : > { %1956 = vst.msk [vmem:[#allocation3 + $0x30] sm:$0xff] %vm1815_vm10, %v1954_v57  ;;  %1941 = vst.msk [vmem:[#allocation3 + $0x20] sm:$0xff] %vm1815_vm10, %v1939_v58 }
 0x5cf   : > { %v1991_v59 = vpop.permute.xlu0 %1990  ;;  %v2025_v60 = vld [vmem:[#allocation3 + $0x10] sm:$0xff]  ;;  %v1976_v61 = vpop.permute.xlu1 %1975  ;;  %v2024_v62 = vld [vmem:[#allocation3] sm:$0xff] }
 0x5d0   : > { %1993 = vst.msk [vmem:[#allocation3 + $0x60] sm:$0xff] %vm1815_vm10, %v1991_v59  ;;  %1978 = vst.msk [vmem:[#allocation3 + $0x50] sm:$0xff] %vm1815_vm10, %v1976_v61  ;;  %v2033_v13 = vpack.c.bf16 %v2025_v60, %v2024_v62 }
 0x5d2   : > { %4734 = vmatpush3.bf16.msra.mxu0 %v2033_v13 }
 0x5d3   : > { %v2021_v16 = vpop.permute.xlu0 %2020  ;;  %v2027_v12 = vld [vmem:[#allocation3 + $0x30] sm:$0xff]  ;;  %v2006_v17 = vpop.permute.xlu1 %2005  ;;  %4735 = vmatprep.subr.bf16.mxu0 %v5513_v19  ;;  %v2026_v20 = vld [vmem:[#allocation3 + $0x20] sm:$0xff] }
 0x5d4   : > { %2023 = vst.msk [vmem:[#allocation3 + $0x80] sm:$0xff] %vm1815_vm10, %v2021_v16  ;;  %2008 = vst.msk [vmem:[#allocation3 + $0x70] sm:$0xff] %vm1815_vm10, %v2006_v17  ;;  %v2034_v22 = vpack.c.bf16 %v2027_v12, %v2026_v20 }
 0x5d6   : > { %4736 = vmatpush3.bf16.msra.mxu0 %v2034_v22 }
 0x5d7   : > { %4737 = vmatprep.subr.bf16.mxu0 %v5513_v19  ;;  %v2029_v25 = vld [vmem:[#allocation3 + $0x50] sm:$0xff]  ;;  %v2030_v30 = vld [vmem:[#allocation3 + $0x60] sm:$0xff] }
 0x5d8   : > { %v2035_v26 = vpack.c.bf16 %v2029_v25, %v2028_v23 }
 0x5da   : > { %4738 = vmatpush3.bf16.msra.mxu0 %v2035_v26 }
 0x5db   : > { %v2032_v29 = vld [vmem:[#allocation3 + $0x80] sm:$0xff]  ;;  %4739 = vmatprep.subr.bf16.mxu0 %v5513_v19  ;;  %v2031_v31 = vld [vmem:[#allocation3 + $0x70] sm:$0xff] }
 0x5dc   : > { %v2036_v33 = vpack.c.bf16 %v2031_v31, %v2030_v30  ;;  %v2037_v34 = vpack.c.bf16 %v2032_v29, %v2032_v29 }
 0x5de   : > { %4740 = vmatpush3.bf16.msra.mxu0 %v2036_v33  ;;  %v2045_v37 = vsel %vm1690_vm8, %v2037_v34, 0 }
 0x5df   : > { %4741 = vmatprep.subr.bf16.mxu0 %v5513_v19 }
 0x5e2   : > { %4742 = vmatpush3.bf16.msra.mxu0 %v2045_v37 }
 0x5e3   : > { %2470 = vmatprep.subr.bf16.mxu0 %v5504_v28 }
 0x5e4   : > { %v2204_v55 = vpop.permute.xlu0 %2203  ;;  %v2209_v56 = vpop.permute.xlu1 %2208 }
 0x5e5   : > { %4744 = vmatmul.mubr.msk.bf16.vlgmr.msra.gmra.mrb[4].mxu0 %vm1686_vm9, %v2040_v38 }
 0x6b8   : > { %v2081_v7 = vpop.f32.mrb[4].mxu0 }
 0x6b9   : > { %v4745_v39 = vpop.f32.mrb[5].mxu0  ;;  %4763 = vmatprep.mubr.msk.f32.mxu1 %vm1815_vm10, %v2081_v7 }
 0x6ba   : > { %v2084_v40 = vpop.f32.mrb[6].mxu0 }
 0x6bb   : > { %v4746_v42 = vpop.f32.mrb[7].mxu0  ;;  %4764 = vmatmul.mubr.msk.f32.vlgmr.msra.gmra.mrb[4].mxu1 %vm1815_vm10, %v2084_v40 }
 0x6bc   : > { %v2233_v42 = vld [vmem:[%s6948_s18] sm:$0xff] }
 0x78e   : > { %v4765_v43 = vpop.f32.mrb[4].mxu1 }
 0x78f   : > { %v2160_v44 = vpop.f32.mrb[5].mxu1  ;;  %v2172_v45 = vsel %vm1396_vm6, %v4765_v43, 0.0  ;;  %v2178_v51 = vmul.f32 %v4765_v43, %v4765_v43 }
 0x790   : > { %2173 = vadd.xlane.f32.xlu0 %v2172_v45  ;;  %v2169_v49 = vsel %vm1396_vm6, %v2160_v44, 0.0  ;;  %v2177_v50 = vmul.f32 %v2160_v44, %v2160_v44 }
 0x791   : > { %2170 = vadd.xlane.f32.xlu1 %v2169_v49  ;;  %v2182_v52 = vsel %vm1396_vm6, %v2178_v51, 0.0  ;;  %v2297_v51 = vrot.slane %v2233_v42, %v5961_v15 }
 0x792   : > { %v2179_v32 = vsel %vm1396_vm6, %v2177_v50, 0.0  ;;  %v2275_v50 = vrot.slane %v2233_v42, %v5929_v3 }
 0x794   : > { %2180 = vadd.xlane.f32.xlu0 %v2179_v32  ;;  %v2319_v32 = vrot.slane %v2233_v42, %v5970_v18 }
 0x795   : > { %2183 = vadd.xlane.f32.xlu1 %v2182_v52  ;;  %v2351_v52 = vrot.slane %v2233_v42, %v5978_v21 }
 0x7a6   : > { %2217 = vperm.xlu1 %5112, %v2213_v53   ;;  %v2373_v53 = vrot.slane %v2233_v42, %v5986_v24 }
 0x7aa   : > { %2222 = vperm.xlu0 %5111, %v2214_v54   ;;  %v2395_v54 = vrot.slane %v2233_v42, %v5994_v27 }
 0x81d   : > { %v2174_v57 = vpop.xlane.xlu0 %2173 }
 0x81e   : > { %v2171_v58 = vpop.xlane.xlu1 %2170  ;;  %v2176_v59 = vmul.f32 0.0625, %v2174_v57 }
 0x81f   : > { %v2175_v60 = vmul.f32 0.0625, %v2171_v58  ;;  %v2341_v58 = vrot.slane %v2233_v42, %v5932_v4 }
 0x820   : > { %v2188_v12 = vmul.f32 %v2176_v59, %v2176_v59  ;;  %v2192_v30 = vsub.f32 %v4765_v43, %v2176_v59 }
 0x821   : > { %v2187_v61 = vmul.f32 %v2175_v60, %v2175_v60  ;;  %v2181_v62 = vpop.xlane.xlu0 %2180  ;;  %v2191_v26 = vsub.f32 %v2160_v44, %v2175_v60  ;;  %v2253_v44 = vrot.slane %v2233_v42, %v5935_v5 }
 0x822   : > { %v2185_v13 = vmul.f32 0.0625, %v2181_v62  ;;  %v2184_v16 = vpop.xlane.xlu1 %2183 }
 0x823   : > { %v2186_v17 = vmul.f32 0.0625, %v2184_v16 }
 0x824   : > { %v2189_v20 = vsub.f32 %v2185_v13, %v2187_v61 }
 0x825   : > { %v2190_v22 = vsub.f32 %v2186_v17, %v2188_v12 }
 0x826   : > { %v2193_v23 = vadd.f32 1e-05, %v2189_v20  ;;  %v2218_v36 = vpop.permute.xlu1 %2217 }
 0x827   : > { %v2194_v25 = vadd.f32 1e-05, %v2190_v22 }
 0x828   : > { %5115 = vrsqrt.f32 %v2193_v23 }
 0x829   : > { %5117 = vrsqrt.f32 %v2194_v25  ;;  %v2223_v7 = vpop.permute.xlu0 %2222 }
 0x832   : > { %v5116_v29 = vpop.eup %5115 }
 0x833   : > { %v5118_v31 = vpop.eup %5117  ;;  %v2197_v33 = vmul.f32 %v5116_v29, %v2191_v26 }
 0x834   : > { %v2198_v34 = vmul.f32 %v5118_v31, %v2192_v30 }
 0x835   : > { %v2211_v35 = vmul.f32 %v2204_v55, %v2197_v33  ;;  %v4624_v55 = vld [vmem:[%s6948_s18 + $0x8] ss:$0 sm:$0xff]  ;;  %s6967_s18 = smov 121  }
 0x836   : > { %v2212_v37 = vmul.f32 %v2209_v56, %v2198_v34 }
 0x837   : > { %v2225_v38 = vadd.f32 %v2218_v36, %v2211_v35 }
 0x838   : > { %v2226_v39 = vadd.f32 %v2223_v7, %v2212_v37 }
 0x839   : > { %vm2227_vm14 = vcmp.gt.f32.partialorder %v2225_v38, 0.0  ;;  %v2229_v40 = vmul.f32 0.25, %v2225_v38 }
 0x83a   : > { %vm2228_vm15 = vcmp.gt.f32.partialorder %v2226_v39, 0.0  ;;  %v2230_v45 = vmul.f32 0.25, %v2226_v39 }
 0x83b   : > { %v6232_v49 = vsel %vm2227_vm14, %v2225_v38, %v2229_v40 }
 0x83c   : > { %2239 = vrot.lane.b32.xlu1 %v6232_v49, %s6856_s1  ;;  %2235 = vst.msk [vmem:[#allocation2] sm:$0xff] %vm1396_vm6, %v6232_v49  ;;  %v6238_v43 = vsel %vm2228_vm15, %v2226_v39, %v2230_v45 }
 0x83d   : > { %2241 = vrot.lane.b32.xlu0 %v6238_v43, %s6856_s1  ;;  %2236 = vst.msk [vmem:[#allocation2 + $0x20] sm:$0xff] %vm1396_vm6, %v6238_v43  ;;  %s5525_s1 = smov 3  }
 0x840   : > { %2255 = vrot.lane.b32.xlu1 %v2253_v44, %s5522_s29  ;;  %s5526_s29 = smov 4  }
 0x841   : > { %2277 = vrot.lane.b32.xlu0 %v2275_v50, %s5523_s22  ;;  %s5527_s22 = smov 5  }
 0x844   : > { %2299 = vrot.lane.b32.xlu1 %v2297_v51, %s5524_s28  ;;  %s5528_s28 = smov 117  }
 0x845   : > { %2321 = vrot.lane.b32.xlu0 %v2319_v32, %s6858_s16  ;;  %s5532_s16 = smov 124  }
 0x848   : > { %2353 = vrot.lane.b32.xlu1 %v2351_v52, %s6862_s11  ;;  %s6955_s11 = smov 56  }
 0x849   : > { %2375 = vrot.lane.b32.xlu0 %v2373_v53, %s5525_s1  ;;  %s5529_s1 = smov 116  }
 0x84c   : > { %2397 = vrot.lane.b32.xlu1 %v2395_v54, %s5526_s29  ;;  %s5530_s29 = smov 115  }
 0x84d   : > { %2419 = vrot.lane.b32.xlu0 %v4624_v55, %s5527_s22  ;;  %s6949_s22 = smov 127  }
 0x8ae   : > { %v2240_v56 = vpop.permute.xlu1 %2239 }
 0x8af   : > { %2246 = vst.msk [vmem:[#allocation2] sm:$0xff] %vm2245_vm11, %v2240_v56  ;;  %v2242_v57 = vpop.permute.xlu0 %2241 }
 0x8b0   : > { %2247 = vst.msk [vmem:[#allocation2 + $0x20] sm:$0xff] %vm2245_vm11, %v2242_v57 }
 0x8b2   : > { %v2256_v60 = vpop.permute.xlu1 %2255 }
 0x8b3   : > { %v2278_v17 = vpop.permute.xlu0 %2277 }
 0x8b6   : > { %v2336_v59 = vld [vmem:[#allocation2] sm:$0xff]  ;;  %v2300_v23 = vpop.permute.xlu1 %2299 }
 0x8b7   : > { %v2342_v61 = vmul.f32 %v2341_v58, %v2336_v59  ;;  %v2337_v62 = vld [vmem:[#allocation2 + $0x20] sm:$0xff]  ;;  %v2258_v13 = vmul.f32 %v2336_v59, %v2256_v60  ;;  %v2280_v20 = vmul.f32 %v2336_v59, %v2278_v17  ;;  %v2302_v25 = vmul.f32 %v2336_v59, %v2300_v23  ;;  %v2322_v29 = vpop.permute.xlu0 %2321 }
 0x8b8   : > { %v2343_v16 = vmul.f32 %v2341_v58, %v2337_v62  ;;  %v2259_v12 = vmul.f32 %v2337_v62, %v2256_v60  ;;  %v2281_v22 = vmul.f32 %v2337_v62, %v2278_v17  ;;  %v2303_v26 = vmul.f32 %v2337_v62, %v2300_v23 }
 0x8b9   : > { %2344 = vst.msk [vmem:[#allocation3 + $0x80] sm:$0xff] %vm1396_vm6, %v2342_v61  ;;  %2262 = vrot.lane.b32.xlu1 %v2258_v13, %s5528_s28  ;;  %v2324_v30 = vmul.f32 %v2336_v59, %v2322_v29  ;;  %v2325_v31 = vmul.f32 %v2337_v62, %v2322_v29 }
 0x8ba   : > { %2345 = vst.msk [vmem:[#allocation3 + $0x90] sm:$0xff] %vm1396_vm6, %v2343_v16  ;;  %2264 = vrot.lane.b32.xlu0 %v2259_v12, %s5528_s28  ;;  %v2354_v33 = vpop.permute.xlu1 %2353  ;;  %s6950_s28 = sld [smem:[#allocation44_spill]] }
 0x8bb   : > { %v2356_v34 = vmul.f32 %v2354_v33, %v2336_v59  ;;  %v2357_v35 = vmul.f32 %v2354_v33, %v2337_v62  ;;  %v2376_v36 = vpop.permute.xlu0 %2375 }
 0x8bc   : > { %v2378_v37 = vmul.f32 %v2376_v36, %v2336_v59  ;;  %v2379_v38 = vmul.f32 %v2376_v36, %v2337_v62 }
 0x8bd   : > { %2284 = vrot.lane.b32.xlu1 %v2280_v20, %s5529_s1 }
 0x8be   : > { %2286 = vrot.lane.b32.xlu0 %v2281_v22, %s5529_s1  ;;  %v2398_v7 = vpop.permute.xlu1 %2397  ;;  %s5531_s1 = smov 125  }
 0x8bf   : > { %v2400_v39 = vmul.f32 %v2398_v7, %v2336_v59  ;;  %v2401_v40 = vmul.f32 %v2398_v7, %v2337_v62  ;;  %v2420_v42 = vpop.permute.xlu0 %2419 }
 0x8c0   : > { %v2422_v45 = vmul.f32 %v2420_v42, %v2336_v59  ;;  %v2423_v44 = vmul.f32 %v2420_v42, %v2337_v62  ;;  %v2542_v50 = vld [vmem:[%s6950_s28 + $0x8] sm:$0xff]  ;;  %v2541_v51 = vld [vmem:[%s6950_s28] sm:$0xff]  ;;  %s6972_s28 = sld [smem:[#allocation34_spill]] }
 0x8c1   : > { %2306 = vrot.lane.b32.xlu1 %v2302_v25, %s5530_s29  ;;  %v2442_v36 = vld [vmem:[#allocation3 + $0x80] sm:$0xff] }
 0x8c2   : > { %2308 = vrot.lane.b32.xlu0 %v2303_v26, %s5530_s29  ;;  %s6951_s29 = sld [smem:[#allocation43_spill]] }
 0x8c5   : > { %2328 = vrot.lane.b32.xlu1 %v2324_v30, %s6860_s10 }
 0x8c6   : > { %2330 = vrot.lane.b32.xlu0 %v2325_v31, %s6860_s10  ;;  %s5533_s10 = smov 123  }
 0x8c8   : > { %v2462_v32 = vld [vmem:[%s6951_s29 + $0x8] sm:$0xff]  ;;  %v2464_v52 = vld [vmem:[%s6951_s29 + $0x18] sm:$0xff] }
 0x8c9   : > { %2360 = vrot.lane.b32.xlu1 %v2356_v34, %s6949_s22  ;;  %v2466_v53 = vpack.c.bf16 %v2464_v52, %v2462_v32 }
 0x8ca   : > { %2362 = vrot.lane.b32.xlu0 %v2357_v35, %s6949_s22 }
 0x8cb   : > { %4625 = vmatprep.mubr.msk.bf16.mxu0 %vm1396_vm6, %v2466_v53 }
 0x8cd   : > { %2382 = vrot.lane.b32.xlu1 %v2378_v37, %s5531_s1  ;;  %v2443_v37 = vld [vmem:[#allocation3 + $0x90] sm:$0xff] }
 0x8ce   : > { %2384 = vrot.lane.b32.xlu0 %v2379_v38, %s5531_s1  ;;  %s6954_s1 = smov 64  }
 0x8d1   : > { %2404 = vrot.lane.b32.xlu1 %v2400_v39, %s5532_s16  ;;  %v2456_v39 = vpack.c.bf16 %v2443_v37, %v2442_v36 }
 0x8d2   : > { %2406 = vrot.lane.b32.xlu0 %v2401_v40, %s5532_s16  ;;  %s6953_s16 = sld [smem:[#allocation33_spill]] }
 0x8d5   : > { %2426 = vrot.lane.b32.xlu1 %v2422_v45, %s5533_s10 }
 0x8d6   : > { %2428 = vrot.lane.b32.xlu0 %v2423_v44, %s5533_s10  ;;  %s6952_s10 = sld [smem:[#allocation45_spill]] }
 0x8d9   : > { %2550 = vperm.xlu1 %5112, %v2542_v50  }
 0x8da   : > { %2545 = vperm.xlu0 %5111, %v2541_v51  }
 0x92b   : > { %v2263_v54 = vpop.permute.xlu1 %2262 }
 0x92c   : > { %2268 = vst.msk [vmem:[#allocation3] sm:$0xff] %vm1396_vm6, %v2263_v54  ;;  %v2265_v55 = vpop.permute.xlu0 %2264 }
 0x92d   : > { %2269 = vst.msk [vmem:[#allocation3 + $0x10] sm:$0xff] %vm1396_vm6, %v2265_v55 }
 0x92f   : > { %v2285_v56 = vpop.permute.xlu1 %2284 }
 0x930   : > { %2290 = vst.msk [vmem:[#allocation3 + $0x20] sm:$0xff] %vm1396_vm6, %v2285_v56  ;;  %v2287_v57 = vpop.permute.xlu0 %2286 }
 0x931   : > { %2291 = vst.msk [vmem:[#allocation3 + $0x30] sm:$0xff] %vm1396_vm6, %v2287_v57 }
 0x933   : > { %v2307_v58 = vpop.permute.xlu1 %2306  ;;  %v2434_v59 = vld [vmem:[#allocation3] sm:$0xff] }
 0x934   : > { %2312 = vst.msk [vmem:[#allocation3 + $0x40] sm:$0xff] %vm1396_vm6, %v2307_v58  ;;  %v2309_v60 = vpop.permute.xlu0 %2308  ;;  %v2435_v61 = vld [vmem:[#allocation3 + $0x10] sm:$0xff]  ;;  %v2461_v58 = vld [vmem:[%s6951_s29] sm:$0xff] }
 0x935   : > { %2313 = vst.msk [vmem:[#allocation3 + $0x50] sm:$0xff] %vm1396_vm6, %v2309_v60  ;;  %v2452_v62 = vpack.c.bf16 %v2435_v61, %v2434_v59  ;;  %v2463_v59 = vld [vmem:[%s6951_s29 + $0x10] sm:$0xff]  ;;  %s6978_s29 = smov 17  }
 0x936   : > { %v2465_v61 = vpack.c.bf16 %v2463_v59, %v2461_v58 }
 0x937   : > { %2471 = vmatpush1.bf16.msra.mxu0 %v2452_v62  ;;  %v2329_v13 = vpop.permute.xlu1 %2328  ;;  %v2436_v16 = vld [vmem:[#allocation3 + $0x20] sm:$0xff] }
 0x938   : > { %2334 = vst.msk [vmem:[#allocation3 + $0x60] sm:$0xff] %vm1396_vm6, %v2329_v13  ;;  %v2331_v12 = vpop.permute.xlu0 %2330  ;;  %2472 = vmatprep.subr.bf16.mxu0 %v5504_v28  ;;  %v2437_v17 = vld [vmem:[#allocation3 + $0x30] sm:$0xff] }
 0x939   : > { %2335 = vst.msk [vmem:[#allocation3 + $0x70] sm:$0xff] %vm1396_vm6, %v2331_v12  ;;  %v2453_v20 = vpack.c.bf16 %v2437_v17, %v2436_v16 }
 0x93b   : > { %2473 = vmatpush1.bf16.msra.mxu0 %v2453_v20  ;;  %v2361_v22 = vpop.permute.xlu1 %2360  ;;  %v2438_v23 = vld [vmem:[#allocation3 + $0x40] sm:$0xff] }
 0x93c   : > { %2366 = vst.msk [vmem:[#allocation3 + $0xa0] sm:$0xff] %vm1396_vm6, %v2361_v22  ;;  %v2363_v25 = vpop.permute.xlu0 %2362  ;;  %2474 = vmatprep.subr.bf16.mxu0 %v5504_v28  ;;  %v2439_v26 = vld [vmem:[#allocation3 + $0x50] sm:$0xff] }
 0x93d   : > { %2367 = vst.msk [vmem:[#allocation3 + $0xb0] sm:$0xff] %vm1396_vm6, %v2363_v25  ;;  %v2454_v29 = vpack.c.bf16 %v2439_v26, %v2438_v23 }
 0x93f   : > { %2475 = vmatpush1.bf16.msra.mxu0 %v2454_v29  ;;  %v2383_v30 = vpop.permute.xlu1 %2382  ;;  %v2440_v31 = vld [vmem:[#allocation3 + $0x60] sm:$0xff] }
 0x940   : > { %2388 = vst.msk [vmem:[#allocation3 + $0xc0] sm:$0xff] %vm1396_vm6, %v2383_v30  ;;  %v2385_v33 = vpop.permute.xlu0 %2384  ;;  %2476 = vmatprep.subr.bf16.mxu0 %v5504_v28  ;;  %v2441_v34 = vld [vmem:[#allocation3 + $0x70] sm:$0xff]  ;;  %v2555_v29 = vld [vmem:[%s6952_s10] sm:$0xff]  ;;  %v2556_v30 = vld [vmem:[%s6952_s10 + $0x8] sm:$0xff]  ;;  %s6961_s10 = smov 9  }
 0x941   : > { %2389 = vst.msk [vmem:[#allocation3 + $0xd0] sm:$0xff] %vm1396_vm6, %v2385_v33  ;;  %v2455_v35 = vpack.c.bf16 %v2441_v34, %v2440_v31  ;;  %v2577_v31 = vld [vmem:[%s6953_s16] sm:$0xff]  ;;  %v2578_v33 = vld [vmem:[%s6953_s16 + $0x8] sm:$0xff]  ;;  %s6965_s16 = smov 71  }
 0x942   : > { %v4880_v34 = vpack.c.bf16 %v2578_v33, %v2577_v31 }
 0x943   : > { %2477 = vmatpush1.bf16.msra.mxu0 %v2455_v35  ;;  %v2405_v38 = vpop.permute.xlu1 %2404  ;;  %v2444_v40 = vld [vmem:[#allocation3 + $0xa0] sm:$0xff] }
 0x944   : > { %2410 = vst.msk [vmem:[#allocation3 + $0xe0] sm:$0xff] %vm1396_vm6, %v2405_v38  ;;  %v2407_v7 = vpop.permute.xlu0 %2406  ;;  %2478 = vmatprep.subr.bf16.mxu0 %v5504_v28  ;;  %v2445_v42 = vld [vmem:[#allocation3 + $0xb0] sm:$0xff]  ;;  %4881 = vmatprep.subr.bf16.mxu1 %v4880_v34 }
 0x945   : > { %2411 = vst.msk [vmem:[#allocation3 + $0xf0] sm:$0xff] %vm1396_vm6, %v2407_v7  ;;  %v2457_v50 = vpack.c.bf16 %v2445_v42, %v2444_v40  ;;  %4883 = vmatpush3.bf16.msra.mxu1 %v4880_v34 }
 0x946   : > { %4773 = vmatprep.subr.bf16.mxu1 %v5513_v19 }
 0x947   : > { %2479 = vmatpush1.bf16.msra.mxu0 %v2456_v39  ;;  %v2427_v45 = vpop.permute.xlu1 %2426  ;;  %v2446_v51 = vld [vmem:[#allocation3 + $0xc0] sm:$0xff] }
 0x948   : > { %2432 = vst.msk [vmem:[#allocation3 + $0x100] sm:$0xff] %vm1396_vm6, %v2427_v45  ;;  %v2429_v44 = vpop.permute.xlu0 %2428  ;;  %2480 = vmatprep.subr.bf16.mxu0 %v5504_v28  ;;  %v2447_v32 = vld [vmem:[#allocation3 + $0xd0] sm:$0xff] }
 0x949   : > { %2433 = vst.msk [vmem:[#allocation3 + $0x110] sm:$0xff] %vm1396_vm6, %v2429_v44  ;;  %v2458_v52 = vpack.c.bf16 %v2447_v32, %v2446_v51 }
 0x94b   : > { %2481 = vmatpush1.bf16.msra.mxu0 %v2457_v50  ;;  %v2448_v53 = vld [vmem:[#allocation3 + $0xe0] sm:$0xff] }
 0x94c   : > { %2482 = vmatprep.subr.bf16.mxu0 %v5504_v28  ;;  %v2449_v54 = vld [vmem:[#allocation3 + $0xf0] sm:$0xff] }
 0x94d   : > { %v2459_v55 = vpack.c.bf16 %v2449_v54, %v2448_v53 }
 0x94f   : > { %2483 = vmatpush1.bf16.msra.mxu0 %v2458_v52  ;;  %v2450_v56 = vld [vmem:[#allocation3 + $0x100] sm:$0xff] }
 0x950   : > { %2484 = vmatprep.subr.bf16.mxu0 %v5504_v28  ;;  %v2451_v57 = vld [vmem:[#allocation3 + $0x110] sm:$0xff] }
 0x951   : > { %v2460_v60 = vpack.c.bf16 %v2451_v57, %v2450_v56 }
 0x953   : > { %2485 = vmatpush1.bf16.msra.mxu0 %v2459_v55 }
 0x954   : > { %2486 = vmatprep.subr.bf16.mxu0 %v5504_v28 }
 0x957   : > { %2487 = vmatpush1.bf16.msra.mxu0 %v2460_v60 }
 0x958   : > { %v2551_v35 = vpop.permute.xlu1 %2550 }
 0x959   : > { %v2546_v36 = vpop.permute.xlu0 %2545 }
 0x95a   : > { %2503 = vmatmul.mubr.bf16.vlgmr.msra.gmra.mrb[8].mxu0 %v2465_v61 }
 0x95b   : > { %3172 = vmatprep.mubr.f32.mxu0 %v5513_v19 }
 0xa2d   : > { %v2504_v62 = vpop.f32.mrb[8].mxu0 }
 0xa2e   : > { %v2506_v13 = vpop.f32.mrb[9].mxu0  ;;  %v2511_v16 = vsel %vm1396_vm6, %v2504_v62, 0.0  ;;  %v2519_v23 = vmul.f32 %v2504_v62, %v2504_v62 }
 0xa2f   : > { %2512 = vadd.xlane.f32.xlu1 %v2511_v16  ;;  %v2507_v12 = vpop.f32.mrb[10].mxu0 }
 0xa30   : > { %v2520_v17 = vmul.f32 %v2507_v12, %v2507_v12  ;;  %v2509_v20 = vpop.f32.mrb[11].mxu0  ;;  %v2514_v22 = vsel %vm1396_vm6, %v2507_v12, 0.0  ;;  %v2521_v26 = vsel %vm1396_vm6, %v2519_v23, 0.0 }
 0xa31   : > { %2515 = vadd.xlane.f32.xlu0 %v2514_v22 }
 0xa32   : > { %v2524_v25 = vsel %vm1396_vm6, %v2520_v17, 0.0 }
 0xa33   : > { %2525 = vadd.xlane.f32.xlu1 %v2524_v25 }
 0xa35   : > { %2522 = vadd.xlane.f32.xlu0 %v2521_v26 }
 0xa44   : > { %2559 = vperm.xlu1 %5112, %v2555_v29  }
 0xa4b   : > { %2564 = vperm.xlu0 %5111, %v2556_v30  }
 0xabc   : > { %v2513_v37 = vpop.xlane.xlu1 %2512 }
 0xabd   : > { %v2517_v7 = vmul.f32 0.0625, %v2513_v37 }
 0xabe   : > { %v2516_v38 = vpop.xlane.xlu0 %2515 }
 0xabf   : > { %v2518_v39 = vmul.f32 0.0625, %v2516_v38  ;;  %v2529_v50 = vmul.f32 %v2517_v7, %v2517_v7  ;;  %v2533_v57 = vsub.f32 %v2504_v62, %v2517_v7 }
 0xac0   : > { %v2526_v40 = vpop.xlane.xlu1 %2525 }
 0xac1   : > { %v2530_v42 = vmul.f32 %v2518_v39, %v2518_v39  ;;  %v2528_v45 = vmul.f32 0.0625, %v2526_v40  ;;  %v2534_v55 = vsub.f32 %v2507_v12, %v2518_v39 }
 0xac2   : > { %v2523_v44 = vpop.xlane.xlu0 %2522 }
 0xac3   : > { %v2532_v51 = vsub.f32 %v2528_v45, %v2530_v42  ;;  %v2527_v32 = vmul.f32 0.0625, %v2523_v44 }
 0xac4   : > { %v2560_v20 = vpop.permute.xlu1 %2559 }
 0xac5   : > { %v2536_v52 = vadd.f32 1e-05, %v2532_v51  ;;  %v2531_v53 = vsub.f32 %v2527_v32, %v2529_v50 }
 0xac7   : > { %5119 = vrsqrt.f32 %v2536_v52  ;;  %v2535_v54 = vadd.f32 1e-05, %v2531_v53 }
 0xac9   : > { %5121 = vrsqrt.f32 %v2535_v54 }
 0xaca   : > { %v2565_v13 = vpop.permute.xlu0 %2564 }
 0xad1   : > { %v5120_v56 = vpop.eup %5119 }
 0xad2   : > { %v2540_v58 = vmul.f32 %v5120_v56, %v2534_v55 }
 0xad3   : > { %v5122_v59 = vpop.eup %5121 }
 0xad4   : > { %v2539_v60 = vmul.f32 %v5122_v59, %v2533_v57  ;;  %v2554_v61 = vmul.f32 %v2551_v35, %v2540_v58 }
 0xad6   : > { %v2553_v16 = vmul.f32 %v2546_v36, %v2539_v60  ;;  %v2568_v17 = vadd.f32 %v2565_v13, %v2554_v61 }
 0xad8   : > { %v2567_v22 = vadd.f32 %v2560_v20, %v2553_v16  ;;  %vm2570_vm14 = vcmp.gt.f32.partialorder %v2568_v17, 0.0  ;;  %v2572_v23 = vmul.f32 0.25, %v2568_v17 }
 0xada   : > { %vm2569_vm15 = vcmp.gt.f32.partialorder %v2567_v22, 0.0  ;;  %v2571_v25 = vmul.f32 0.25, %v2567_v22  ;;  %v2574_v26 = vsel %vm2570_vm14, %v2568_v17, %v2572_v23 }
 0xadb   : > { %v2576_v12 = vadd.f32 %v2574_v26, %v6238_v43 }
 0xadc   : > { %v2573_v29 = vsel %vm2569_vm15, %v2567_v22, %v2571_v25 }
 0xadd   : > { %v2575_v30 = vadd.f32 %v2573_v29, %v6232_v49 }
 0xadf   : > { %4770 = vmatprep.mubr.msk.f32.mxu1 %vm1396_vm6, %v2575_v30 }
 0xae0   : > { %4771 = vmatmul.mubr.msk.f32.vlgmr.msra.gmra.mrb[6].mxu1 %vm1396_vm6, %v2576_v12 }
 0xae1   : > { %4783 = vmatprep.mubr.msk.bf16.mxu1 %vm5521_vm13, %v5513_v19 }
 0xbb3   : > { %v4772_v62 = vpop.f32.mrb[6].mxu1 }
 0xbb4   : > { %2663 = vst.msk [vmem:[#allocation2 + $0x20] sm:$0xff] %vm1815_vm10, %v4772_v62  ;;  %2668 = vrot.lane.b32.xlu0 %v4772_v62, %s6954_s1  ;;  %v2651_v31 = vpop.f32.mrb[7].mxu1 }
 0xbb5   : > { %2662 = vst.msk [vmem:[#allocation2] sm:$0xff] %vm1815_vm10, %v2651_v31  ;;  %2666 = vrot.lane.b32.xlu1 %v2651_v31, %s6954_s1 }
 0xbb8   : > { %2703 = vrot.lane.b32.xlu0 %v6154_v0, %s6955_s11 }
 0xbb9   : > { %2681 = vrot.lane.b32.xlu1 %v6134_v46, %s6956_s2 }
 0xbbc   : > { %2747 = vrot.lane.b32.xlu0 %v6164_v8, %s6957_s3 }
 0xbbd   : > { %2725 = vrot.lane.b32.xlu1 %v6159_v6, %s6958_s4 }
 0xbc0   : > { %2801 = vrot.lane.b32.xlu0 %v6139_v47, %s6959_s5 }
 0xbc1   : > { %2779 = vrot.lane.b32.xlu1 %v6169_v10, %s6960_s8 }
 0xbc4   : > { %2845 = vrot.lane.b32.xlu0 %v6143_v48, %s6961_s10 }
 0xbc5   : > { %2823 = vrot.lane.b32.xlu1 %v6174_v11, %s6962_s12 }
 0xc26   : > { %v2669_v0 = vpop.permute.xlu0 %2668 }
 0xc27   : > { %2673 = vst.msk [vmem:[#allocation2 + $0x20] sm:$0xff] %vm1895_vm12, %v2669_v0  ;;  %v2667_v46 = vpop.permute.xlu1 %2666 }
 0xc28   : > { %2672 = vst.msk [vmem:[#allocation2] sm:$0xff] %vm1895_vm12, %v2667_v46 }
 0xc2a   : > { %v2704_v11 = vpop.permute.xlu0 %2703 }
 0xc2b   : > { %v2682_v6 = vpop.permute.xlu1 %2681 }
 0xc2e   : > { %v2697_v8 = vld [vmem:[#allocation2 + $0x20] sm:$0xff] }
 0xc2f   : > { %v2674_v49 = vld [vmem:[#allocation2] sm:$0xff]  ;;  %v2685_v43 = vmul.f32 %v2697_v8, %v2682_v6  ;;  %v2769_v47 = vmul.f32 %v2697_v8, %v6183_v9  ;;  %v2707_v33 = vmul.f32 %v2704_v11, %v2697_v8  ;;  %v2726_v35 = vpop.permute.xlu1 %2725 }
 0xc30   : > { %2891 = vst.msk [vmem:[#allocation2] sm:$0xff] %vm1815_vm10, %v6147_v63  ;;  %v2684_v10 = vmul.f32 %v2682_v6, %v2674_v49  ;;  %v2768_v48 = vmul.f32 %v2674_v49, %v6183_v9  ;;  %v2706_v34 = vmul.f32 %v2704_v11, %v2674_v49  ;;  %v2729_v63 = vmul.f32 %v2726_v35, %v2697_v8 }
 0xc31   : > { %2892 = vst.msk [vmem:[#allocation2] sm:$0xff] %vm1895_vm12, %v6178_v14  ;;  %2690 = vrot.lane.b32.xlu0 %v2685_v43, %s6963_s14  ;;  %v2748_v14 = vpop.permute.xlu0 %2747  ;;  %v2728_v36 = vmul.f32 %v2726_v35, %v2674_v49 }
 0xc32   : > { %2771 = vst.msk [vmem:[#allocation3 + $0x90] sm:$0xff] %vm1815_vm10, %v2769_v47  ;;  %2688 = vrot.lane.b32.xlu1 %v2684_v10, %s6963_s14  ;;  %2770 = vst.msk [vmem:[#allocation3 + $0x80] sm:$0xff] %vm1815_vm10, %v2768_v48  ;;  %v2751_v37 = vmul.f32 %v2748_v14, %v2697_v8  ;;  %v2750_v7 = vmul.f32 %v2748_v14, %v2674_v49 }
 0xc33   : > { %v2780_v45 = vpop.permute.xlu1 %2779 }
 0xc34   : > { %v2783_v56 = vmul.f32 %v2780_v45, %v2697_v8  ;;  %v2782_v57 = vmul.f32 %v2780_v45, %v2674_v49 }
 0xc35   : > { %2712 = vrot.lane.b32.xlu0 %v2707_v33, %s6964_s15  ;;  %v2802_v50 = vpop.permute.xlu0 %2801 }
 0xc36   : > { %2710 = vrot.lane.b32.xlu1 %v2706_v34, %s6964_s15  ;;  %v2805_v58 = vmul.f32 %v2802_v50, %v2697_v8  ;;  %v2804_v59 = vmul.f32 %v2802_v50, %v2674_v49 }
 0xc37   : > { %v2824_v52 = vpop.permute.xlu1 %2823 }
 0xc38   : > { %v2900_v38 = vld [vmem:[#allocation2] sm:$0xff]  ;;  %v2827_v60 = vmul.f32 %v2824_v52, %v2697_v8  ;;  %v2826_v61 = vmul.f32 %v2824_v52, %v2674_v49 }
 0xc39   : > { %2734 = vrot.lane.b32.xlu0 %v2729_v63, %s6965_s16  ;;  %v2901_v39 = vmul.f32 %v2900_v38, %v2704_v11  ;;  %v2894_v40 = vmul.f32 %v2900_v38, %v2682_v6  ;;  %v2915_v42 = vmul.f32 %v2900_v38, %v2748_v14  ;;  %v2908_v44 = vmul.f32 %v2900_v38, %v2726_v35  ;;  %v2846_v53 = vpop.permute.xlu0 %2845  ;;  %v6390_v63 = vld [vmem:[#allocation3 + $0x80] sm:$0xff] }
 0xc3a   : > { %2732 = vrot.lane.b32.xlu1 %v2728_v36, %s6965_s16  ;;  %v2932_v51 = vmul.f32 %v2900_v38, %v2802_v50  ;;  %v2925_v32 = vmul.f32 %v2900_v38, %v2780_v45  ;;  %v2946_v54 = vmul.f32 %v2900_v38, %v2846_v53  ;;  %v2939_v55 = vmul.f32 %v2900_v38, %v2824_v52 }
 0xc3b   : > { %v2849_v13 = vmul.f32 %v2846_v53, %v2697_v8  ;;  %v2848_v16 = vmul.f32 %v2846_v53, %v2674_v49  ;;  %v2922_v12 = vmul.f32 %v2900_v38, %v6183_v9 }
 0xc3d   : > { %2756 = vrot.lane.b32.xlu0 %v2751_v37, %s6966_s17 }
 0xc3e   : > { %2754 = vrot.lane.b32.xlu1 %v2750_v7, %s6966_s17 }
 0xc41   : > { %2903 = vrot.lane.b32.xlu0 %v2901_v39, %s6964_s15 }
 0xc42   : > { %2896 = vrot.lane.b32.xlu1 %v2894_v40, %s6963_s14 }
 0xc45   : > { %2917 = vrot.lane.b32.xlu0 %v2915_v42, %s6966_s17 }
 0xc46   : > { %2910 = vrot.lane.b32.xlu1 %v2908_v44, %s6965_s16 }
 0xc49   : > { %2934 = vrot.lane.b32.xlu0 %v2932_v51, %s6967_s18 }
 0xc4a   : > { %2927 = vrot.lane.b32.xlu1 %v2925_v32, %s6949_s22 }
 0xc4d   : > { %2948 = vrot.lane.b32.xlu0 %v2946_v54, %s6968_s20 }
 0xc4e   : > { %2941 = vrot.lane.b32.xlu1 %v2939_v55, %s6969_s21 }
 0xc51   : > { %2788 = vrot.lane.b32.xlu0 %v2783_v56, %s6949_s22 }
 0xc52   : > { %2786 = vrot.lane.b32.xlu1 %v2782_v57, %s6949_s22 }
 0xc55   : > { %2810 = vrot.lane.b32.xlu0 %v2805_v58, %s6967_s18  ;;  %v2966_v58 = vld [vmem:[#allocation13] sm:$0xff] }
 0xc56   : > { %2808 = vrot.lane.b32.xlu1 %v2804_v59, %s6967_s18 }
 0xc59   : > { %2832 = vrot.lane.b32.xlu0 %v2827_v60, %s6969_s21  ;;  %v2888_v60 = vld [vmem:[#allocation12 + $0x8] sm:$0xff] }
 0xc5a   : > { %2830 = vrot.lane.b32.xlu1 %v2826_v61, %s6969_s21 }
 0xc5d   : > { %2854 = vrot.lane.b32.xlu0 %v2849_v13, %s6968_s20  ;;  %v2967_v13 = vpack.c.bf16 %v2966_v58, %v2966_v58 }
 0xc5e   : > { %2852 = vrot.lane.b32.xlu1 %v2848_v16, %s6968_s20 }
 0xca3   : > { %v2691_v17 = vpop.permute.xlu0 %2690 }
 0xca4   : > { %2695 = vst.msk [vmem:[#allocation3 + $0x10] sm:$0xff] %vm1815_vm10, %v2691_v17  ;;  %v2689_v20 = vpop.permute.xlu1 %2688  ;;  %v2890_v17 = vpack.c.bf16 %v2888_v60, %v2888_v60  ;;  %v3099_v60 = vld [vmem:[%s6972_s28 + $0x50] sm:$0xff] }
 0xca5   : > { %2694 = vst.msk [vmem:[#allocation3] sm:$0xff] %vm1815_vm10, %v2689_v20 }
 0xca7   : > { %v2713_v22 = vpop.permute.xlu0 %2712 }
 0xca8   : > { %2717 = vst.msk [vmem:[#allocation3 + $0x30] sm:$0xff] %vm1815_vm10, %v2713_v22  ;;  %v2711_v23 = vpop.permute.xlu1 %2710 }
 0xca9   : > { %2716 = vst.msk [vmem:[#allocation3 + $0x20] sm:$0xff] %vm1815_vm10, %v2711_v23 }
 0xcab   : > { %v2735_v25 = vpop.permute.xlu0 %2734  ;;  %v6371_v62 = vld [vmem:[#allocation3 + $0x10] sm:$0xff] }
 0xcac   : > { %2739 = vst.msk [vmem:[#allocation3 + $0x50] sm:$0xff] %vm1815_vm10, %v2735_v25  ;;  %v2733_v26 = vpop.permute.xlu1 %2732  ;;  %v6376_v46 = vld [vmem:[#allocation3] sm:$0xff] }
 0xcad   : > { %2738 = vst.msk [vmem:[#allocation3 + $0x40] sm:$0xff] %vm1815_vm10, %v2733_v26  ;;  %v2878_v22 = vpack.c.bf16 %v6371_v62, %v6376_v46 }
 0xcaf   : > { %v2757_v29 = vpop.permute.xlu0 %2756  ;;  %v6380_v6 = vld [vmem:[#allocation3 + $0x30] sm:$0xff] }
 0xcb0   : > { %2761 = vst.msk [vmem:[#allocation3 + $0x70] sm:$0xff] %vm1815_vm10, %v2757_v29  ;;  %v2755_v30 = vpop.permute.xlu1 %2754  ;;  %v6383_v9 = vld [vmem:[#allocation3 + $0x20] sm:$0xff]  ;;  %v2869_v29 = vld [vmem:[#allocation3 + $0x90] sm:$0xff] }
 0xcb1   : > { %2760 = vst.msk [vmem:[#allocation3 + $0x60] sm:$0xff] %vm1815_vm10, %v2755_v30  ;;  %v2879_v23 = vpack.c.bf16 %v6380_v6, %v6383_v9  ;;  %v2882_v30 = vpack.c.bf16 %v2869_v29, %v6390_v63 }
 0xcb3   : > { %v2904_v31 = vpop.permute.xlu0 %2903  ;;  %v2865_v11 = vld [vmem:[#allocation3 + $0x50] sm:$0xff] }
 0xcb4   : > { %v6373_v0 = vld [vmem:[#allocation3 + $0x40] sm:$0xff]  ;;  %2906 = vst.msk [vmem:[#allocation3 + $0x10] sm:$0xff] %vm1815_vm10, %v2904_v31  ;;  %v2897_v8 = vpop.permute.xlu1 %2896 }
 0xcb5   : > { %2923 = vst.msk [vmem:[#allocation3 + $0x40] sm:$0xff] %vm1815_vm10, %v2922_v12  ;;  %2899 = vst.msk [vmem:[#allocation3] sm:$0xff] %vm1815_vm10, %v2897_v8  ;;  %v2880_v25 = vpack.c.bf16 %v2865_v11, %v6373_v0 }
 0xcb7   : > { %v2918_v49 = vpop.permute.xlu0 %2917  ;;  %v2867_v37 = vld [vmem:[#allocation3 + $0x70] sm:$0xff] }
 0xcb8   : > { %2920 = vst.msk [vmem:[#allocation3 + $0x30] sm:$0xff] %vm1815_vm10, %v2918_v49  ;;  %v2911_v43 = vpop.permute.xlu1 %2910  ;;  %v6386_v10 = vld [vmem:[#allocation3 + $0x60] sm:$0xff] }
 0xcb9   : > { %2913 = vst.msk [vmem:[#allocation3 + $0x20] sm:$0xff] %vm1815_vm10, %v2911_v43  ;;  %v2881_v26 = vpack.c.bf16 %v2867_v37, %v6386_v10  ;;  %v2887_v10 = vld [vmem:[#allocation12] sm:$0xff] }
 0xcba   : > { %v2889_v11 = vpack.c.bf16 %v2887_v10, %v2887_v10 }
 0xcbb   : > { %v2935_v47 = vpop.permute.xlu0 %2934  ;;  %v2953_v48 = vld [vmem:[#allocation3 + $0x10] sm:$0xff] }
 0xcbc   : > { %2937 = vst.msk [vmem:[#allocation3 + $0x60] sm:$0xff] %vm1815_vm10, %v2935_v47  ;;  %v2928_v33 = vpop.permute.xlu1 %2927  ;;  %v2952_v34 = vld [vmem:[#allocation3] sm:$0xff] }
 0xcbd   : > { %2930 = vst.msk [vmem:[#allocation3 + $0x50] sm:$0xff] %vm1815_vm10, %v2928_v33  ;;  %v2961_v35 = vpack.c.bf16 %v2953_v48, %v2952_v34  ;;  %v2956_v45 = vld [vmem:[#allocation3 + $0x40] sm:$0xff] }
 0xcbf   : > { %v2949_v14 = vpop.permute.xlu0 %2948  ;;  %4774 = vmatpush3.bf16.msra.mxu1 %v2961_v35  ;;  %v2955_v36 = vld [vmem:[#allocation3 + $0x30] sm:$0xff] }
 0xcc0   : > { %2951 = vst.msk [vmem:[#allocation3 + $0x80] sm:$0xff] %vm1815_vm10, %v2949_v14  ;;  %v2942_v38 = vpop.permute.xlu1 %2941  ;;  %4775 = vmatprep.subr.bf16.mxu1 %v5513_v19  ;;  %v2954_v7 = vld [vmem:[#allocation3 + $0x20] sm:$0xff] }
 0xcc1   : > { %2944 = vst.msk [vmem:[#allocation3 + $0x70] sm:$0xff] %vm1815_vm10, %v2942_v38  ;;  %v2962_v39 = vpack.c.bf16 %v2955_v36, %v2954_v7  ;;  %v3079_v38 = vld [vmem:[%s6970_s25] sm:$0xff]  ;;  %s6973_s25 = smov 111  }
 0xcc2   : > { %v3072_v7 = vld [vmem:[%s6971_s27] sm:$0xff]  ;;  %s6974_s27 = smov 112  }
 0xcc3   : > { %v2789_v40 = vpop.permute.xlu0 %2788  ;;  %4776 = vmatpush3.bf16.msra.mxu1 %v2962_v39  ;;  %v2958_v53 = vld [vmem:[#allocation3 + $0x60] sm:$0xff]  ;;  %v3090_v39 = vld [vmem:[%s6972_s28 + $0x8] sm:$0xff] }
 0xcc4   : > { %2793 = vst.msk [vmem:[#allocation3 + $0xb0] sm:$0xff] %vm1815_vm10, %v2789_v40  ;;  %v2787_v42 = vpop.permute.xlu1 %2786  ;;  %4777 = vmatprep.subr.bf16.mxu1 %v5513_v19  ;;  %v2957_v44 = vld [vmem:[#allocation3 + $0x50] sm:$0xff]  ;;  %v3092_v40 = vld [vmem:[%s6972_s28 + $0x18] sm:$0xff] }
 0xcc5   : > { %2792 = vst.msk [vmem:[#allocation3 + $0xa0] sm:$0xff] %vm1815_vm10, %v2787_v42  ;;  %v2963_v50 = vpack.c.bf16 %v2957_v44, %v2956_v45  ;;  %v4884_v42 = vpack.c.bf16 %v3092_v40, %v3090_v39  ;;  %v3089_v45 = vld [vmem:[%s6972_s28] sm:$0xff]  ;;  %v3091_v44 = vld [vmem:[%s6972_s28 + $0x10] sm:$0xff] }
 0xcc7   : > { %v2811_v51 = vpop.permute.xlu0 %2810  ;;  %4778 = vmatpush3.bf16.msra.mxu1 %v2963_v50  ;;  %v2960_v32 = vld [vmem:[#allocation3 + $0x80] sm:$0xff]  ;;  %v4886_v50 = vpack.c.bf16 %v3091_v44, %v3089_v45  ;;  %4885 = vmatprep.subr.bf16.mxu0 %v4884_v42 }
 0xcc8   : > { %2815 = vst.msk [vmem:[#allocation3 + $0xd0] sm:$0xff] %vm1815_vm10, %v2811_v51  ;;  %v2809_v52 = vpop.permute.xlu1 %2808  ;;  %4779 = vmatprep.subr.bf16.mxu1 %v5513_v19  ;;  %v2959_v54 = vld [vmem:[#allocation3 + $0x70] sm:$0xff]  ;;  %v2965_v56 = vpack.c.bf16 %v2960_v32, %v2960_v32  ;;  %v3094_v51 = vld [vmem:[%s6972_s28 + $0x28] sm:$0xff]  ;;  %v3096_v32 = vld [vmem:[%s6972_s28 + $0x38] sm:$0xff] }
 0xcc9   : > { %2814 = vst.msk [vmem:[#allocation3 + $0xc0] sm:$0xff] %vm1815_vm10, %v2809_v52  ;;  %v2964_v55 = vpack.c.bf16 %v2959_v54, %v2958_v53  ;;  %4887 = vmatpush1.bf16.msra.mxu0 %v4886_v50  ;;  %v4888_v52 = vpack.c.bf16 %v3096_v32, %v3094_v51  ;;  %v3093_v53 = vld [vmem:[%s6972_s28 + $0x20] sm:$0xff]  ;;  %v3095_v54 = vld [vmem:[%s6972_s28 + $0x30] sm:$0xff] }
 0xcca   : > { %v2972_v61 = vsel %vm1690_vm8, %v2965_v56, 0  ;;  %v3098_v56 = vld [vmem:[%s6972_s28 + $0x48] sm:$0xff] }
 0xccb   : > { %v2833_v57 = vpop.permute.xlu0 %2832  ;;  %4780 = vmatpush3.bf16.msra.mxu1 %v2964_v55  ;;  %v2871_v62 = vld [vmem:[#allocation3 + $0xb0] sm:$0xff]  ;;  %v4890_v55 = vpack.c.bf16 %v3095_v54, %v3093_v53  ;;  %4889 = vmatprep.subr.bf16.mxu0 %v4888_v52 }
 0xccc   : > { %2837 = vst.msk [vmem:[#allocation3 + $0xf0] sm:$0xff] %vm1815_vm10, %v2833_v57  ;;  %v2831_v59 = vpop.permute.xlu1 %2830  ;;  %4781 = vmatprep.subr.bf16.mxu1 %v5513_v19  ;;  %v2870_v12 = vld [vmem:[#allocation3 + $0xa0] sm:$0xff]  ;;  %v3100_v57 = vld [vmem:[%s6972_s28 + $0x58] sm:$0xff] }
 0xccd   : > { %2836 = vst.msk [vmem:[#allocation3 + $0xe0] sm:$0xff] %vm1815_vm10, %v2831_v59  ;;  %v2883_v31 = vpack.c.bf16 %v2871_v62, %v2870_v12  ;;  %4891 = vmatpush1.bf16.msra.mxu0 %v4890_v55  ;;  %v4892_v58 = vpack.c.bf16 %v3100_v57, %v3098_v56  ;;  %v3097_v59 = vld [vmem:[%s6972_s28 + $0x40] sm:$0xff]  ;;  %v1847_v12 = vld [vmem:[%s6944_s26 + $0x8] sm:$0xff]  ;;  %s6976_s26 = smov 15  }
 0xcce   : > { %v6461_v62 = vld [vmem:[%s5554_s13] sm:$0xff] }
 0xccf   : > { %v2855_v16 = vpop.permute.xlu0 %2854  ;;  %4782 = vmatpush3.bf16.msra.mxu1 %v2972_v61  ;;  %v2873_v8 = vld [vmem:[#allocation3 + $0xd0] sm:$0xff]  ;;  %v4894_v61 = vpack.c.bf16 %v3099_v60, %v3097_v59  ;;  %4893 = vmatprep.subr.bf16.mxu0 %v4892_v58 }
 0xcd0   : > { %2859 = vst.msk [vmem:[#allocation3 + $0x110] sm:$0xff] %vm1815_vm10, %v2855_v16  ;;  %v2853_v20 = vpop.permute.xlu1 %2852  ;;  %3017 = vmatprep.subr.bf16.mxu1 %v5504_v28  ;;  %v2872_v46 = vld [vmem:[#allocation3 + $0xc0] sm:$0xff]  ;;  %v3104_v16 = vld [vmem:[%s6972_s28 + $0x78] sm:$0xff] }
 0xcd1   : > { %2858 = vst.msk [vmem:[#allocation3 + $0x100] sm:$0xff] %vm1815_vm10, %v2853_v20  ;;  %v2884_v0 = vpack.c.bf16 %v2873_v8, %v2872_v46  ;;  %4895 = vmatpush1.bf16.msra.mxu0 %v4894_v61  ;;  %v3101_v20 = vld [vmem:[%s6972_s28 + $0x60] sm:$0xff]  ;;  %v3232_v46 = vrot.slane %v6461_v62, %v5929_v3  ;;  %v6470_v8 = vld [vmem:[%s5554_s13 + $0x8] sm:$0xff] }
 0xcd2   : > { %4784 = vmatmul.mubr.msk.bf16.vlgmr.msra.gmra.mrb[8].mxu1 %vm1686_vm9, %v2967_v13  ;;  %v3102_v13 = vld [vmem:[%s6972_s28 + $0x68] sm:$0xff] }
 0xcd3   : > { %3018 = vmatpush1.bf16.msra.mxu1 %v2878_v22  ;;  %4630 = vmatprep.mubr.msk.bf16.mxu1 %vm1396_vm6, %v2890_v17  ;;  %v2875_v49 = vld [vmem:[#allocation3 + $0xf0] sm:$0xff]  ;;  %v4896_v17 = vpack.c.bf16 %v3104_v16, %v3102_v13 }
 0xcd4   : > { %3019 = vmatprep.subr.bf16.mxu1 %v5504_v28  ;;  %v2874_v6 = vld [vmem:[#allocation3 + $0xe0] sm:$0xff]  ;;  %v3103_v22 = vld [vmem:[%s6972_s28 + $0x70] sm:$0xff]  ;;  %s6977_s28 = smov 16  }
 0xcd5   : > { %v2885_v9 = vpack.c.bf16 %v2875_v49, %v2874_v6  ;;  %4897 = vmatprep.subr.bf16.mxu0 %v4896_v17  ;;  %v3236_v6 = vrot.slane %v6470_v8, %v5929_v3  ;;  %v3271_v49 = vrot.slane %v6461_v62, %v5961_v15 }
 0xcd7   : > { %3020 = vmatpush1.bf16.msra.mxu1 %v2879_v23  ;;  %v2877_v47 = vld [vmem:[#allocation3 + $0x110] sm:$0xff]  ;;  %v4898_v23 = vpack.c.bf16 %v3103_v22, %v3101_v20 }
 0xcd8   : > { %3021 = vmatprep.subr.bf16.mxu1 %v5504_v28  ;;  %v2876_v43 = vld [vmem:[#allocation3 + $0x100] sm:$0xff] }
 0xcd9   : > { %v2886_v48 = vpack.c.bf16 %v2877_v47, %v2876_v43  ;;  %4899 = vmatpush1.bf16.msra.mxu0 %v4898_v23  ;;  %v3363_v43 = vrot.slane %v6461_v62, %v5978_v21  ;;  %v6486_v47 = vld [vmem:[#allocation5] sm:$0xff] }
 0xcda   : > { %v3653_v10 = vrot.slane %v6486_v47, %v5935_v5 }
 0xcdb   : > { %3022 = vmatpush1.bf16.msra.mxu1 %v2880_v25  ;;  %v1825_v25 = vmul.f32 %v6128_v41, %v6128_v41 }
 0xcdc   : > { %3023 = vmatprep.subr.bf16.mxu1 %v5504_v28 }
 0xcdd   : > { %v1829_v29 = vsel %vm1815_vm10, %v1825_v25, 0.0 }
 0xcdf   : > { %3024 = vmatpush1.bf16.msra.mxu1 %v2881_v26  ;;  %v1819_v26 = vsel %vm1815_vm10, %v6128_v41, 0.0 }
 0xce0   : > { %3025 = vmatprep.subr.bf16.mxu1 %v5504_v28 }
 0xce3   : > { %3026 = vmatpush1.bf16.msra.mxu1 %v2882_v30  ;;  %v1861_v30 = vld [vmem:[%s6916_s24 + $0x8] sm:$0xff]  ;;  %s6975_s24 = smov 113  }
 0xce4   : > { %3027 = vmatprep.subr.bf16.mxu1 %v5504_v28 }
 0xce7   : > { %3028 = vmatpush1.bf16.msra.mxu1 %v2883_v31  ;;  %v3193_v31 = vrot.slane %v6461_v62, %v5935_v5 }
 0xce8   : > { %3029 = vmatprep.subr.bf16.mxu1 %v5504_v28 }
 0xceb   : > { %3030 = vmatpush1.bf16.msra.mxu1 %v2884_v0  ;;  %v3197_v0 = vrot.slane %v6470_v8, %v5935_v5 }
 0xcec   : > { %3031 = vmatprep.subr.bf16.mxu1 %v5504_v28 }
 0xcef   : > { %3032 = vmatpush1.bf16.msra.mxu1 %v2885_v9  ;;  %v3310_v9 = vrot.slane %v6461_v62, %v5970_v18 }
 0xcf0   : > { %3033 = vmatprep.subr.bf16.mxu1 %v5504_v28 }
 0xcf3   : > { %3034 = vmatpush1.bf16.msra.mxu1 %v2886_v48  ;;  %v3402_v48 = vrot.slane %v6461_v62, %v5986_v24 }
 0xcf4   : > { %4787 = vmatprep.subr.bf16.mxu1 %v5513_v19 }
 0xcf6   : > { %3050 = vmatmul.mubr.bf16.vlgmr.msra.gmra.mrb[8].mxu1 %v2889_v11  ;;  %v3441_v11 = vrot.slane %v6461_v62, %v5994_v27 }
 0xcf7   : > { %4797 = vmatprep.mubr.msk.bf16.mxu1 %vm5521_vm13, %v5513_v19 }
 0xdc9   : > { %v6428_v33 = vpop.f32.mrb[8].mxu1 }
 0xdca   : > { %v3061_v34 = vmul.f32 %v6428_v33, %v6428_v33  ;;  %v3053_v35 = vpop.f32.mrb[9].mxu1  ;;  %v3057_v63 = vsel %vm1815_vm10, %v6428_v33, 0.0 }
 0xdcb   : > { %3058 = vadd.xlane.f32.xlu1 %v3057_v63  ;;  %v3054_v14 = vpop.f32.mrb[10].mxu1  ;;  %v4632_v35 = vld [vmem:[%s5554_s13 + $0x10] ss:$0 sm:$0xff]  ;;  %v3720_v63 = vrot.slane %v6486_v47, %v5978_v21 }
 0xdcc   : > { %v3055_v36 = vpop.f32.mrb[11].mxu1  ;;  %v3062_v37 = vsel %vm1815_vm10, %v3061_v34, 0.0  ;;  %v3683_v34 = vrot.slane %v6486_v47, %v5961_v15  ;;  %v3750_v14 = vrot.slane %v6486_v47, %v5994_v27 }
 0xdcd   : > { %3063 = vadd.xlane.f32.xlu0 %v3062_v37 }
 0xddc   : > { %3082 = vperm.xlu1 %5112, %v3079_v38  }
 0xde3   : > { %3075 = vperm.xlu0 %5111, %v3072_v7  }
 0xe00   : > { %1820 = vadd.xlane.f32.xlu1 %v1819_v26 }
 0xe02   : > { %1830 = vadd.xlane.f32.xlu0 %v1829_v29 }
 0xe11   : > { %1869 = vperm.xlu1 %5112, %v1861_v30   ;;  %v3367_v30 = vrot.slane %v6470_v8, %v5978_v21  ;;  %v3698_v21 = vrot.slane %v6486_v47, %v5970_v18 }
 0xe15   : > { %3200 = vrot.lane.b32.xlu1 %v3193_v31, %s6973_s25  ;;  %v3445_v31 = vrot.slane %v6470_v8, %v5994_v27 }
 0xe18   : > { %1855 = vperm.xlu0 %5111, %v1847_v12   ;;  %v3668_v12 = vrot.slane %v6486_v47, %v5929_v3  ;;  %v3735_v3 = vrot.slane %v6486_v47, %v5986_v24 }
 0xe19   : > { %3239 = vrot.lane.b32.xlu1 %v3232_v46, %s6974_s27  ;;  %v4633_v46 = vld [vmem:[%s5554_s13 + $0x18] ss:$0 sm:$0xff] }
 0xe1c   : > { %3202 = vrot.lane.b32.xlu0 %v3197_v0, %s6973_s25  ;;  %v4636_v0 = vld [vmem:[#allocation5 + $0x8] ss:$0 sm:$0xff] }
 0xe20   : > { %3241 = vrot.lane.b32.xlu0 %v3236_v6, %s6974_s27 }
 0xe24   : > { %3278 = vrot.lane.b32.xlu0 %v3271_v49, %s6975_s24 }
 0xe28   : > { %3317 = vrot.lane.b32.xlu0 %v3310_v9, %s6949_s22 }
 0xe2c   : > { %3370 = vrot.lane.b32.xlu0 %v3363_v43, %s6960_s8 }
 0xe30   : > { %3655 = vrot.lane.b32.xlu0 %v3653_v10, %s6956_s2  ;;  %s4615_s2 = sshll.u32 %s6988_s0, 1 }
 0xe34   : > { %3409 = vrot.lane.b32.xlu0 %v3402_v48, %s6976_s26 }
 0xe38   : > { %3448 = vrot.lane.b32.xlu0 %v3441_v11, %s6977_s28 }
 0xe3c   : > { %3685 = vrot.lane.b32.xlu0 %v3683_v34, %s6958_s4  ;;  %s6986_s4 = sld [smem:[#allocation57_spill]] }
 0xe40   : > { %3487 = vrot.lane.b32.xlu0 %v4632_v35, %s6978_s29 }
 0xe44   : > { %3722 = vrot.lane.b32.xlu0 %v3720_v63, %s6960_s8 }
 0xe48   : > { %3752 = vrot.lane.b32.xlu0 %v3750_v14, %s6962_s12  ;;  %s4614_s12 = sshll.u32 %s6988_s0, 2 }
 0xe58   : > { %v3059_v36 = vpop.xlane.xlu1 %3058 }
 0xe59   : > { %v3060_v37 = vmul.f32 0.015625, %v3059_v36 }
 0xe5a   : > { %v3064_v38 = vpop.xlane.xlu0 %3063 }
 0xe5b   : > { %v3066_v7 = vmul.f32 %v3060_v37, %v3060_v37  ;;  %v3065_v39 = vmul.f32 0.015625, %v3064_v38  ;;  %v3068_v45 = vsub.f32 %v6428_v33, %v3060_v37 }
 0xe5c   : > { %v3083_v52 = vpop.permute.xlu1 %3082 }
 0xe5d   : > { %v3067_v40 = vsub.f32 %v3065_v39, %v3066_v7  ;;  %v3348_v7 = vrot.slane %v6461_v62, %v5932_v4  ;;  %v3352_v39 = vrot.slane %v6470_v8, %v5932_v4 }
 0xe5f   : > { %v3069_v42 = vadd.f32 1e-05, %v3067_v40 }
 0xe61   : > { %5123 = vrsqrt.f32 %v3069_v42 }
 0xe62   : > { %v3076_v51 = vpop.permute.xlu0 %3075 }
 0xe6b   : > { %v5124_v44 = vpop.eup %5123 }
 0xe6c   : > { %v3071_v50 = vmul.f32 %v5124_v44, %v3068_v45 }
 0xe6e   : > { %v3078_v32 = vmul.f32 %v3076_v51, %v3071_v50 }
 0xe70   : > { %v3085_v53 = vadd.f32 %v3083_v52, %v3078_v32  ;;  %v3713_v32 = vrot.slane %v6486_v47, %v5932_v4 }
 0xe72   : > { %vm3086_vm11 = vcmp.gt.f32.partialorder %v3085_v53, 0.0  ;;  %v3087_v54 = vmul.f32 0.25, %v3085_v53 }
 0xe74   : > { %v3088_v55 = vsel %vm3086_vm11, %v3085_v53, %v3087_v54 }
 0xe75   : > { %4631 = vmatmul.mubr.msk.f32.vlgmr.msra.gmra.mrb[12].mxu0 %vm1815_vm10, %v3088_v55 }
 0xe76   : > { %3584 = vmatprep.mubr.bf16.mxu0 %v5504_v28  ;;  %v3275_v28 = vrot.slane %v6470_v8, %v5961_v15  ;;  %v3406_v15 = vrot.slane %v6470_v8, %v5986_v24 }
 0xe8d   : > { %v1821_v56 = vpop.xlane.xlu1 %1820 }
 0xe8e   : > { %v1823_v57 = vmul.f32 0.015625, %v1821_v56 }
 0xe8f   : > { %v1831_v58 = vpop.xlane.xlu0 %1830 }
 0xe90   : > { %v1835_v59 = vmul.f32 %v1823_v57, %v1823_v57  ;;  %v1833_v60 = vmul.f32 0.015625, %v1831_v58  ;;  %v1839_v13 = vsub.f32 %v6128_v41, %v1823_v57  ;;  %v3314_v41 = vrot.slane %v6470_v8, %v5970_v18 }
 0xe91   : > { %v1870_v23 = vpop.permute.xlu1 %1869 }
 0xe92   : > { %v1837_v61 = vsub.f32 %v1833_v60, %v1835_v59 }
 0xe94   : > { %v1841_v33 = vadd.f32 1e-05, %v1837_v61 }
 0xe95   : > { %v3201_v49 = vpop.permute.xlu1 %3200 }
 0xe96   : > { %5125 = vrsqrt.f32 %v1841_v33 }
 0xe97   : > { %v1856_v20 = vpop.permute.xlu0 %1855 }
 0xe99   : > { %v3240_v43 = vpop.permute.xlu1 %3239 }
 0xe9b   : > { %v6541_v6 = vpop.permute.xlu0 %3202 }
 0xe9c   : > { %v3204_v63 = vsel %vm1338_vm0, %v3201_v49, %v6541_v6 }
 0xe9f   : > { %v3242_v27 = vpop.permute.xlu0 %3241 }
 0xea0   : > { %v5126_v16 = vpop.eup %5125  ;;  %v3243_v42 = vsel %vm1379_vm1, %v3240_v43, %v3242_v27 }
 0xea1   : > { %v1845_v17 = vmul.f32 %v5126_v16, %v1839_v13 }
 0xea3   : > { %v1859_v22 = vmul.f32 %v1856_v20, %v1845_v17  ;;  %v3279_v9 = vpop.permute.xlu0 %3278 }
 0xea5   : > { %v1873_v25 = vadd.f32 %v1870_v23, %v1859_v22 }
 0xea7   : > { %v1877_v26 = vmul.f32 0.25, %v1873_v25  ;;  %vm1875_vm14 = vcmp.gt.f32.partialorder %v1873_v25, 0.0  ;;  %v3318_v18 = vpop.permute.xlu0 %3317 }
 0xea9   : > { %v1879_v29 = vsel %vm1875_vm14, %v1873_v25, %v1877_v26 }
 0xeaa   : > { %3645 = vrot.lane.b32.xlu1 %v1879_v29, %s6954_s1 }
 0xeab   : > { %v3371_v11 = vpop.permute.xlu0 %3370 }
 0xeae   : > { %3280 = vrot.lane.b32.xlu1 %v3275_v28, %s6975_s24 }
 0xeaf   : > { %v6547_v35 = vpop.permute.xlu0 %3655 }
 0xeb2   : > { %3319 = vrot.lane.b32.xlu1 %v3314_v41, %s6949_s22 }
 0xeb3   : > { %v3410_v40 = vpop.permute.xlu0 %3409 }
 0xeb6   : > { %3372 = vrot.lane.b32.xlu1 %v3367_v30, %s6960_s8 }
 0xeb7   : > { %v3449_v53 = vpop.permute.xlu0 %3448 }
 0xeba   : > { %3670 = vrot.lane.b32.xlu1 %v3668_v12, %s6955_s11  ;;  %s1277_s11 = scalar_lea.vmem %s5727_s19, %s4615_s2 }
 0xebb   : > { %v3686_v17 = vpop.permute.xlu0 %3685 }
 0xebe   : > { %3411 = vrot.lane.b32.xlu1 %v3406_v15, %s6976_s26 }
 0xebf   : > { %v3488_v28 = vpop.permute.xlu0 %3487 }
 0xec2   : > { %3450 = vrot.lane.b32.xlu1 %v3445_v31, %s6977_s28 }
 0xec6   : > { %3700 = vrot.lane.b32.xlu1 %v3698_v21, %s6957_s3  ;;  %s6982_s3 = sld [smem:[#allocation52_spill]] }
 0xeca   : > { %3489 = vrot.lane.b32.xlu1 %v4633_v46, %s6978_s29  ;;  %v3723_v46 = vpop.permute.xlu0 %3722 }
 0xece   : > { %3737 = vrot.lane.b32.xlu1 %v3735_v3, %s6959_s5  ;;  %s6979_s5 = sld [smem:[#allocation41_spill]] }
 0xed2   : > { %3767 = vrot.lane.b32.xlu1 %v4636_v0, %s6961_s10 }
 0xf1c   : > { %v3646_v10 = vpop.permute.xlu1 %3645 }
 0xf20   : > { %v6543_v48 = vpop.permute.xlu1 %3280 }
 0xf21   : > { %v3282_v52 = vsel %vm1420_vm2, %v3279_v9, %v6543_v48 }
 0xf24   : > { %v6545_v34 = vpop.permute.xlu1 %3319 }
 0xf25   : > { %v3321_v57 = vsel %vm1461_vm3, %v3318_v18, %v6545_v34 }
 0xf28   : > { %v6556_v36 = vpop.permute.xlu1 %3372 }
 0xf29   : > { %v3374_v60 = vsel %vm1478_vm5, %v3371_v11, %v6556_v36 }
 0xf2c   : > { %v3671_v51 = vpop.permute.xlu1 %3670 }
 0xf30   : > { %v3412_v4 = vpop.permute.xlu1 %3411 }
 0xf31   : > { %v3413_v13 = vsel %vm1437_vm4, %v3410_v40, %v3412_v4 }
 0xf34   : > { %v3451_v16 = vpop.permute.xlu1 %3450 }
 0xf35   : > { %v3452_v23 = vsel %vm1396_vm6, %v3449_v53, %v3451_v16 }
 0xf38   : > { %v3701_v25 = vpop.permute.xlu1 %3700 }
 0xf3c   : > { %v3490_v12 = vpop.permute.xlu1 %3489 }
 0xf3d   : > { %v3491_v21 = vsel %vm1355_vm7, %v3488_v28, %v3490_v12 }
 0xf40   : > { %v3738_v3 = vpop.permute.xlu1 %3737 }
 0xf48   : > { %v6549_v24 = vpop.f32.mrb[12].mxu0 }
 0xf49   : > { %3183 = vst [vmem:[#allocation2] sm:$0xff] %v6549_v24  ;;  %v6554_v14 = vpop.f32.mrb[13].mxu0  ;;  %v3378_v37 = vmul.f32 %v3371_v11, %v6549_v24  ;;  %v3209_v38 = vmul.f32 %v3204_v63, %v6549_v24  ;;  %v3417_v45 = vmul.f32 %v3410_v40, %v6549_v24  ;;  %v3248_v44 = vmul.f32 %v3243_v42, %v6549_v24 }
 0xf4a   : > { %3643 = vst.msk [vmem:[#allocation2] sm:$0xff] %vm1815_vm10, %v1879_v29  ;;  %v6572_v50 = vmul.f32 %v3242_v27, %v6554_v14  ;;  %v6575_v62 = vmul.f32 %v3348_v7, %v6549_v24  ;;  %v6578_v8 = vmul.f32 %v3352_v39, %v6554_v14  ;;  %v3456_v54 = vmul.f32 %v3449_v53, %v6549_v24 }
 0xf4b   : > { %3648 = vst.msk [vmem:[#allocation2] sm:$0xff] %vm1895_vm12, %v3646_v10  ;;  %3384 = vrot.lane.b32.xlu0 %v3378_v37, %s6949_s22  ;;  %3216 = vrot.lane.b32.xlu1 %v3209_v38, %s6978_s29  ;;  %v3287_v56 = vmul.f32 %v3282_v52, %v6549_v24  ;;  %v3208_v47 = vmul.f32 %v3201_v49, %v6554_v14 }
 0xf4c   : > { %3355 = vst [vmem:[#allocation3 + $0x40] sm:$0xff] %v6575_v62  ;;  %v3326_v59 = vmul.f32 %v3321_v57, %v6549_v24  ;;  %v3247_v61 = vmul.f32 %v3240_v43, %v6554_v14  ;;  %v3379_v33 = vmul.f32 %v3374_v60, %v6554_v14  ;;  %v3286_v20 = vmul.f32 %v3279_v9, %v6554_v14  ;;  %v3753_v43 = vpop.permute.xlu0 %3752 }
 0xf4d   : > { %v3418_v22 = vmul.f32 %v3413_v13, %v6554_v14  ;;  %v3325_v26 = vmul.f32 %v3318_v18, %v6554_v14  ;;  %v3457_v29 = vmul.f32 %v3452_v23, %v6554_v14  ;;  %v3495_v41 = vmul.f32 %v3488_v28, %v6549_v24  ;;  %v3768_v18 = vpop.permute.xlu1 %3767 }
 0xf4e   : > { %v3496_v27 = vmul.f32 %v3491_v21, %v6554_v14  ;;  %v3288_v63 = vmul.f32 %v6543_v48, %v6554_v14  ;;  %v3327_v37 = vmul.f32 %v6545_v34, %v6554_v14  ;;  %v3380_v38 = vmul.f32 %v6556_v36, %v6549_v24  ;;  %v3951_v34 = vld [vmem:[%s6979_s5] sm:$0xff] }
 0xf4f   : > { %3423 = vrot.lane.b32.xlu0 %v3417_v45, %s6975_s24  ;;  %3255 = vrot.lane.b32.xlu1 %v3248_v44, %s6977_s28  ;;  %v3458_v7 = vmul.f32 %v3451_v16, %v6549_v24  ;;  %v3497_v48 = vmul.f32 %v3490_v12, %v6549_v24 }
 0xf52   : > { %v3679_v55 = vld [vmem:[#allocation2] sm:$0xff] }
 0xf53   : > { %3462 = vrot.lane.b32.xlu0 %v3456_v54, %s6974_s27  ;;  %3294 = vrot.lane.b32.xlu1 %v3287_v56, %s6976_s26  ;;  %v3714_v58 = vmul.f32 %v3713_v32, %v3679_v55  ;;  %v3673_v30 = vmul.f32 %v3679_v55, %v3671_v51  ;;  %v3703_v15 = vmul.f32 %v3701_v25, %v3679_v55 }
 0xf54   : > { %v3658_v31 = vmul.f32 %v3679_v55, %v6547_v35  ;;  %v3688_v0 = vmul.f32 %v3686_v17, %v3679_v55  ;;  %v3725_v49 = vmul.f32 %v3723_v46, %v3679_v55  ;;  %v3740_v9 = vmul.f32 %v3738_v3, %v3679_v55 }
 0xf55   : > { %3715 = vst.msk [vmem:[#allocation3 + $0x40] sm:$0xff] %vm1815_vm10, %v3714_v58  ;;  %v3755_v10 = vmul.f32 %v3753_v43, %v3679_v55  ;;  %v3770_v11 = vmul.f32 %v3768_v18, %v3679_v55  ;;  %v3210_v35 = vmul.f32 %v6541_v6, %v6554_v14  ;;  %v3419_v6 = vmul.f32 %v3412_v4, %v6549_v24 }
 0xf57   : > { %3214 = vrot.lane.b32.xlu0 %v3208_v47, %s6978_s29  ;;  %3333 = vrot.lane.b32.xlu1 %v3326_v59, %s6960_s8 }
 0xf5b   : > { %3253 = vrot.lane.b32.xlu0 %v3247_v61, %s6977_s28  ;;  %3386 = vrot.lane.b32.xlu1 %v3379_v33, %s6949_s22 }
 0xf5c   : > { %v3780_v46 = vld [vmem:[#allocation3 + $0x40] sm:$0xff] }
 0xf5f   : > { %3292 = vrot.lane.b32.xlu0 %v3286_v20, %s6976_s26  ;;  %3425 = vrot.lane.b32.xlu1 %v3418_v22, %s6975_s24 }
 0xf63   : > { %3331 = vrot.lane.b32.xlu0 %v3325_v26, %s6960_s8  ;;  %3464 = vrot.lane.b32.xlu1 %v3457_v29, %s6974_s27 }
 0xf67   : > { %3501 = vrot.lane.b32.xlu0 %v3495_v41, %s6973_s25  ;;  %3675 = vrot.lane.b32.xlu1 %v3673_v30, %s6964_s15 }
 0xf6b   : > { %3660 = vrot.lane.b32.xlu0 %v3658_v31, %s6963_s14  ;;  %3705 = vrot.lane.b32.xlu1 %v3703_v15, %s6966_s17  ;;  %s6980_s17 = sld [smem:[#allocation42_spill]]  ;;  %s6984_s14 = sld [smem:[#allocation28_spill]] }
 0xf6f   : > { %3690 = vrot.lane.b32.xlu0 %v3688_v0, %s6965_s16  ;;  %3503 = vrot.lane.b32.xlu1 %v3496_v27, %s6973_s25 }
 0xf73   : > { %3727 = vrot.lane.b32.xlu0 %v3725_v49, %s6949_s22  ;;  %3742 = vrot.lane.b32.xlu1 %v3740_v9, %s6967_s18 }
 0xf77   : > { %3757 = vrot.lane.b32.xlu0 %v3755_v10, %s6969_s21  ;;  %3772 = vrot.lane.b32.xlu1 %v3770_v11, %s6968_s20  ;;  %s6981_s21 = sld [smem:[#allocation51_spill]]  ;;  %s1273_s20 = scalar_lea.vmem %s6984_s14, %s4614_s12 }
 0xf7b   : > { %3218 = vrot.lane.b32.xlu0 %v3210_v35, %s6978_s29  ;;  %3257 = vrot.lane.b32.xlu1 %v6572_v50, %s6977_s28 }
 0xf7f   : > { %3296 = vrot.lane.b32.xlu0 %v3288_v63, %s6976_s26  ;;  %3335 = vrot.lane.b32.xlu1 %v3327_v37, %s6960_s8  ;;  %s6983_s8 = sld [smem:[#allocation54_spill]] }
 0xf83   : > { %3388 = vrot.lane.b32.xlu0 %v3380_v38, %s6949_s22  ;;  %3427 = vrot.lane.b32.xlu1 %v3419_v6, %s6975_s24  ;;  %s6985_s24 = sld [smem:[#allocation56_spill]] }
 0xf87   : > { %3466 = vrot.lane.b32.xlu0 %v3458_v7, %s6974_s27  ;;  %3505 = vrot.lane.b32.xlu1 %v3497_v48, %s6973_s25 }
 0xf8b   : > { %3955 = vperm.xlu1 %5112, %v3951_v34   ;;  %v3790_v34 = vld [vmem:[#allocation10] sm:$0xff] }
 0xfbd   : > { %v3385_v14 = vpop.permute.xlu0 %3384  ;;  %v3217_v39 = vpop.permute.xlu1 %3216 }
 0xfc1   : > { %v3424_v40 = vpop.permute.xlu0 %3423  ;;  %v3256_v36 = vpop.permute.xlu1 %3255 }
 0xfc5   : > { %v3463_v42 = vpop.permute.xlu0 %3462  ;;  %v6649_v45 = vpop.permute.xlu1 %3294 }
 0xfc9   : > { %v3215_v44 = vpop.permute.xlu0 %3214  ;;  %v6651_v50 = vpop.permute.xlu1 %3333 }
 0xfca   : > { %v6654_v51 = vsel %vm1355_vm7, %v3215_v44, %v3217_v39 }
 0xfcb   : > { %3224 = vst [vmem:[#allocation3] sm:$0xff] %v6654_v51 }
 0xfcd   : > { %v3254_v24 = vpop.permute.xlu0 %3253  ;;  %v6657_v32 = vpop.permute.xlu1 %3386 }
 0xfce   : > { %v6660_v52 = vsel %vm1396_vm6, %v3254_v24, %v3256_v36  ;;  %v6664_v53 = vsel %vm1461_vm3, %v3385_v14, %v6657_v32  ;;  %v3791_v14 = vld [vmem:[#allocation10 + $0x8] sm:$0xff] }
 0xfcf   : > { %3263 = vst [vmem:[#allocation3 + $0x10] sm:$0xff] %v6660_v52  ;;  %3394 = vst [vmem:[#allocation3 + $0x50] sm:$0xff] %v6664_v53  ;;  %v3531_v43 = vpack.c.bf16 %v6660_v52, %v6654_v51  ;;  %v3535_v24 = vpack.c.bf16 %v6664_v53, %v6575_v62  ;;  %v3634_v62 = vld [vmem:[%s6946_s23 + $0x8] sm:$0xff] }
 0xfd1   : > { %v3293_v54 = vpop.permute.xlu0 %3292  ;;  %v6668_v55 = vpop.permute.xlu1 %3425 }
 0xfd2   : > { %v6672_v56 = vsel %vm1437_vm4, %v3293_v54, %v6649_v45  ;;  %v6676_v57 = vsel %vm1420_vm2, %v3424_v40, %v6668_v55 }
 0xfd3   : > { %3302 = vst [vmem:[#allocation3 + $0x20] sm:$0xff] %v6672_v56  ;;  %3433 = vst [vmem:[#allocation3 + $0x60] sm:$0xff] %v6676_v57 }
 0xfd5   : > { %v3332_v58 = vpop.permute.xlu0 %3331  ;;  %v6680_v4 = vpop.permute.xlu1 %3464 }
 0xfd6   : > { %v6684_v47 = vsel %vm1478_vm5, %v3332_v58, %v6651_v50  ;;  %v6688_v59 = vsel %vm1379_vm1, %v3463_v42, %v6680_v4  ;;  %v3633_v58 = vld [vmem:[%s6946_s23] sm:$0xff] }
 0xfd7   : > { %3341 = vst [vmem:[#allocation3 + $0x30] sm:$0xff] %v6684_v47  ;;  %3472 = vst [vmem:[#allocation3 + $0x70] sm:$0xff] %v6688_v59 }
 0xfd9   : > { %v3502_v60 = vpop.permute.xlu0 %3501  ;;  %v3676_v61 = vpop.permute.xlu1 %3675 }
 0xfda   : > { %3678 = vst.msk [vmem:[#allocation3 + $0x10] sm:$0xff] %vm1815_vm10, %v3676_v61  ;;  %v3635_v61 = vld [vmem:[%s6946_s23 + $0x10] sm:$0xff] }
 0xfdd   : > { %v3661_v33 = vpop.permute.xlu0 %3660  ;;  %v3706_v13 = vpop.permute.xlu1 %3705 }
 0xfde   : > { %3663 = vst.msk [vmem:[#allocation3] sm:$0xff] %vm1815_vm10, %v3661_v33  ;;  %3708 = vst.msk [vmem:[#allocation3 + $0x30] sm:$0xff] %vm1815_vm10, %v3706_v13 }
 0xfe1   : > { %v3691_v16 = vpop.permute.xlu0 %3690  ;;  %v6695_v17 = vpop.permute.xlu1 %3503  ;;  %v3777_v26 = vld [vmem:[#allocation3 + $0x10] sm:$0xff] }
 0xfe2   : > { %3693 = vst.msk [vmem:[#allocation3 + $0x20] sm:$0xff] %vm1815_vm10, %v3691_v16  ;;  %v6700_v20 = vsel %vm1338_vm0, %v3502_v60, %v6695_v17  ;;  %v4900_v60 = vpack.c.bf16 %v3634_v62, %v3633_v58  ;;  %v3637_v16 = vld [vmem:[%s6946_s23 + $0x20] sm:$0xff] }
 0xfe3   : > { %3511 = vst [vmem:[#allocation3 + $0x80] sm:$0xff] %v6700_v20 }
 0xfe5   : > { %v3728_v22 = vpop.permute.xlu0 %3727  ;;  %v3743_v23 = vpop.permute.xlu1 %3742  ;;  %v3776_v25 = vld [vmem:[#allocation3] sm:$0xff]  ;;  %v3779_v12 = vld [vmem:[#allocation3 + $0x30] sm:$0xff] }
 0xfe6   : > { %3730 = vst.msk [vmem:[#allocation3 + $0x50] sm:$0xff] %vm1815_vm10, %v3728_v22  ;;  %3745 = vst.msk [vmem:[#allocation3 + $0x60] sm:$0xff] %vm1815_vm10, %v3743_v23  ;;  %v3785_v29 = vpack.c.bf16 %v3777_v26, %v3776_v25  ;;  %v3639_v22 = vld [vmem:[%s6946_s23 + $0x30] sm:$0xff]  ;;  %v3640_v23 = vld [vmem:[%s6946_s23 + $0x38] sm:$0xff] }
 0xfe7   : > { %v4912_v25 = vpack.c.bf16 %v3640_v23, %v3639_v22  ;;  %v3611_v22 = vld [vmem:[%s6981_s21] sm:$0xff]  ;;  %v5534_v23 = vmov 0.0|0.0  }
 0xfe8   : > { %4788 = vmatpush3.bf16.msra.mxu1 %v3785_v29 }
 0xfe9   : > { %v3758_v28 = vpop.permute.xlu0 %3757  ;;  %v3773_v41 = vpop.permute.xlu1 %3772  ;;  %4789 = vmatprep.subr.bf16.mxu1 %v5513_v19  ;;  %v3778_v30 = vld [vmem:[#allocation3 + $0x20] sm:$0xff] }
 0xfea   : > { %3760 = vst.msk [vmem:[#allocation3 + $0x70] sm:$0xff] %vm1815_vm10, %v3758_v28  ;;  %3775 = vst.msk [vmem:[#allocation3 + $0x80] sm:$0xff] %vm1815_vm10, %v3773_v41  ;;  %v3786_v15 = vpack.c.bf16 %v3779_v12, %v3778_v30 }
 0xfec   : > { %4790 = vmatpush3.bf16.msra.mxu1 %v3786_v15 }
 0xfed   : > { %v3219_v31 = vpop.permute.xlu0 %3218  ;;  %v3258_v21 = vpop.permute.xlu1 %3257  ;;  %4791 = vmatprep.subr.bf16.mxu1 %v5513_v19  ;;  %v3781_v3 = vld [vmem:[#allocation3 + $0x50] sm:$0xff]  ;;  %v3782_v11 = vld [vmem:[#allocation3 + $0x60] sm:$0xff] }
 0xfee   : > { %v3221_v0 = vsel %vm1355_vm7, %v3217_v39, %v3219_v31  ;;  %v3260_v27 = vsel %vm1396_vm6, %v3256_v36, %v3258_v21  ;;  %v3787_v49 = vpack.c.bf16 %v3781_v3, %v3780_v46  ;;  %v3533_v39 = vpack.c.bf16 %v6684_v47, %v6672_v56  ;;  %v3541_v47 = vld [vmem:[#allocation15] sm:$0xff] }
 0xfef   : > { %v3532_v9 = vpack.c.bf16 %v3260_v27, %v3221_v0  ;;  %v3542_v33 = vpack.c.bf16 %v3541_v47, %v3541_v47 }
 0xff0   : > { %4792 = vmatpush3.bf16.msra.mxu1 %v3787_v49 }
 0xff1   : > { %v3297_v18 = vpop.permute.xlu0 %3296  ;;  %v3336_v10 = vpop.permute.xlu1 %3335  ;;  %4793 = vmatprep.subr.bf16.mxu1 %v5513_v19  ;;  %v3783_v35 = vld [vmem:[#allocation3 + $0x70] sm:$0xff]  ;;  %v3784_v63 = vld [vmem:[#allocation3 + $0x80] sm:$0xff]  ;;  %3552 = vmatprep.subr.bf16.mxu0 %v3532_v9 }
 0xff2   : > { %v3299_v37 = vsel %vm1437_vm4, %v6649_v45, %v3297_v18  ;;  %v3338_v38 = vsel %vm1478_vm5, %v6651_v50, %v3336_v10  ;;  %v3788_v6 = vpack.c.bf16 %v3783_v35, %v3782_v11  ;;  %3553 = vmatpush1.bf16.msra.mxu0 %v3531_v43  ;;  %v3789_v7 = vpack.c.bf16 %v3784_v63, %v3784_v63  ;;  %v3965_v63 = vld [vmem:[%s6980_s17] sm:$0xff] }
 0xff3   : > { %v3534_v48 = vpack.c.bf16 %v3338_v38, %v3299_v37  ;;  %v3792_v50 = vpack.c.bf16 %v3791_v14, %v3790_v34  ;;  %v3966_v37 = vld [vmem:[%s6980_s17 + $0x8] sm:$0xff]  ;;  %vm4164_vm4 = vcmask 64512   ;;  %vm4082_vm5 = vcmask 31744  }
 0xff4   : > { %4794 = vmatpush3.bf16.msra.mxu1 %v3788_v6  ;;  %v3797_v44 = vsel %vm1690_vm8, %v3789_v7, 0  ;;  %v3952_v38 = vld [vmem:[%s6979_s5 + $0x8] sm:$0xff] }
 0xff5   : > { %v3389_v40 = vpop.permute.xlu0 %3388  ;;  %v3428_v36 = vpop.permute.xlu1 %3427  ;;  %4795 = vmatprep.subr.bf16.mxu1 %v5513_v19  ;;  %3554 = vmatprep.subr.bf16.mxu0 %v3534_v48 }
 0xff6   : > { %v3391_v42 = vsel %vm1461_vm3, %v6657_v32, %v3389_v40  ;;  %v3430_v45 = vsel %vm1420_vm2, %v6668_v55, %v3428_v36  ;;  %3555 = vmatpush1.bf16.msra.mxu0 %v3533_v39 }
 0xff7   : > { %v3536_v51 = vpack.c.bf16 %v3391_v42, %v6578_v8  ;;  %v3537_v8 = vpack.c.bf16 %v6688_v59, %v6676_v57  ;;  %v3636_v57 = vld [vmem:[%s6946_s23 + $0x18] sm:$0xff] }
 0xff8   : > { %4796 = vmatpush3.bf16.msra.mxu1 %v3797_v44  ;;  %v4904_v13 = vpack.c.bf16 %v3636_v57, %v3635_v61 }
 0xff9   : > { %v3467_v52 = vpop.permute.xlu0 %3466  ;;  %v3506_v54 = vpop.permute.xlu1 %3505  ;;  %3556 = vmatprep.subr.bf16.mxu0 %v3536_v51 }
 0xffa   : > { %v3469_v32 = vsel %vm1379_vm1, %v6680_v4, %v3467_v52  ;;  %v3508_v55 = vsel %vm1338_vm0, %v6695_v17, %v3506_v54  ;;  %3557 = vmatpush1.bf16.msra.mxu0 %v3535_v24  ;;  %v3539_v4 = vpack.c.bf16 %v6700_v20, %v6700_v20  ;;  %v3638_v17 = vld [vmem:[%s6946_s23 + $0x28] sm:$0xff] }
 0xffb   : > { %4798 = vmatmul.mubr.msk.bf16.vlgmr.msra.gmra.mrb[12].mxu1 %vm1686_vm9, %v3792_v50  ;;  %v3538_v56 = vpack.c.bf16 %v3469_v32, %v3430_v45  ;;  %v3540_v53 = vpack.c.bf16 %v3508_v55, %v3508_v55  ;;  %v4908_v20 = vpack.c.bf16 %v3638_v17, %v3637_v16 }
 0xffc   : > { %4232 = vmatprep.mubr.f32.mxu1 %v5513_v19  ;;  %v3547_v59 = vsel %vm1690_vm8, %v3539_v4, 0 }
 0xffd   : > { %3558 = vmatprep.subr.bf16.mxu0 %v3538_v56 }
 0xffe   : > { %3559 = vmatpush1.bf16.msra.mxu0 %v3537_v8 }
 0xfff   : > { %4634 = vmatprep.subr.msk.bf16.mxu0 %vm1690_vm8, %v3540_v53 }
0x1002   : > { %3561 = vmatpush1.bf16.msra.mxu0 %v3547_v59 }
0x1003   : > { %4901 = vmatprep.subr.bf16.mxu0 %v4900_v60 }
0x1005   : > { %4635 = vmatmul.mubr.msk.bf16.vlgmr.msra.gmra.mrb[16].mxu0 %vm1686_vm9, %v3542_v33 }
0x1006   : > { %4903 = vmatpush3.bf16.msra.mxu0 %v4900_v60 }
0x1007   : > { %4905 = vmatprep.subr.bf16.mxu0 %v4904_v13 }
0x100a   : > { %4907 = vmatpush3.bf16.msra.mxu0 %v4904_v13  ;;  %v3956_v6 = vpop.permute.xlu1 %3955 }
0x100b   : > { %4909 = vmatprep.subr.bf16.mxu0 %v4908_v20 }
0x100e   : > { %4911 = vmatpush3.bf16.msra.mxu0 %v4908_v20 }
0x100f   : > { %4913 = vmatprep.subr.bf16.mxu0 %v4912_v25 }
0x1012   : > { %4915 = vmatpush3.bf16.msra.mxu0 %v4912_v25  ;;  %v3619_v25 = vld [vmem:[%s6982_s3] sm:$0xff] }
0x1013   : > { %4916 = vmatprep.subr.bf16.mxu0 %v5534_v23  ;;  %v4249_v23 = vld [vmem:[#allocation19] sm:$0xff] }
0x10ce   : > { %v3833_v26 = vpop.f32.mrb[12].mxu1 }
0x10cf   : > { %v4799_v29 = vpop.f32.mrb[13].mxu1  ;;  %4817 = vmatprep.mubr.msk.f32.mxu0 %vm1815_vm10, %v3833_v26  ;;  %v4250_v26 = vld [vmem:[%s5714_s6] sm:$0xff] }
0x10d0   : > { %v3836_v28 = vpop.f32.mrb[14].mxu1  ;;  %v4352_v29 = vld [vmem:[#allocation4] sm:$0x1] }
0x10d1   : > { %v4800_v41 = vpop.f32.mrb[15].mxu1  ;;  %4818 = vmatmul.mubr.msk.f32.vlgmr.msra.gmra.mrb[14].mxu0 %vm1815_vm10, %v3836_v28 }
0x10d2   : > { %4824 = vmatprep.mubr.msk.f32.mxu0 %vm5521_vm13, %v5513_v19 }
0x10d8   : > { %v6754_v30 = vpop.f32.mrb[16].mxu0 }
0x10d9   : > { %v6756_v12 = vpop.f32.mrb[17].mxu0  ;;  %v3597_v46 = vmul.f32 %v6754_v30, %v6754_v30 }
0x10da   : > { %v6760_v15 = vadd.f32 %v6756_v12, %v6754_v30  ;;  %v3590_v31 = vpop.f32.mrb[18].mxu0  ;;  %v3598_v3 = vmul.f32 %v6756_v12, %v6756_v12 }
0x10db   : > { %v3591_v21 = vpop.f32.mrb[19].mxu0 }
0x10dc   : > { %v3599_v0 = vadd.f32 %v3598_v3, %v3597_v46 }
0x11a4   : > { %v4819_v27 = vpop.f32.mrb[14].mxu0 }
0x11a5   : > { %v3912_v49 = vpop.f32.mrb[15].mxu0  ;;  %v3924_v9 = vsel %vm1396_vm6, %v4819_v27, 0.0  ;;  %v3930_v43 = vmul.f32 %v4819_v27, %v4819_v27 }
0x11a6   : > { %3925 = vadd.xlane.f32.xlu1 %v3924_v9  ;;  %v3921_v18 = vsel %vm1396_vm6, %v3912_v49, 0.0  ;;  %v3929_v10 = vmul.f32 %v3912_v49, %v3912_v49 }
0x11a7   : > { %3922 = vadd.xlane.f32.xlu0 %v3921_v18  ;;  %v3934_v11 = vsel %vm1396_vm6, %v3930_v43, 0.0 }
0x11a8   : > { %v3931_v35 = vsel %vm1396_vm6, %v3929_v10, 0.0 }
0x11ab   : > { %3935 = vadd.xlane.f32.xlu0 %v3934_v11 }
0x11af   : > { %3932 = vadd.xlane.f32.xlu0 %v3931_v35 }
0x11b7   : > { %3969 = vperm.xlu1 %5112, %v3965_v63  }
0x11bb   : > { %3974 = vperm.xlu1 %5112, %v3966_v37  }
0x11c5   : > { %3960 = vperm.xlu0 %5111, %v3952_v38  }
0x1233   : > { %v3926_v7 = vpop.xlane.xlu1 %3925 }
0x1234   : > { %v3923_v48 = vpop.xlane.xlu0 %3922  ;;  %v3928_v34 = vmul.f32 0.0625, %v3926_v7 }
0x1235   : > { %v3927_v40 = vmul.f32 0.0625, %v3923_v48 }
0x1236   : > { %v3940_v39 = vmul.f32 %v3928_v34, %v3928_v34  ;;  %v3944_v32 = vsub.f32 %v4819_v27, %v3928_v34 }
0x1237   : > { %v3939_v44 = vmul.f32 %v3927_v40, %v3927_v40  ;;  %v3970_v54 = vpop.permute.xlu1 %3969  ;;  %v3943_v58 = vsub.f32 %v3912_v49, %v3927_v40 }
0x1238   : > { %v3936_v14 = vpop.xlane.xlu0 %3935 }
0x1239   : > { %v3938_v36 = vmul.f32 0.0625, %v3936_v14 }
0x123b   : > { %v3942_v42 = vsub.f32 %v3938_v36, %v3940_v39  ;;  %v3975_v4 = vpop.permute.xlu1 %3974 }
0x123c   : > { %v3933_v45 = vpop.xlane.xlu0 %3932 }
0x123d   : > { %v3946_v50 = vadd.f32 1e-05, %v3942_v42  ;;  %v3937_v51 = vmul.f32 0.0625, %v3933_v45  ;;  %v3994_v42 = vld [vmem:[%s6983_s8] sm:$0xff] }
0x123f   : > { %5127 = vrsqrt.f32 %v3946_v50  ;;  %v3941_v24 = vsub.f32 %v3937_v51, %v3939_v44 }
0x1241   : > { %v3945_v52 = vadd.f32 1e-05, %v3941_v24 }
0x1243   : > { %5129 = vrsqrt.f32 %v3945_v52  ;;  %v4071_v52 = vld [vmem:[%s1273_s20] sm:$0xf] }
0x1244   : > { %v3961_v8 = vpop.permute.xlu0 %3960 }
0x1249   : > { %v5128_v55 = vpop.eup %5127 }
0x124a   : > { %v3950_v56 = vmul.f32 %v5128_v55, %v3944_v32 }
0x124c   : > { %v3964_v62 = vmul.f32 %v3961_v8, %v3950_v56 }
0x124d   : > { %v5130_v53 = vpop.eup %5129 }
0x124e   : > { %v3978_v47 = vadd.f32 %v3975_v4, %v3964_v62  ;;  %v3949_v60 = vmul.f32 %v5130_v53, %v3943_v58  ;;  %v4081_v58 = vld [vmem:[%s6985_s24] sm:$0xff] }
0x1250   : > { %v3982_v61 = vmul.f32 0.25, %v3978_v47  ;;  %vm3980_vm0 = vcmp.gt.f32.partialorder %v3978_v47, 0.0  ;;  %v3963_v57 = vmul.f32 %v3956_v6, %v3949_v60  ;;  %v4239_v60 = vld [vmem:[%s6986_s4] sm:$0xff] }
0x1252   : > { %v3984_v59 = vsel %vm3980_vm0, %v3978_v47, %v3982_v61  ;;  %v3977_v33 = vadd.f32 %v3970_v54, %v3963_v57  ;;  %v4073_v54 = vrot.slane %v4071_v52, 4  ;;  %v4332_v61 = vld [vmem:[%s5719_s9] sm:$0xff] }
0x1253   : > { %v3988_v13 = vsel %vm1396_vm6, %v3984_v59, 0.0 }
0x1254   : > { %3989 = vadd.xlane.f32.xlu1 %v3988_v13  ;;  %vm3979_vm1 = vcmp.gt.f32.partialorder %v3977_v33, 0.0  ;;  %v3981_v16 = vmul.f32 0.25, %v3977_v33 }
0x1256   : > { %v3983_v17 = vsel %vm3979_vm1, %v3977_v33, %v3981_v16 }
0x1257   : > { %v3985_v20 = vsel %vm1396_vm6, %v3983_v17, 0.0 }
0x1258   : > { %3986 = vadd.xlane.f32.xlu0 %v3985_v20 }
0x125c   : > { %3594 = vadd.xlane.f32.xlu0 %v6760_v15  ;;  %v3993_v15 = vld [vmem:[#allocation16] sm:$0xff] }
0x1260   : > { %3600 = vadd.xlane.f32.xlu0 %v3599_v0 }
0x1265   : > { %3614 = vperm.xlu1 %5112, %v3611_v22  }
0x1276   : > { %3622 = vperm.xlu0 %5111, %v3619_v25  }
0x127a   : > { %4253 = vperm.xlu0 %5111, %v4250_v26  }
0x127e   : > { %4355 = vperm.xlu0 %5111, %v4352_v29  }
0x12e1   : > { %v3990_v28 = vpop.xlane.xlu1 %3989 }
0x12e2   : > { %v3992_v31 = vmul.f32 0.0625, %v3990_v28 }
0x12e5   : > { %v3987_v41 = vpop.xlane.xlu0 %3986  ;;  %v3615_v38 = vpop.permute.xlu1 %3614 }
0x12e6   : > { %v3991_v21 = vmul.f32 0.0625, %v3987_v41 }
0x12e8   : > { %v4917_v46 = vpack.c.bf16 %v3992_v31, %v3991_v21 }
0x12e9   : > { %v3595_v3 = vpop.xlane.xlu0 %3594 }
0x12ea   : > { %v3596_v27 = vmul.f32 0.00390625, %v3595_v3  ;;  %4918 = vmatpush3.bf16.msra.mxu0 %v4917_v46 }
0x12eb   : > { %4827 = vmatprep.subr.mxu0 %v5513_v19 }
0x12ec   : > { %v3603_v49 = vmul.f32 %v3596_v27, %v3596_v27  ;;  %v3605_v10 = vsub.f32 %v6754_v30, %v3596_v27  ;;  %v3606_v11 = vsub.f32 %v6756_v12, %v3596_v27  ;;  %v4080_v12 = vld [vmem:[#allocation18] sm:$0xff] }
0x12ed   : > { %v3601_v0 = vpop.xlane.xlu0 %3600  ;;  %4825 = vmatmul.mubr.msk.f32.vlgmr.msra.gmra.mrb[20].mxu0 %vm1396_vm6, %v3993_v15  ;;  %vm4384_vm6 = vcmp.lt.s32.totalorder %v1324_v1, 256 }
0x12ee   : > { %v3602_v9 = vmul.f32 0.00390625, %v3601_v0  ;;  %4829 = vmatprep.mubr.msk.f32.mxu0 %vm5521_vm13, %v5513_v19 }
0x12f0   : > { %v3604_v43 = vsub.f32 %v3602_v9, %v3603_v49 }
0x12f2   : > { %v3607_v18 = vadd.f32 1e-05, %v3604_v43 }
0x12f4   : > { %5131 = vrsqrt.f32 %v3607_v18  ;;  %v5535_v18 = vmov 1966171168  }
0x12f5   : > { %v3623_v48 = vpop.permute.xlu0 %3622 }
0x12fe   : > { %v5132_v35 = vpop.eup %5131 }
0x12ff   : > { %v3609_v63 = vmul.f32 %v5132_v35, %v3605_v10  ;;  %v3610_v37 = vmul.f32 %v5132_v35, %v3606_v11  ;;  %v4368_v10 = vunpack.c.l.s4 %v5535_v18 }
0x1301   : > { %v3617_v6 = vmul.f32 %v3615_v38, %v3609_v63  ;;  %v3618_v7 = vmul.f32 %v3615_v38, %v3610_v37 }
0x1303   : > { %v3625_v34 = vadd.f32 %v3623_v48, %v3617_v6  ;;  %v3626_v14 = vadd.f32 %v3623_v48, %v3618_v7  ;;  %v4369_v6 = vunpack.c.0.s8 %v4368_v10 }
0x1305   : > { %v3629_v39 = vmul.f32 0.25, %v3625_v34  ;;  %vm3628_vm2 = vcmp.gt.f32.partialorder %v3626_v14, 0.0  ;;  %v3630_v40 = vmul.f32 0.25, %v3626_v14  ;;  %vm3627_vm3 = vcmp.gt.f32.partialorder %v3625_v34, 0.0 }
0x1307   : > { %v3632_v36 = vsel %vm3628_vm2, %v3626_v14, %v3630_v40  ;;  %v3631_v30 = vsel %vm3627_vm3, %v3625_v34, %v3629_v39  ;;  %v4372_v40 = vsub.s32 %v4369_v6, %v5925_v2 }
0x1308   : > { %4168 = vmatprep.subr.mxu1 %v3632_v36 }
0x1309   : > { %4169 = vmatpush1.msra.mxu1 %v3631_v30 }
0x130a   : > { %4643 = vmatmul.mubr.msk.f32.vlgmr.msra.gmra.mrb[16].mxu1 %vm4164_vm4, %v4080_v12 }
0x13c0   : > { %v4064_v45 = vpop.f32.mrb[20].mxu0 }
0x13c1   : > { %v4065_v44 = vadd.f32 %v4064_v45, %v3994_v42  ;;  %v4826_v50 = vpop.f32.mrb[21].mxu0 }
0x13c3   : > { %v4068_v51 = vmul.f32 0.5, %v4065_v44 }
0x13c5   : > { %v4069_v24 = vmul.f32 1.442695, %v4068_v51 }
0x13c7   : > { %5133 = vpow2.f32 %v4069_v24 }
0x13d1   : > { %v5134_v32 = vpop.eup %5133 }
0x13d2   : > { %v4075_v55 = vmul.f32 %v5134_v32, %v4073_v54 }
0x13d4   : > { %v4077_v56 = vrot.slane %v4075_v55, 4 }
0x13d6   : > { %v4079_v8 = vadd.f32 %v4077_v56, %v4065_v44 }
0x13d8   : > { %4828 = vmatpush3.msk.msra.mxu0 %vm1690_vm8, %v4079_v8 }
0x13d9   : > { %4830 = vmatmul.mubr.msk.f32.vlgmr.msra.gmra.mrb[22].mxu0 %vm4082_vm5, %v4081_v58 }
0x13da   : > { %4323 = vmatprep.mubr.f32.mxu0 %v5513_v19  ;;  %v4254_v19 = vpop.permute.xlu0 %4253 }
0x13dd   : > { %v4234_v62 = vpop.f32.mrb[16].mxu1 }
0x13de   : > { %v4236_v53 = vpop.f32.mrb[17].mxu1  ;;  %v4356_v35 = vpop.permute.xlu0 %4355 }
0x13df   : > { %v4361_v7 = vrot.slane %v4356_v35, %v5935_v5 }
0x14ac   : > { %v4155_v4 = vpop.f32.mrb[22].mxu0 }
0x14ad   : > { %4161 = vperm.xlu1 %5112, %v4155_v4   ;;  %v4831_v47 = vpop.f32.mrb[23].mxu0 }
0x14b1   : > { %4242 = vperm.xlu1 %5112, %v4239_v60  }
0x14b5   : > { %4335 = vperm.xlu1 %5112, %v4332_v61  }
0x152c   : > { %v4162_v57 = vpop.permute.xlu1 %4161 }
0x152d   : > { %v4235_v59 = vadd.f32 %v4234_v62, %v4162_v57  ;;  %v4237_v33 = vadd.f32 %v4236_v53, %v4162_v57 }
0x1530   : > { %v4243_v13 = vpop.permute.xlu1 %4242 }
0x1531   : > { %v4245_v16 = vadd.f32 %v4243_v13, %v4235_v59  ;;  %v4246_v17 = vadd.f32 %v4243_v13, %v4237_v33 }
0x1533   : > { %v4247_v20 = vmax.f32 %v4245_v16, 0.0  ;;  %v4248_v22 = vmax.f32 %v4246_v17, 0.0 }
0x1534   : > { %v4336_v31 = vpop.permute.xlu1 %4335 }
0x1535   : > { %4259 = vmatprep.subr.mxu0 %v4248_v22 }
0x1536   : > { %4260 = vmatpush1.msra.mxu0 %v4247_v20 }
0x1537   : > { %4644 = vmatmul.mubr.msk.f32.vlgmr.msra.gmra.mrb[24].mxu0 %vm4164_vm4, %v4249_v23 }
0x160a   : > { %v4325_v25 = vpop.f32.mrb[24].mxu0 }
0x160b   : > { %v4326_v26 = vadd.f32 %v4325_v25, %v4254_v19  ;;  %v4327_v29 = vpop.f32.mrb[25].mxu0 }
0x160c   : > { %v4328_v28 = vadd.f32 %v4327_v29, %v4254_v19 }
0x160d   : > { %v4330_v41 = vmax.f32 %v4326_v26, 0.0 }
0x160e   : > { %v4331_v21 = vmax.f32 %v4328_v28, 0.0 }
0x160f   : > { %v4338_v46 = vmul.f32 %v4336_v31, %v4330_v41 }
0x1610   : > { %v4339_v3 = vmul.f32 %v4336_v31, %v4331_v21 }
0x1611   : > { %v4340_v27 = vrot.slane %v4338_v46, 4 }
0x1612   : > { %v4346_v15 = vrot.slane %v4339_v3, 4 }
0x1613   : > { %v4341_v0 = vadd.f32 %v4340_v27, %v4338_v46 }
0x1614   : > { %v4347_v49 = vadd.f32 %v4346_v15, %v4339_v3 }
0x1615   : > { %v4342_v9 = vrot.slane %v4341_v0, 2 }
0x1616   : > { %v4348_v43 = vrot.slane %v4347_v49, 2 }
0x1617   : > { %v4343_v11 = vadd.f32 %v4342_v9, %v4341_v0 }
0x1618   : > { %v4349_v63 = vadd.f32 %v4348_v43, %v4347_v49 }
0x1619   : > { %v4344_v37 = vrot.slane %v4343_v11, 1 }
0x161a   : > { %v4350_v38 = vrot.slane %v4349_v63, 1 }
0x161b   : > { %v4345_v48 = vadd.f32 %v4344_v37, %v4343_v11 }
0x161c   : > { %v4351_v34 = vadd.f32 %v4350_v38, %v4349_v63 }
0x161d   : > { %v4362_v14 = vadd.f32 %v4361_v7, %v4345_v48 }
0x161e   : > { %v4363_v39 = vadd.f32 %v4361_v7, %v4351_v34 }
0x1620   : > { %v4366_v36 = vcombine.low %v4362_v14, %v4363_v39 }
0x1622   : > { %v4373_v30 = vrot.slane %v4366_v36, %v4372_v40 }
0x1624   : > { %v4380_v12 = vrot.slane %v4373_v30, %v4372_v40 }
0x1626   : > { %4386 = vst.msk [vmem:[%s1277_s11] sm:$0x3] %vm4384_vm6, %v4380_v12 }
0x1627 PF: > { %s93_s7 = sadd.s32 1, %s5445_s7  }
0x1628   : > { %p90_p6 = scmp.ge.s32.totalorder %s93_s7, 4  }
0x162a   :  { %92 = sbr.rel (!%p90_p6) target bundleno = 84 (0x54), region = 279 }
0x1631   :  { %4406 = vsyncpa [#allocation6], 1 }
0x1632   :  { %4408 = vsyncpa [#allocation6 + $0x1], 1 }
0x1633   :  { %4409 = vsyncpa [#allocation8], 1 }
0x1634   :  { %4410 = vsyncpa [#allocation11], 1 }
0x1635   :  { %4411 = vsyncpa [#allocation14], 1 }
0x1636   :  { %4412 = vsyncpa [#allocation17], 1 }
0x1637   :  { %4413 = vsyncpa [#allocation20], 1 }

</bundles_post_ra>
